<compile_context>
chip_gen: v6e
topology: v6e:2x2x1
jax: 0.10.0
libtpu: 0.0.40
codegen_flags: <defaults>
</compile_context>

<pallas_src>
import functools

import jax
import jax.numpy as jnp
from jax import lax
from jax.experimental import pallas as pl
from jax.experimental.pallas import tpu as pltpu


def _pick_tile_h(h, w, cin, cpad, budget_bytes=20 * 1024 * 1024):
  """Largest row tile dividing H whose per-step working set fits the budget."""
  candidates = [h] + [t for t in (64, 32, 16, 8) if t < h and h % t == 0]
  for th in candidates:
    rows = th * w
    # out block + f32 accumulator + 3 double-buffered bf16 input tiles.
    vmem = 2 * rows * cpad * 4 + 3 * 2 * th * (w + 2) * cin * 2
    if vmem <= budget_bytes:
      return th
  return candidates[-1]


def _scale_pred_kernel(x0_ref, x1_ref, x2_ref, w1_ref, shift_ref, w2_ref,
                       b2_ref, o_ref, acc_ref):
  # x{0,1,2}_ref: (1, TH, W+2, Cin) bf16 — dy-shifted padded row tiles.
  # w1_ref:       (3, 3, Cin, TC1)  bf16 — 3x3 weights with BN scale folded in.
  # shift_ref:    (1, TC1) f32          — folded BatchNorm shift.
  # w2_ref:       (TC1, Cpad) bf16      — 1x1 weights (output-channel padded).
  # b2_ref:       (1, Cpad) f32         — 1x1 bias (padded).
  # o_ref:        (1, TH*W, Cpad) f32   — flattened-rows, lane-dense output.
  # acc_ref:      (TH*W, Cpad) f32      — VMEM accumulator over C1 tiles.
  c = pl.program_id(2)

  @pl.when(c == 0)
  def _init():
    acc_ref[...] = jnp.zeros_like(acc_ref)

  th = x0_ref.shape[1]
  wp = x0_ref.shape[2]
  cin = x0_ref.shape[3]
  w_out = wp - 2
  tc1 = w1_ref.shape[3]
  rows = th * w_out

  x_dy = (x0_ref[0], x1_ref[0], x2_ref[0])  # each (TH, W+2, Cin) bf16

  # 3x3 conv for this C1 tile as 9 flattened (rows, Cin) x (Cin, TC1) matmuls.
  conv = jnp.zeros((rows, tc1), jnp.float32)
  for dy in range(3):
    xs = x_dy[dy]
    for dx in range(3):
      patch = xs[:, dx:dx + w_out, :].reshape(rows, cin)
      conv = conv + jnp.dot(patch, w1_ref[dy, dx],
                            preferred_element_type=jnp.float32)

  # Folded BatchNorm shift (scale already folded into w1) + LeakyReLU(0.1).
  h = conv + shift_ref[0]
  h = jnp.maximum(h, 0.1 * h)

  # Partial 1x1 conv for this C1 tile, accumulated in f32 VMEM scratch.
  acc_ref[...] += jnp.dot(h.astype(jnp.bfloat16), w2_ref[...],
                          preferred_element_type=jnp.float32)

  @pl.when(c == pl.num_programs(2) - 1)
  def _finalize():
    o_ref[0] = acc_ref[...] + b2_ref[...]


@functools.partial(jax.jit, static_argnames=("num_classes",))
def scale_prediction(x_nchw, params, *, num_classes):
  """Forward pass of ScalePrediction. x_nchw: (N, Cin, H, W) float32."""
  w1, gamma, beta, run_mean, run_var, w2, b2 = params
  eps = 1e-5

  # Fold BatchNorm (eval semantics): scale goes into w1, shift stays.
  scale = gamma * lax.rsqrt(run_var + eps)               # (C1,)
  shift = (beta - run_mean * scale).astype(jnp.float32)  # (C1,)
  w1f = (w1 * scale[None, None, None, :]).astype(jnp.bfloat16)

  N, Cin, H, W = x_nchw.shape
  C1 = w1.shape[3]
  Cout = w2.shape[1]
  assert Cout == 3 * (num_classes + 5)

  # Pad output channels to a multiple of 128 for lane-dense (unmasked) stores.
  cpad = ((Cout + 127) // 128) * 128
  w2p = jnp.zeros((C1, cpad), jnp.bfloat16).at[:, :Cout].set(
      w2.astype(jnp.bfloat16))
  b2p = jnp.zeros((1, cpad), jnp.float32).at[0, :Cout].set(b2)

  # NCHW -> NHWC, bf16, spatial pad=1 for the 3x3 conv.
  x = jnp.transpose(x_nchw, (0, 2, 3, 1)).astype(jnp.bfloat16)
  xp = jnp.pad(x, ((0, 0), (1, 1), (1, 1), (0, 0)))
  Wp = W + 2
  # Three dy-shifted views (non-overlapping row blocks -> no halo needed in
  # the BlockSpecs; XLA fuses pad+slice around the custom call).
  x0 = xp[:, 0:H]
  x1 = xp[:, 1:H + 1]
  x2 = xp[:, 2:H + 2]

  TH = _pick_tile_h(H, W, Cin, cpad)
  TC1 = 256 if C1 % 256 == 0 else C1
  grid = (N, H // TH, C1 // TC1)

  out = pl.pallas_call(
      _scale_pred_kernel,
      out_shape=jax.ShapeDtypeStruct((N, H * W, cpad), jnp.float32),
      grid=grid,
      in_specs=[
          pl.BlockSpec((1, TH, Wp, Cin), lambda n, h, c: (n, h, 0, 0)),
          pl.BlockSpec((1, TH, Wp, Cin), lambda n, h, c: (n, h, 0, 0)),
          pl.BlockSpec((1, TH, Wp, Cin), lambda n, h, c: (n, h, 0, 0)),
          pl.BlockSpec((3, 3, Cin, TC1), lambda n, h, c: (0, 0, 0, c)),
          pl.BlockSpec((1, TC1), lambda n, h, c: (0, c)),
          pl.BlockSpec((TC1, cpad), lambda n, h, c: (c, 0)),
          pl.BlockSpec((1, cpad), lambda n, h, c: (0, 0)),
      ],
      out_specs=pl.BlockSpec((1, TH * W, cpad), lambda n, h, c: (n, h, 0)),
      scratch_shapes=[pltpu.VMEM((TH * W, cpad), jnp.float32)],
      compiler_params=pltpu.CompilerParams(
          dimension_semantics=("parallel", "parallel", "arbitrary"),
          vmem_limit_bytes=48 * 1024 * 1024),
      cost_estimate=pl.CostEstimate(
          flops=2 * N * H * W * (9 * Cin * C1 + C1 * cpad),
          transcendentals=0,
          bytes_accessed=(3 * N * H * Wp * Cin * 2 + 9 * Cin * C1 * 2
                          + C1 * cpad * 2 + cpad * 4
                          + N * H * W * cpad * 4)),
  )(x0, x1, x2, w1f, shift.reshape(1, C1), w2p, b2p)

  # Slice off channel padding BEFORE reshaping into per-anchor slots, then do
  # the PyTorch reshape+permute in XLA: (N,H,W,3*(nc+5)) -> (N,3,H,W,nc+5).
  out = out[:, :, :Cout].reshape(N, H, W, 3, num_classes + 5)
  return jnp.transpose(out, (0, 3, 1, 2, 4))


def _reference(x_nchw, params, num_classes):
  """Pure-JAX f32 reference with the same semantics (for validation)."""
  w1, gamma, beta, run_mean, run_var, w2, b2 = params
  eps = 1e-5
  x = jnp.transpose(x_nchw, (0, 2, 3, 1))
  h = lax.conv_general_dilated(
      x, w1, window_strides=(1, 1), padding="SAME",
      dimension_numbers=("NHWC", "HWIO", "NHWC"))
  h = (h - run_mean) / jnp.sqrt(run_var + eps) * gamma + beta
  h = jnp.where(h > 0, h, 0.1 * h)
  o = lax.conv_general_dilated(
      h, w2[None, None], window_strides=(1, 1), padding="VALID",
      dimension_numbers=("NHWC", "HWIO", "NHWC")) + b2
  N, H, W, _ = x.shape
  o = o.reshape(N, H, W, 3, num_classes + 5)
  return jnp.transpose(o, (0, 3, 1, 2, 4))


if __name__ == "__main__":
  # Small shapes consistent with the module.
  N, Cin, H, W = 2, 4, 16, 16
  num_classes = 4
  C1 = 2 * Cin                       # first CNNBlock out channels
  Cout = 3 * (num_classes + 5)       # second CNNBlock out channels

  key = jax.random.PRNGKey(0)
  k = jax.random.split(key, 8)
  x = jax.random.normal(k[0], (N, Cin, H, W), jnp.float32)

  # Deterministic parameter init (synthetic; no checkpoint load).
  w1 = jax.random.normal(k[1], (3, 3, Cin, C1), jnp.float32) * 0.1   # HWIO
  gamma = 1.0 + 0.1 * jax.random.normal(k[2], (C1,), jnp.float32)
  beta = 0.1 * jax.random.normal(k[3], (C1,), jnp.float32)
  run_mean = 0.1 * jax.random.normal(k[4], (C1,), jnp.float32)
  run_var = jnp.abs(1.0 + 0.1 * jax.random.normal(k[5], (C1,), jnp.float32))
  w2 = jax.random.normal(k[6], (C1, Cout), jnp.float32) * 0.1
  b2 = 0.1 * jax.random.normal(k[7], (Cout,), jnp.float32)

  params = (w1, gamma, beta, run_mean, run_var, w2, b2)

  out = scale_prediction(x, params, num_classes=num_classes)
  out = jax.block_until_ready(out)

  ref = _reference(x, params, num_classes)
  assert out.shape == (N, 3, H, W, num_classes + 5), out.shape
  # bf16 MXU inputs -> compare against the f32 reference with bf16 tolerance.
  max_err = float(jnp.max(jnp.abs(out - ref)))
  assert jnp.allclose(out, ref, atol=5e-2, rtol=5e-2), max_err

  print("KERNEL_OK")
</pallas_src>

<mosaic_0001>
module attributes {stable_mosaic.version = 11 : i64} {
  func.func @_scale_pred_kernel(%arg0: i32, %arg1: i32, %arg2: i32, %arg3: memref<1x16x18x4xbf16, #tpu.memory_space<vmem>>, %arg4: memref<1x16x18x4xbf16, #tpu.memory_space<vmem>>, %arg5: memref<1x16x18x4xbf16, #tpu.memory_space<vmem>>, %arg6: memref<3x3x4x8xbf16, #tpu.memory_space<vmem>>, %arg7: memref<1x8xf32, #tpu.memory_space<vmem>>, %arg8: memref<8x128xbf16, #tpu.memory_space<vmem>>, %arg9: memref<1x128xf32, #tpu.memory_space<vmem>>, %arg10: memref<1x256x128xf32, #tpu.memory_space<vmem>>, %arg11: memref<256x128xf32, #tpu.memory_space<vmem>>) attributes {dimension_semantics = [#tpu.dimension_semantics<parallel>, #tpu.dimension_semantics<parallel>, #tpu.dimension_semantics<arbitrary>], iteration_bounds = array<i64: 2, 1, 1>, scalar_prefetch = 0 : i64, scratch_operands = 1 : i64, tpu.core_type = #tpu.core_type<tc>, window_params = [{transform_indices = @transform_0, window_bounds = array<i64: 1, 16, 18, 4>}, {transform_indices = @transform_1, window_bounds = array<i64: 1, 16, 18, 4>}, {transform_indices = @transform_2, window_bounds = array<i64: 1, 16, 18, 4>}, {transform_indices = @transform_3, window_bounds = array<i64: 3, 3, 4, 8>}, {transform_indices = @transform_4, window_bounds = array<i64: 1, 8>}, {transform_indices = @transform_5, window_bounds = array<i64: 8, 128>}, {pipeline_mode = #tpu.pipeline_mode<synchronous>, transform_indices = @transform_6, window_bounds = array<i64: 1, 128>}, {transform_indices = @transform_7, window_bounds = array<i64: 1, 256, 128>}]} {
    %c0_i32 = arith.constant 0 : i32
    %0 = arith.cmpi eq, %arg2, %c0_i32 : i32
    %1 = arith.extui %0 : i1 to i32
    %c0_i32_0 = arith.constant 0 : i32
    %2 = arith.cmpi ne, %1, %c0_i32_0 : i32
    scf.if %2 {
      %cst_67 = arith.constant 0.000000e+00 : f32
      %81 = vector.broadcast %cst_67 : f32 to vector<256x128xf32>
      %c0_68 = arith.constant 0 : index
      %c0_69 = arith.constant 0 : index
      %82 = vector.load %arg11[%c0_68, %c0_69] : memref<256x128xf32, #tpu.memory_space<vmem>>, vector<256x128xf32>
      tpu.vector_store %arg11[%c0_68, %c0_69], %81 {strides = array<i32>} : memref<256x128xf32, #tpu.memory_space<vmem>>, vector<256x128xf32>,
    } else {
    }
    %c0 = arith.constant 0 : index
    %c0_1 = arith.constant 0 : index
    %c0_2 = arith.constant 0 : index
    %c0_3 = arith.constant 0 : index
    %3 = vector.load %arg3[%c0, %c0_1, %c0_2, %c0_3] : memref<1x16x18x4xbf16, #tpu.memory_space<vmem>>, vector<1x16x18x4xbf16>
    %4 = vector.shape_cast %3 : vector<1x16x18x4xbf16> to vector<16x18x4xbf16>
    %c0_4 = arith.constant 0 : index
    %c0_5 = arith.constant 0 : index
    %c0_6 = arith.constant 0 : index
    %c0_7 = arith.constant 0 : index
    %5 = vector.load %arg4[%c0_4, %c0_5, %c0_6, %c0_7] : memref<1x16x18x4xbf16, #tpu.memory_space<vmem>>, vector<1x16x18x4xbf16>
    %6 = vector.shape_cast %5 : vector<1x16x18x4xbf16> to vector<16x18x4xbf16>
    %c0_8 = arith.constant 0 : index
    %c0_9 = arith.constant 0 : index
    %c0_10 = arith.constant 0 : index
    %c0_11 = arith.constant 0 : index
    %7 = vector.load %arg5[%c0_8, %c0_9, %c0_10, %c0_11] : memref<1x16x18x4xbf16, #tpu.memory_space<vmem>>, vector<1x16x18x4xbf16>
    %8 = vector.shape_cast %7 : vector<1x16x18x4xbf16> to vector<16x18x4xbf16>
    %cst = arith.constant 0.000000e+00 : f32
    %9 = vector.broadcast %cst : f32 to vector<256x8xf32>
    %10 = vector.extract_strided_slice %4 {offsets = [0, 0, 0], sizes = [16, 16, 4], strides = [1, 1, 1]} : vector<16x18x4xbf16> to vector<16x16x4xbf16>
    %11 = vector.shape_cast %10 : vector<16x16x4xbf16> to vector<256x4xbf16>
    %c0_12 = arith.constant 0 : index
    %c0_13 = arith.constant 0 : index
    %c0_14 = arith.constant 0 : index
    %c0_15 = arith.constant 0 : index
    %12 = vector.load %arg6[%c0_12, %c0_13, %c0_14, %c0_15] : memref<3x3x4x8xbf16, #tpu.memory_space<vmem>>, vector<1x1x4x8xbf16>
    %13 = vector.shape_cast %12 : vector<1x1x4x8xbf16> to vector<4x8xbf16>
    %cst_16 = arith.constant dense<0.000000e+00> : vector<256x8xf32>
    %14 = tpu.matmul %11, %13, %cst_16 {dimension_numbers = #tpu.dot_dimension_numbers<[1], [0], [0], [1], [0, 0, 1, 1], [], []>} : vector<256x4xbf16>, vector<4x8xbf16>, vector<256x8xf32> -> vector<256x8xf32>
    %15 = arith.addf %9, %14 : vector<256x8xf32>
    %16 = vector.extract_strided_slice %4 {offsets = [0, 1, 0], sizes = [16, 16, 4], strides = [1, 1, 1]} : vector<16x18x4xbf16> to vector<16x16x4xbf16>
    %17 = vector.shape_cast %16 : vector<16x16x4xbf16> to vector<256x4xbf16>
    %c0_17 = arith.constant 0 : index
    %c1 = arith.constant 1 : index
    %c0_18 = arith.constant 0 : index
    %c0_19 = arith.constant 0 : index
    %18 = vector.load %arg6[%c0_17, %c1, %c0_18, %c0_19] : memref<3x3x4x8xbf16, #tpu.memory_space<vmem>>, vector<1x1x4x8xbf16>
    %19 = vector.shape_cast %18 : vector<1x1x4x8xbf16> to vector<4x8xbf16>
    %cst_20 = arith.constant dense<0.000000e+00> : vector<256x8xf32>
    %20 = tpu.matmul %17, %19, %cst_20 {dimension_numbers = #tpu.dot_dimension_numbers<[1], [0], [0], [1], [0, 0, 1, 1], [], []>} : vector<256x4xbf16>, vector<4x8xbf16>, vector<256x8xf32> -> vector<256x8xf32>
    %21 = arith.addf %15, %20 : vector<256x8xf32>
    %22 = vector.extract_strided_slice %4 {offsets = [0, 2, 0], sizes = [16, 16, 4], strides = [1, 1, 1]} : vector<16x18x4xbf16> to vector<16x16x4xbf16>
    %23 = vector.shape_cast %22 : vector<16x16x4xbf16> to vector<256x4xbf16>
    %c0_21 = arith.constant 0 : index
    %c2 = arith.constant 2 : index
    %c0_22 = arith.constant 0 : index
    %c0_23 = arith.constant 0 : index
    %24 = vector.load %arg6[%c0_21, %c2, %c0_22, %c0_23] : memref<3x3x4x8xbf16, #tpu.memory_space<vmem>>, vector<1x1x4x8xbf16>
    %25 = vector.shape_cast %24 : vector<1x1x4x8xbf16> to vector<4x8xbf16>
    %cst_24 = arith.constant dense<0.000000e+00> : vector<256x8xf32>
    %26 = tpu.matmul %23, %25, %cst_24 {dimension_numbers = #tpu.dot_dimension_numbers<[1], [0], [0], [1], [0, 0, 1, 1], [], []>} : vector<256x4xbf16>, vector<4x8xbf16>, vector<256x8xf32> -> vector<256x8xf32>
    %27 = arith.addf %21, %26 : vector<256x8xf32>
    %28 = vector.extract_strided_slice %6 {offsets = [0, 0, 0], sizes = [16, 16, 4], strides = [1, 1, 1]} : vector<16x18x4xbf16> to vector<16x16x4xbf16>
    %29 = vector.shape_cast %28 : vector<16x16x4xbf16> to vector<256x4xbf16>
    %c1_25 = arith.constant 1 : index
    %c0_26 = arith.constant 0 : index
    %c0_27 = arith.constant 0 : index
    %c0_28 = arith.constant 0 : index
    %30 = vector.load %arg6[%c1_25, %c0_26, %c0_27, %c0_28] : memref<3x3x4x8xbf16, #tpu.memory_space<vmem>>, vector<1x1x4x8xbf16>
    %31 = vector.shape_cast %30 : vector<1x1x4x8xbf16> to vector<4x8xbf16>
    %cst_29 = arith.constant dense<0.000000e+00> : vector<256x8xf32>
    %32 = tpu.matmul %29, %31, %cst_29 {dimension_numbers = #tpu.dot_dimension_numbers<[1], [0], [0], [1], [0, 0, 1, 1], [], []>} : vector<256x4xbf16>, vector<4x8xbf16>, vector<256x8xf32> -> vector<256x8xf32>
    %33 = arith.addf %27, %32 : vector<256x8xf32>
    %34 = vector.extract_strided_slice %6 {offsets = [0, 1, 0], sizes = [16, 16, 4], strides = [1, 1, 1]} : vector<16x18x4xbf16> to vector<16x16x4xbf16>
    %35 = vector.shape_cast %34 : vector<16x16x4xbf16> to vector<256x4xbf16>
    %c1_30 = arith.constant 1 : index
    %c1_31 = arith.constant 1 : index
    %c0_32 = arith.constant 0 : index
    %c0_33 = arith.constant 0 : index
    %36 = vector.load %arg6[%c1_30, %c1_31, %c0_32, %c0_33] : memref<3x3x4x8xbf16, #tpu.memory_space<vmem>>, vector<1x1x4x8xbf16>
    %37 = vector.shape_cast %36 : vector<1x1x4x8xbf16> to vector<4x8xbf16>
    %cst_34 = arith.constant dense<0.000000e+00> : vector<256x8xf32>
    %38 = tpu.matmul %35, %37, %cst_34 {dimension_numbers = #tpu.dot_dimension_numbers<[1], [0], [0], [1], [0, 0, 1, 1], [], []>} : vector<256x4xbf16>, vector<4x8xbf16>, vector<256x8xf32> -> vector<256x8xf32>
    %39 = arith.addf %33, %38 : vector<256x8xf32>
    %40 = vector.extract_strided_slice %6 {offsets = [0, 2, 0], sizes = [16, 16, 4], strides = [1, 1, 1]} : vector<16x18x4xbf16> to vector<16x16x4xbf16>
    %41 = vector.shape_cast %40 : vector<16x16x4xbf16> to vector<256x4xbf16>
    %c1_35 = arith.constant 1 : index
    %c2_36 = arith.constant 2 : index
    %c0_37 = arith.constant 0 : index
    %c0_38 = arith.constant 0 : index
    %42 = vector.load %arg6[%c1_35, %c2_36, %c0_37, %c0_38] : memref<3x3x4x8xbf16, #tpu.memory_space<vmem>>, vector<1x1x4x8xbf16>
    %43 = vector.shape_cast %42 : vector<1x1x4x8xbf16> to vector<4x8xbf16>
    %cst_39 = arith.constant dense<0.000000e+00> : vector<256x8xf32>
    %44 = tpu.matmul %41, %43, %cst_39 {dimension_numbers = #tpu.dot_dimension_numbers<[1], [0], [0], [1], [0, 0, 1, 1], [], []>} : vector<256x4xbf16>, vector<4x8xbf16>, vector<256x8xf32> -> vector<256x8xf32>
    %45 = arith.addf %39, %44 : vector<256x8xf32>
    %46 = vector.extract_strided_slice %8 {offsets = [0, 0, 0], sizes = [16, 16, 4], strides = [1, 1, 1]} : vector<16x18x4xbf16> to vector<16x16x4xbf16>
    %47 = vector.shape_cast %46 : vector<16x16x4xbf16> to vector<256x4xbf16>
    %c2_40 = arith.constant 2 : index
    %c0_41 = arith.constant 0 : index
    %c0_42 = arith.constant 0 : index
    %c0_43 = arith.constant 0 : index
    %48 = vector.load %arg6[%c2_40, %c0_41, %c0_42, %c0_43] : memref<3x3x4x8xbf16, #tpu.memory_space<vmem>>, vector<1x1x4x8xbf16>
    %49 = vector.shape_cast %48 : vector<1x1x4x8xbf16> to vector<4x8xbf16>
    %cst_44 = arith.constant dense<0.000000e+00> : vector<256x8xf32>
    %50 = tpu.matmul %47, %49, %cst_44 {dimension_numbers = #tpu.dot_dimension_numbers<[1], [0], [0], [1], [0, 0, 1, 1], [], []>} : vector<256x4xbf16>, vector<4x8xbf16>, vector<256x8xf32> -> vector<256x8xf32>
    %51 = arith.addf %45, %50 : vector<256x8xf32>
    %52 = vector.extract_strided_slice %8 {offsets = [0, 1, 0], sizes = [16, 16, 4], strides = [1, 1, 1]} : vector<16x18x4xbf16> to vector<16x16x4xbf16>
    %53 = vector.shape_cast %52 : vector<16x16x4xbf16> to vector<256x4xbf16>
    %c2_45 = arith.constant 2 : index
    %c1_46 = arith.constant 1 : index
    %c0_47 = arith.constant 0 : index
    %c0_48 = arith.constant 0 : index
    %54 = vector.load %arg6[%c2_45, %c1_46, %c0_47, %c0_48] : memref<3x3x4x8xbf16, #tpu.memory_space<vmem>>, vector<1x1x4x8xbf16>
    %55 = vector.shape_cast %54 : vector<1x1x4x8xbf16> to vector<4x8xbf16>
    %cst_49 = arith.constant dense<0.000000e+00> : vector<256x8xf32>
    %56 = tpu.matmul %53, %55, %cst_49 {dimension_numbers = #tpu.dot_dimension_numbers<[1], [0], [0], [1], [0, 0, 1, 1], [], []>} : vector<256x4xbf16>, vector<4x8xbf16>, vector<256x8xf32> -> vector<256x8xf32>
    %57 = arith.addf %51, %56 : vector<256x8xf32>
    %58 = vector.extract_strided_slice %8 {offsets = [0, 2, 0], sizes = [16, 16, 4], strides = [1, 1, 1]} : vector<16x18x4xbf16> to vector<16x16x4xbf16>
    %59 = vector.shape_cast %58 : vector<16x16x4xbf16> to vector<256x4xbf16>
    %c2_50 = arith.constant 2 : index
    %c2_51 = arith.constant 2 : index
    %c0_52 = arith.constant 0 : index
    %c0_53 = arith.constant 0 : index
    %60 = vector.load %arg6[%c2_50, %c2_51, %c0_52, %c0_53] : memref<3x3x4x8xbf16, #tpu.memory_space<vmem>>, vector<1x1x4x8xbf16>
    %61 = vector.shape_cast %60 : vector<1x1x4x8xbf16> to vector<4x8xbf16>
    %cst_54 = arith.constant dense<0.000000e+00> : vector<256x8xf32>
    %62 = tpu.matmul %59, %61, %cst_54 {dimension_numbers = #tpu.dot_dimension_numbers<[1], [0], [0], [1], [0, 0, 1, 1], [], []>} : vector<256x4xbf16>, vector<4x8xbf16>, vector<256x8xf32> -> vector<256x8xf32>
    %63 = arith.addf %57, %62 : vector<256x8xf32>
    %c0_55 = arith.constant 0 : index
    %c0_56 = arith.constant 0 : index
    %64 = vector.load %arg7[%c0_55, %c0_56] : memref<1x8xf32, #tpu.memory_space<vmem>>, vector<1x8xf32>
    %65 = vector.shape_cast %64 : vector<1x8xf32> to vector<8xf32>
    %66 = vector.shape_cast %65 : vector<8xf32> to vector<1x8xf32>
    %67 = vector.broadcast %66 : vector<1x8xf32> to vector<256x8xf32>
    %68 = arith.addf %63, %67 : vector<256x8xf32>
    %cst_57 = arith.constant 1.000000e-01 : f32
    %69 = vector.broadcast %cst_57 : f32 to vector<256x8xf32>
    %70 = arith.mulf %69, %68 : vector<256x8xf32>
    %71 = arith.maximumf %68, %70 : vector<256x8xf32>
    %c0_58 = arith.constant 0 : index
    %c0_59 = arith.constant 0 : index
    %72 = vector.load %arg11[%c0_58, %c0_59] : memref<256x128xf32, #tpu.memory_space<vmem>>, vector<256x128xf32>
    %73 = arith.truncf %71 : vector<256x8xf32> to vector<256x8xbf16>
    %c0_60 = arith.constant 0 : index
    %c0_61 = arith.constant 0 : index
    %74 = vector.load %arg8[%c0_60, %c0_61] : memref<8x128xbf16, #tpu.memory_space<vmem>>, vector<8x128xbf16>
    %cst_62 = arith.constant dense<0.000000e+00> : vector<256x128xf32>
    %75 = tpu.matmul %73, %74, %cst_62 {dimension_numbers = #tpu.dot_dimension_numbers<[1], [0], [0], [1], [0, 0, 1, 1], [], []>} : vector<256x8xbf16>, vector<8x128xbf16>, vector<256x128xf32> -> vector<256x128xf32>
    %76 = arith.addf %72, %75 : vector<256x128xf32>
    %c0_63 = arith.constant 0 : index
    %c0_64 = arith.constant 0 : index
    %77 = vector.load %arg11[%c0_63, %c0_64] : memref<256x128xf32, #tpu.memory_space<vmem>>, vector<256x128xf32>
    tpu.vector_store %arg11[%c0_63, %c0_64], %76 {strides = array<i32>} : memref<256x128xf32, #tpu.memory_space<vmem>>, vector<256x128xf32>,
    %c0_i32_65 = arith.constant 0 : i32
    %78 = arith.cmpi eq, %arg2, %c0_i32_65 : i32
    %79 = arith.extui %78 : i1 to i32
    %c0_i32_66 = arith.constant 0 : i32
    %80 = arith.cmpi ne, %79, %c0_i32_66 : i32
    scf.if %80 {
      %c0_67 = arith.constant 0 : index
      %c0_68 = arith.constant 0 : index
      %81 = vector.load %arg11[%c0_67, %c0_68] : memref<256x128xf32, #tpu.memory_space<vmem>>, vector<256x128xf32>
      %c0_69 = arith.constant 0 : index
      %c0_70 = arith.constant 0 : index
      %82 = vector.load %arg9[%c0_69, %c0_70] : memref<1x128xf32, #tpu.memory_space<vmem>>, vector<1x128xf32>
      %83 = vector.broadcast %82 : vector<1x128xf32> to vector<256x128xf32>
      %84 = arith.addf %81, %83 : vector<256x128xf32>
      %c0_71 = arith.constant 0 : index
      %c0_72 = arith.constant 0 : index
      %c0_73 = arith.constant 0 : index
      %85 = vector.load %arg10[%c0_71, %c0_72, %c0_73] : memref<1x256x128xf32, #tpu.memory_space<vmem>>, vector<1x256x128xf32>
      %86 = vector.shape_cast %85 : vector<1x256x128xf32> to vector<256x128xf32>
      %87 = vector.shape_cast %84 : vector<256x128xf32> to vector<1x256x128xf32>
      tpu.vector_store %arg10[%c0_71, %c0_72, %c0_73], %87 {strides = array<i32>} : memref<1x256x128xf32, #tpu.memory_space<vmem>>, vector<1x256x128xf32>,
    } else {
    }
    return
  }
  func.func @transform_0(%arg0: i32, %arg1: i32, %arg2: i32) -> (i32, i32, i32, i32) {
    %c0_i32 = arith.constant 0 : i32
    %c0_i32_0 = arith.constant 0 : i32
    %c0_i32_1 = arith.constant 0 : i32
    return %arg0, %arg1, %c0_i32, %c0_i32_0 : i32, i32, i32, i32
  }
  func.func @transform_1(%arg0: i32, %arg1: i32, %arg2: i32) -> (i32, i32, i32, i32) {
    %c0_i32 = arith.constant 0 : i32
    %c0_i32_0 = arith.constant 0 : i32
    %c0_i32_1 = arith.constant 0 : i32
    return %arg0, %arg1, %c0_i32, %c0_i32_0 : i32, i32, i32, i32
  }
  func.func @transform_2(%arg0: i32, %arg1: i32, %arg2: i32) -> (i32, i32, i32, i32) {
    %c0_i32 = arith.constant 0 : i32
    %c0_i32_0 = arith.constant 0 : i32
    %c0_i32_1 = arith.constant 0 : i32
    return %arg0, %arg1, %c0_i32, %c0_i32_0 : i32, i32, i32, i32
  }
  func.func @transform_3(%arg0: i32, %arg1: i32, %arg2: i32) -> (i32, i32, i32, i32) {
    %c0_i32 = arith.constant 0 : i32
    %c0_i32_0 = arith.constant 0 : i32
    %c0_i32_1 = arith.constant 0 : i32
    %c0_i32_2 = arith.constant 0 : i32
    return %c0_i32, %c0_i32_0, %c0_i32_1, %arg2 : i32, i32, i32, i32
  }
  func.func @transform_4(%arg0: i32, %arg1: i32, %arg2: i32) -> (i32, i32) {
    %c0_i32 = arith.constant 0 : i32
    %c0_i32_0 = arith.constant 0 : i32
    return %c0_i32, %arg2 : i32, i32
  }
  func.func @transform_5(%arg0: i32, %arg1: i32, %arg2: i32) -> (i32, i32) {
    %c0_i32 = arith.constant 0 : i32
    %c0_i32_0 = arith.constant 0 : i32
    return %arg2, %c0_i32 : i32, i32
  }
  func.func @transform_6(%arg0: i32, %arg1: i32, %arg2: i32) -> (i32, i32) {
    %c0_i32 = arith.constant 0 : i32
    %c0_i32_0 = arith.constant 0 : i32
    %c0_i32_1 = arith.constant 0 : i32
    return %c0_i32, %c0_i32_0 : i32, i32
  }
  func.func @transform_7(%arg0: i32, %arg1: i32, %arg2: i32) -> (i32, i32, i32) {
    %c0_i32 = arith.constant 0 : i32
    %c0_i32_0 = arith.constant 0 : i32
    return %arg0, %arg1, %c0_i32 : i32, i32, i32
  }
}

</mosaic_0001>

<bundles_post_ra>
// kernel: scale_prediction.1
= control target key start
LH: loop header
LB: loop body
LE: loop exit
PB: predicated region body
PF: predicated region fallthrough
CT: control target
= control target key end

     0   :  { %s6604_s24 = smov 0   ;;  %s6606_s25 = smov 0   ;;  %s9112_s0 = inlined_call_operand.vmem [shape: bf16[2,16,18,4], index: 0, kind: input, shape index: {}]   ;;  %s9113_s1 = inlined_call_operand.vmem [shape: bf16[2,16,18,4], index: 1, kind: input, shape index: {}]   ;;  %s9114_s2 = inlined_call_operand.vmem [shape: bf16[2,16,18,4], index: 2, kind: input, shape index: {}]   ;;  %s9115_s3 = inlined_call_operand.vmem [shape: bf16[3,3,4,8], index: 3, kind: input, shape index: {}]   ;;  %s9116_s4 = inlined_call_operand.vmem [shape: f32[1,8], index: 4, kind: input, shape index: {}]   ;;  %s9117_s5 = inlined_call_operand.vmem [shape: bf16[8,128], index: 5, kind: input, shape index: {}]   ;;  %s9118_s6 = inlined_call_operand.vmem [shape: f32[1,128], index: 6, kind: input, shape index: {}]   ;;  %s9119_s7 = inlined_call_operand.vmem [shape: f32[2,256,128], index: 7, kind: output, shape index: {}]  }
   0x1   :  { %s6608_s26 = smov 0  }
   0x2 LB: > { %s36_s27 = sadd.s32 1, %s6558_s25  ;;  %p5576_p0 = scmp.ge.s32.totalorder %s6562_s26, 1  ;;  %s6562_s26 = sphi %s6608_s26, %s17_s26   ;;  %s6558_s25 = sphi %s6606_s25, %s9416_s25   ;;  %s6554_s24 = sphi %s6604_s24, %s9415_s24  }
   0x3   : > { %p38_p1 = scmp.ge.s32.totalorder %s36_s27, 2  ;;  %p328_p2 = scmp.lt.s32.totalorder %s6562_s26, 3 }
   0x5   : > { %s9418_s27 = smov (%p38_p1, %s36_s27), 0  ;;  %p329_p3 = pnand %p5576_p0, %p328_p2 }
   0x7   : > { %332 = sbr.rel (%p329_p3) target bundleno = 784 (0x310), region = 48 }
   0xc   : > { %v5582_v0 = vld [vmem:[%s9115_s3 + $0x2] sm:$0x3]  ;;  %vm1122_vm0 = vcmask 1041408   ;;  %v635_v1 = vld [vmem:[%s9115_s3] sm:$0x3]  ;;  %p401_p4 = scmp.lt.s32.totalorder %s6554_s24, 1 }
   0xd   : > { %6457 = vmatprep.subr.msk.bf16.mxu0 %vm1122_vm0, %v5582_v0  ;;  %v1124_v2 = vsel %vm1122_vm0, %v5582_v0, 0  ;;  %6458 = vmatprep.subr.msk.bf16.mxu1 %vm1122_vm0, %v635_v1  ;;  %v1416_v3 = vsel %vm1122_vm0, %v635_v1, 0  ;;  %v5663_v4 = vld [vmem:[%s9115_s3 + $0x4] sm:$0x3]  ;;  %v5696_v5 = vld [vmem:[%s9115_s3 + $0x6] sm:$0x3] }
   0xe   : > { %6118 = vmatpush3.bf16.msra.mxu0 %v1124_v2  ;;  %6152 = vmatpush3.bf16.msra.mxu1 %v1416_v3  ;;  %s9420_s24 = smov (!%p401_p4, %s6554_s24), 1  ;;  %v6645_v6 = vld [vmem:[%s9115_s3 + $0x8] sm:$0x3]  ;;  %vm636_vm1 = vsmask.f32 3328  ;;  %vm1073_vm3 = vcmask 31744  }
   0xf   : > { %6459 = vmatprep.subr.msk.bf16.mxu0 %vm1122_vm0, %v5663_v4  ;;  %6460 = vmatprep.subr.msk.bf16.mxu1 %vm1122_vm0, %v5696_v5  ;;  %s6648_s15 = smul.u32 192, %s9420_s24  ;;  %vm637_vm2 = vsmask.f32 7440  ;;  %v6657_v7 = vsel %vm1122_vm0, %v5663_v4, 0  ;;  %v2135_v8 = vsel %vm1122_vm0, %v5696_v5, 0  ;;  %v6662_v9 = vsel %vm1122_vm0, %v6645_v6, 0 }
  0x10   : > { %vm6701_vm4 = vmor %vm636_vm1, %vm637_vm2  ;;  %vm1595_vm5 = vcmask 1042432   ;;  %vm1596_vm6 = vcmask 1046532   ;;  %vm5057_vm8 = vcmask 1043456   ;;  %vm5008_vm9 = vcmask 64512  }
  0x11   : > { %s6654_s18 = scalar_lea.vmem %s9112_s0, %s6648_s15  ;;  %s7018_s23 = scalar_lea.vmem %s9113_s1, %s6648_s15  ;;  %vm7041_vm7 = vmor %vm1595_vm5, %vm1596_vm6 }
  0x12   : > { %v6665_v10 = vld [vmem:[%s6654_s18] sm:$0xf]  ;;  %v6668_v11 = vld [vmem:[%s6654_s18 + $0x4] sm:$0xf]  ;;  %v6671_v12 = vld [vmem:[%s6654_s18 + $0x8] sm:$0x1]  ;;  %s7867_s13 = scalar_lea.vmem %s9114_s2, %s6648_s15 }
  0x13   : > { %v640_v13 = vshrl.u32 %v6665_v10, 16  ;;  %v643_v14 = vshll.u32 %v6665_v10, 16  ;;  %v649_v15 = vshll.u32 %v6668_v11, 16  ;;  %v653_v16 = vshrl.u32 %v6668_v11, 16  ;;  %v6678_v17 = vld [vmem:[%s6654_s18 + $0xc] sm:$0xf] }
  0x14   : > { %v659_v18 = vshll.u32 %v6671_v12, 16  ;;  %v5615_v20 = vcombine.low %v6665_v10, %v6668_v11  ;;  %v6685_v21 = vld [vmem:[%s6654_s18 + $0x10] sm:$0xf]  ;;  %v6688_v22 = vld [vmem:[%s6654_s18 + $0x14] sm:$0x1]  ;;  %v664_v28 = vshrl.u32 %v6678_v17, 16 }
  0x15   : > { %v642_v23 = vrot.slane %v640_v13, 4  ;;  %v645_v24 = vrot.slane %v643_v14, 5  ;;  %v651_v25 = vrot.slane %v649_v15, 5  ;;  %v655_v26 = vrot.slane %v653_v16, 4  ;;  %v6697_v35 = vld [vmem:[%s6654_s18 + $0x18] sm:$0xf] }
  0x16   : > { %v661_v27 = vrot.slane %v659_v18, 5  ;;  %6153 = vmatprep.mubr.msk.bf16.mxu1 %vm1073_vm3, %v5615_v20  ;;  %v667_v29 = vshll.u32 %v6678_v17, 16  ;;  %v673_v30 = vshll.u32 %v6685_v21, 16  ;;  %v677_v33 = vshrl.u32 %v6685_v21, 16  ;;  %v6707_v45 = vld [vmem:[%s6654_s18 + $0x1c] sm:$0xf] }
  0x17   : > { %v646_v31 = vor.u32 %v645_v24, %v642_v23  ;;  %v656_v32 = vor.u32 %v655_v26, %v651_v25  ;;  %v683_v34 = vshll.u32 %v6688_v22, 16  ;;  %v666_v37 = vrot.slane %v664_v28, 4  ;;  %v6713_v49 = vld [vmem:[%s6654_s18 + $0x20] sm:$0x1]  ;;  %v6722_v55 = vld [vmem:[%s6654_s18 + $0x24] sm:$0xf] }
  0x18   : > { %v669_v38 = vrot.slane %v667_v29, 5  ;;  %v675_v39 = vrot.slane %v673_v30, 5  ;;  %v679_v43 = vrot.slane %v677_v33, 4  ;;  %v5616_v48 = vcombine.low %v6678_v17, %v6685_v21  ;;  %v6729_v0 = vld [vmem:[%s6654_s18 + $0x28] sm:$0xf] }
  0x19   : > { %v647_v41 = vrot.slane %v646_v31, 4  ;;  %v657_v42 = vrot.slane %v656_v32, 4  ;;  %v685_v44 = vrot.slane %v683_v34, 5  ;;  %v688_v50 = vshrl.u32 %v6697_v35, 16  ;;  %v6737_v4 = vld [vmem:[%s6654_s18 + $0x2c] sm:$0x1] }
  0x1a   : > { %v670_v46 = vor.u32 %v669_v38, %v666_v37  ;;  %v680_v53 = vor.u32 %v679_v43, %v675_v39  ;;  %v691_v54 = vshll.u32 %v6697_v35, 16  ;;  %6154 = vmatmul.mubr.msk.bf16.vlgmr.msra.gmra.mxu1 %vm1073_vm3, %v5616_v48  ;;  %v697_v59 = vshll.u32 %v6707_v45, 16  ;;  %v6743_v16 = vld [vmem:[%s6654_s18 + $0x30] sm:$0xf]  ;;  %v6751_v29 = vld [vmem:[%s6654_s18 + $0x34] sm:$0xf] }
  0x1b   : > { %v652_v51 = vsel %vm6701_vm4, %v647_v41, %v651_v25  ;;  %v662_v52 = vsel %vm6701_vm4, %v657_v42, %v661_v27  ;;  %v690_v58 = vrot.slane %v688_v50, 4  ;;  %v701_v62 = vshrl.u32 %v6707_v45, 16  ;;  %6220 = vmatpush3.bf16.msra.mxu1 %v2135_v8  ;;  %v6757_v33 = vld [vmem:[%s6654_s18 + $0x38] sm:$0x1] }
  0x1c   : > { %v5583_v56 = vcombine.low %v652_v51, %v662_v52  ;;  %v671_v57 = vrot.slane %v670_v46, 4  ;;  %v681_v60 = vrot.slane %v680_v53, 4  ;;  %v693_v61 = vrot.slane %v691_v54, 5  ;;  %v6773_v52 = vld [vmem:[%s6654_s18 + $0x3c] sm:$0xf] }
  0x1d   : > { %v707_v63 = vshll.u32 %v6713_v49, 16  ;;  %v699_v2 = vrot.slane %v697_v59, 5  ;;  %v5617_v3 = vcombine.low %v6697_v35, %v6707_v45  ;;  %v712_v5 = vshrl.u32 %v6722_v55, 16 }
  0x1e   : > { %6119 = vmatprep.mubr.msk.bf16.mxu0 %vm1073_vm3, %v5583_v56  ;;  %v676_v1 = vsel %vm6701_vm4, %v671_v57, %v675_v39  ;;  %v686_v13 = vsel %vm6701_vm4, %v681_v60, %v685_v44  ;;  %v694_v14 = vor.u32 %v693_v61, %v690_v58  ;;  %v703_v15 = vrot.slane %v701_v62, 4  ;;  %v6776_v58 = vld [vmem:[%s6654_s18 + $0x40] sm:$0xf] }
  0x1f   : > { %v709_v8 = vrot.slane %v707_v63, 5  ;;  %v5584_v18 = vcombine.low %v676_v1, %v686_v13  ;;  %6157 = vmatprep.mubr.msk.bf16.mxu1 %vm1073_vm3, %v5617_v3  ;;  %v714_v20 = vrot.slane %v712_v5, 4  ;;  %v715_v23 = vshll.u32 %v6722_v55, 16  ;;  %v6784_v1 = vld [vmem:[%s6654_s18 + $0x44] sm:$0x1] }
  0x20   : > { %v721_v24 = vshll.u32 %v6729_v0, 16  ;;  %v695_v25 = vrot.slane %v694_v14, 4  ;;  %v704_v26 = vor.u32 %v703_v15, %v699_v2  ;;  %v725_v27 = vshrl.u32 %v6729_v0, 16 }
  0x21   : > { %v731_v28 = vshll.u32 %v6737_v4, 16  ;;  %6120 = vmatmul.mubr.msk.bf16.vlgmr.msra.gmra.mxu0 %vm1073_vm3, %v5584_v18  ;;  %v717_v30 = vrot.slane %v715_v23, 5  ;;  %v5618_v32 = vcombine.low %v6722_v55, %v6729_v0  ;;  %v736_v34 = vshrl.u32 %v6743_v16, 16 }
  0x22   : > { %v723_v31 = vrot.slane %v721_v24, 5  ;;  %6186 = vmatpush3.bf16.msra.mxu0 %v6657_v7  ;;  %v700_v37 = vsel %vm6701_vm4, %v695_v25, %v699_v2  ;;  %v705_v38 = vrot.slane %v704_v26, 4  ;;  %v727_v39 = vrot.slane %v725_v27, 4 }
  0x23   : > { %v733_v41 = vrot.slane %v731_v28, 5  ;;  %v718_v42 = vor.u32 %v717_v30, %v714_v20  ;;  %6158 = vmatmul.mubr.msk.bf16.gmra.mxu1 %vm1073_vm3, %v5618_v32  ;;  %v738_v43 = vrot.slane %v736_v34, 4  ;;  %v739_v44 = vshll.u32 %v6743_v16, 16  ;;  %6461 = vmatprep.subr.msk.bf16.mxu0 %vm1122_vm0, %v6645_v6  ;;  %v6798_v30 = vld [vmem:[%s6654_s18 + $0x4c] sm:$0xf] }
  0x24   : > { %v745_v46 = vshll.u32 %v6751_v29, 16  ;;  %v710_v7 = vsel %vm6701_vm4, %v705_v38, %v709_v8  ;;  %v728_v48 = vor.u32 %v727_v39, %v723_v31  ;;  %v749_v50 = vshrl.u32 %v6751_v29, 16  ;;  %v6794_v8 = vld [vmem:[%s6654_s18 + $0x48] sm:$0xf] }
  0x25   : > { %v755_v51 = vshll.u32 %v6757_v33, 16  ;;  %v5585_v53 = vcombine.low %v700_v37, %v710_v7  ;;  %v719_v54 = vrot.slane %v718_v42, 4  ;;  %v741_v56 = vrot.slane %v739_v44, 5  ;;  %v6806_v37 = vld [vmem:[%s6654_s18 + $0x50] sm:$0x1] }
  0x26   : > { %v747_v57 = vrot.slane %v745_v46, 5  ;;  %v729_v59 = vrot.slane %v728_v48, 4  ;;  %v751_v6 = vrot.slane %v749_v50, 4  ;;  %v5619_v61 = vcombine.low %v6743_v16, %v6751_v29  ;;  %v6813_v44 = vld [vmem:[%s6654_s18 + $0x54] sm:$0xf] }
  0x27   : > { %v757_v60 = vrot.slane %v755_v51, 5  ;;  %6123 = vmatprep.mubr.msk.bf16.mxu0 %vm1073_vm3, %v5585_v53  ;;  %v724_v62 = vsel %vm6701_vm4, %v719_v54, %v723_v31  ;;  %v742_v63 = vor.u32 %v741_v56, %v738_v43  ;;  %v760_v2 = vshrl.u32 %v6773_v52, 16 }
  0x28   : > { %v763_v3 = vshll.u32 %v6773_v52, 16  ;;  %v734_v5 = vsel %vm6701_vm4, %v729_v59, %v733_v41  ;;  %v752_v13 = vor.u32 %v751_v6, %v747_v57  ;;  %6161 = vmatprep.mubr.msk.bf16.mxu1 %vm1073_vm3, %v5619_v61  ;;  %v769_v14 = vshll.u32 %v6776_v58, 16  ;;  %v6828_v61 = vld [vmem:[%s6654_s18 + $0x5c] sm:$0x1] }
  0x29   : > { %v773_v15 = vshrl.u32 %v6776_v58, 16  ;;  %v5586_v18 = vcombine.low %v724_v62, %v734_v5  ;;  %v743_v20 = vrot.slane %v742_v63, 4  ;;  %v762_v23 = vrot.slane %v760_v2, 4 }
  0x2a   : > { %v765_v24 = vrot.slane %v763_v3, 5  ;;  %v753_v25 = vrot.slane %v752_v13, 4  ;;  %v771_v26 = vrot.slane %v769_v14, 5  ;;  %v779_v28 = vshll.u32 %v6784_v1, 16  ;;  %v6834_v13 = vld [vmem:[%s6654_s18 + $0x60] sm:$0xf] }
  0x2b   : > { %v775_v27 = vrot.slane %v773_v15, 4  ;;  %6124 = vmatmul.mubr.msk.bf16.gmra.mxu0 %vm1073_vm3, %v5586_v18  ;;  %v748_v31 = vsel %vm6701_vm4, %v743_v20, %v747_v57  ;;  %v5620_v34 = vcombine.low %v6773_v52, %v6776_v58  ;;  %v784_v38 = vshrl.u32 %v6794_v8, 16  ;;  %v6820_v57 = vld [vmem:[%s6654_s18 + $0x58] sm:$0xf] }
  0x2c   : > { %v766_v32 = vor.u32 %v765_v24, %v762_v23  ;;  %v758_v39 = vsel %vm6701_vm4, %v753_v25, %v757_v60  ;;  %v781_v42 = vrot.slane %v779_v28, 5  ;;  %v787_v43 = vshll.u32 %v6794_v8, 16 }
  0x2d   : > { %v776_v41 = vor.u32 %v775_v27, %v771_v26  ;;  %v5587_v46 = vcombine.low %v748_v31, %v758_v39  ;;  %6162 = vmatmul.mubr.msk.bf16.gmra.mxu1 %vm1073_vm3, %v5620_v34  ;;  %v786_v48 = vrot.slane %v784_v38, 4  ;;  %v793_v50 = vshll.u32 %v6798_v30, 16  ;;  %v6842_v27 = vld [vmem:[%s6654_s18 + $0x64] sm:$0xf]  ;;  %v6848_v34 = vld [vmem:[%s6654_s18 + $0x68] sm:$0x1] }
  0x2e   : > { %v767_v7 = vrot.slane %v766_v32, 4  ;;  %v789_v53 = vrot.slane %v787_v43, 5  ;;  %v797_v54 = vshrl.u32 %v6798_v30, 16  ;;  %v803_v56 = vshll.u32 %v6806_v37, 16 }
  0x2f   : > { %v777_v51 = vrot.slane %v776_v41, 4  ;;  %6127 = vmatprep.mubr.msk.bf16.mxu0 %vm1073_vm3, %v5587_v46  ;;  %v795_v6 = vrot.slane %v793_v50, 5  ;;  %v5621_v60 = vcombine.low %v6794_v8, %v6798_v30  ;;  %v808_v62 = vshrl.u32 %v6813_v44, 16 }
  0x30   : > { %v772_v59 = vsel %vm6701_vm4, %v767_v7, %v771_v26  ;;  %v790_v2 = vor.u32 %v789_v53, %v786_v48  ;;  %v799_v3 = vrot.slane %v797_v54, 4  ;;  %v805_v5 = vrot.slane %v803_v56, 5 }
  0x31   : > { %v782_v63 = vsel %vm6701_vm4, %v777_v51, %v781_v42  ;;  %6165 = vmatprep.mubr.msk.bf16.mxu1 %vm1073_vm3, %v5621_v60  ;;  %v810_v15 = vrot.slane %v808_v62, 4  ;;  %v811_v18 = vshll.u32 %v6813_v44, 16  ;;  %v817_v20 = vshll.u32 %v6820_v57, 16 }
  0x32   : > { %v5588_v14 = vcombine.low %v772_v59, %v782_v63  ;;  %v791_v23 = vrot.slane %v790_v2, 4  ;;  %v800_v24 = vor.u32 %v799_v3, %v795_v6  ;;  %v821_v25 = vshrl.u32 %v6820_v57, 16  ;;  %v6861_v59 = vld [vmem:[%s6654_s18 + $0x6c] sm:$0xf]  ;;  %v6864_v2 = vld [vmem:[%s6654_s18 + $0x70] sm:$0xf] }
  0x33   : > { %v827_v26 = vshll.u32 %v6828_v61, 16  ;;  %v813_v28 = vrot.slane %v811_v18, 5  ;;  %v819_v31 = vrot.slane %v817_v20, 5  ;;  %v5622_v32 = vcombine.low %v6813_v44, %v6820_v57 }
  0x34   : > { %6128 = vmatmul.mubr.msk.bf16.gmra.mxu0 %vm1073_vm3, %v5588_v14  ;;  %v832_v38 = vshrl.u32 %v6834_v13, 16  ;;  %v796_v39 = vsel %vm6701_vm4, %v791_v23, %v795_v6  ;;  %v801_v41 = vrot.slane %v800_v24, 4  ;;  %v823_v42 = vrot.slane %v821_v25, 4  ;;  %v6872_v23 = vld [vmem:[%s6654_s18 + $0x74] sm:$0x1] }
  0x35   : > { %v829_v43 = vrot.slane %v827_v26, 5  ;;  %v814_v46 = vor.u32 %v813_v28, %v810_v15  ;;  %6166 = vmatmul.mubr.msk.bf16.gmra.mxu1 %vm1073_vm3, %v5622_v32  ;;  %v835_v48 = vshll.u32 %v6834_v13, 16  ;;  %v841_v50 = vshll.u32 %v6842_v27, 16 }
  0x36   : > { %v834_v7 = vrot.slane %v832_v38, 4  ;;  %v806_v51 = vsel %vm6701_vm4, %v801_v41, %v805_v5  ;;  %v824_v53 = vor.u32 %v823_v42, %v819_v31  ;;  %v845_v54 = vshrl.u32 %v6842_v27, 16 }
  0x37   : > { %v851_v56 = vshll.u32 %v6848_v34, 16  ;;  %v5589_v6 = vcombine.low %v796_v39, %v806_v51  ;;  %v815_v60 = vrot.slane %v814_v46, 4  ;;  %v837_v62 = vrot.slane %v835_v48, 5  ;;  %v6886_v51 = vld [vmem:[%s6654_s18 + $0x7c] sm:$0xf] }
  0x38   : > { %v843_v63 = vrot.slane %v841_v50, 5  ;;  %v825_v3 = vrot.slane %v824_v53, 4  ;;  %v847_v14 = vrot.slane %v845_v54, 4  ;;  %v5623_v5 = vcombine.low %v6834_v13, %v6842_v27 }
  0x39   : > { %v853_v15 = vrot.slane %v851_v56, 5  ;;  %6131 = vmatprep.mubr.msk.bf16.mxu0 %vm1073_vm3, %v5589_v6  ;;  %v820_v18 = vsel %vm6701_vm4, %v815_v60, %v819_v31  ;;  %v838_v20 = vor.u32 %v837_v62, %v834_v7  ;;  %v856_v24 = vshrl.u32 %v6861_v59, 16  ;;  %v6882_v31 = vld [vmem:[%s6654_s18 + $0x78] sm:$0xf]  ;;  %v6894_v6 = vld [vmem:[%s6654_s18 + $0x80] sm:$0x1] }
  0x3a   : > { %v859_v25 = vshll.u32 %v6861_v59, 16  ;;  %v830_v26 = vsel %vm6701_vm4, %v825_v3, %v829_v43  ;;  %v848_v28 = vor.u32 %v847_v14, %v843_v63  ;;  %6169 = vmatprep.mubr.msk.bf16.mxu1 %vm1073_vm3, %v5623_v5  ;;  %v865_v32 = vshll.u32 %v6864_v2, 16 }
  0x3b   : > { %v869_v38 = vshrl.u32 %v6864_v2, 16  ;;  %v5590_v39 = vcombine.low %v820_v18, %v830_v26  ;;  %v839_v41 = vrot.slane %v838_v20, 4  ;;  %v858_v42 = vrot.slane %v856_v24, 4  ;;  %v6901_v18 = vld [vmem:[%s6654_s18 + $0x84] sm:$0xf] }
  0x3c   : > { %v861_v46 = vrot.slane %v859_v25, 5  ;;  %v849_v7 = vrot.slane %v848_v28, 4  ;;  %v867_v48 = vrot.slane %v865_v32, 5  ;;  %v875_v43 = vshll.u32 %v6872_v23, 16 }
  0x3d   : > { %v871_v50 = vrot.slane %v869_v38, 4  ;;  %6132 = vmatmul.mubr.msk.bf16.gmra.mxu0 %vm1073_vm3, %v5590_v39  ;;  %v844_v53 = vsel %vm6701_vm4, %v839_v41, %v843_v63  ;;  %v5624_v56 = vcombine.low %v6861_v59, %v6864_v2  ;;  %v880_v60 = vshrl.u32 %v6882_v31, 16  ;;  %v6908_v38 = vld [vmem:[%s6654_s18 + $0x88] sm:$0xf] }
  0x3e   : > { %v862_v54 = vor.u32 %v861_v46, %v858_v42  ;;  %v854_v62 = vsel %vm6701_vm4, %v849_v7, %v853_v15  ;;  %v877_v14 = vrot.slane %v875_v43, 5  ;;  %v883_v5 = vshll.u32 %v6882_v31, 16  ;;  %v6916_v46 = vld [vmem:[%s6654_s18 + $0x8c] sm:$0x1] }
  0x3f   : > { %v872_v3 = vor.u32 %v871_v50, %v867_v48  ;;  %v5591_v63 = vcombine.low %v844_v53, %v854_v62  ;;  %6170 = vmatmul.mubr.msk.bf16.gmra.mxu1 %vm1073_vm3, %v5624_v56  ;;  %v882_v24 = vrot.slane %v880_v60, 4  ;;  %v889_v25 = vshll.u32 %v6886_v51, 16  ;;  %v6922_v56 = vld [vmem:[%s6654_s18 + $0x90] sm:$0xf] }
  0x40   : > { %v863_v20 = vrot.slane %v862_v54, 4  ;;  %v885_v28 = vrot.slane %v883_v5, 5  ;;  %v893_v32 = vshrl.u32 %v6886_v51, 16  ;;  %v899_v15 = vshll.u32 %v6894_v6, 16  ;;  %9171 = vst [vmem:[#allocation3_spill] sm:$0xff] %v6922_v56 }
  0x41   : > { %v873_v26 = vrot.slane %v872_v3, 4  ;;  %6135 = vmatprep.mubr.msk.bf16.mxu0 %vm1073_vm3, %v5591_v63  ;;  %v891_v41 = vrot.slane %v889_v25, 5  ;;  %v5625_v42 = vcombine.low %v6882_v31, %v6886_v51  ;;  %v904_v7 = vshrl.u32 %v6901_v18, 16 }
  0x42   : > { %v868_v39 = vsel %vm6701_vm4, %v863_v20, %v867_v48  ;;  %v886_v43 = vor.u32 %v885_v28, %v882_v24  ;;  %v895_v53 = vrot.slane %v893_v32, 4  ;;  %v901_v54 = vrot.slane %v899_v15, 5  ;;  %v6930_v24 = vld [vmem:[%s6654_s18 + $0x94] sm:$0xf]  ;;  %v6936_v32 = vld [vmem:[%s6654_s18 + $0x98] sm:$0x1] }
  0x43   : > { %v878_v50 = vsel %vm6701_vm4, %v873_v26, %v877_v14  ;;  %6173 = vmatprep.mubr.msk.bf16.mxu1 %vm1073_vm3, %v5625_v42  ;;  %v906_v48 = vrot.slane %v904_v7, 4  ;;  %v907_v62 = vshll.u32 %v6901_v18, 16  ;;  %v913_v3 = vshll.u32 %v6908_v38, 16  ;;  %9172 = vst [vmem:[#allocation4_spill] sm:$0xff] %v6930_v24  ;;  %9173 = vst [vmem:[#allocation5_spill] sm:$0xff] %v6936_v32 }
  0x44   : > { %v5592_v60 = vcombine.low %v868_v39, %v878_v50  ;;  %v887_v5 = vrot.slane %v886_v43, 4  ;;  %v896_v63 = vor.u32 %v895_v53, %v891_v41  ;;  %v917_v20 = vshrl.u32 %v6908_v38, 16 }
  0x45   : > { %v923_v14 = vshll.u32 %v6916_v46, 16  ;;  %v909_v25 = vrot.slane %v907_v62, 5  ;;  %v915_v26 = vrot.slane %v913_v3, 5  ;;  %v5626_v28 = vcombine.low %v6901_v18, %v6908_v38 }
  0x46   : > { %6136 = vmatmul.mubr.msk.bf16.gmra.mxu0 %vm1073_vm3, %v5592_v60  ;;  %v928_v15 = vshrl.u32 %v6922_v56, 16  ;;  %v892_v39 = vsel %vm6701_vm4, %v887_v5, %v891_v41  ;;  %v897_v42 = vrot.slane %v896_v63, 4  ;;  %v919_v7 = vrot.slane %v917_v20, 4  ;;  %v6949_v5 = vld [vmem:[%s6654_s18 + $0x9c] sm:$0xf] }
  0x47   : > { %v925_v50 = vrot.slane %v923_v14, 5  ;;  %v910_v43 = vor.u32 %v909_v25, %v906_v48  ;;  %6174 = vmatmul.mubr.msk.bf16.gmra.mxu1 %vm1073_vm3, %v5626_v28  ;;  %v931_v60 = vshll.u32 %v6922_v56, 16  ;;  %v937_v62 = vshll.u32 %v6930_v24, 16  ;;  %9174 = vst [vmem:[#allocation6_spill] sm:$0xff] %v6949_v5  ;;  %v6952_v25 = vld [vmem:[%s6654_s18 + $0xa0] sm:$0xf] }
  0x48   : > { %v930_v53 = vrot.slane %v928_v15, 4  ;;  %v902_v3 = vsel %vm6701_vm4, %v897_v42, %v901_v54  ;;  %v920_v19 = vor.u32 %v919_v7, %v915_v26  ;;  %v941_v47 = vshrl.u32 %v6930_v24, 16  ;;  %9175 = vst [vmem:[#allocation7_spill] sm:$0xff] %v6952_v25  ;;  %v6959_v42 = vld [vmem:[%s9115_s3 + $0xa] sm:$0x3] }
  0x49   : > { %v947_v41 = vshll.u32 %v6936_v32, 16  ;;  %v5593_v63 = vcombine.low %v892_v39, %v902_v3  ;;  %v911_v48 = vrot.slane %v910_v43, 4  ;;  %v933_v20 = vrot.slane %v931_v60, 5  ;;  %9176 = vst [vmem:[#allocation8_spill] sm:$0xff] %v6959_v42  ;;  %v6965_v43 = vld [vmem:[%s6654_s18 + $0xa4] sm:$0x1]  ;;  %6462 = vmatprep.subr.msk.bf16.mxu1 %vm1122_vm0, %v6959_v42 }
  0x4a   : > { %v939_v14 = vrot.slane %v937_v62, 5  ;;  %v921_v28 = vrot.slane %v920_v19, 4  ;;  %v943_v15 = vrot.slane %v941_v47, 4  ;;  %v5627_v54 = vcombine.low %v6922_v56, %v6930_v24  ;;  %9177 = vst [vmem:[#allocation9_spill] sm:$0xff] %v6965_v43  ;;  %v7028_v56 = vld [vmem:[%s7018_s23] sm:$0xf] }
  0x4b   : > { %v949_v40 = vrot.slane %v947_v41, 5  ;;  %6139 = vmatprep.mubr.msk.bf16.mxu0 %vm1073_vm3, %v5593_v63  ;;  %v916_v39 = vsel %vm6701_vm4, %v911_v48, %v915_v26  ;;  %v934_v7 = vor.u32 %v933_v20, %v930_v53  ;;  %v952_v19 = vshrl.u32 %v6949_v5, 16  ;;  %v6977_v53 = vld [vmem:[%s6654_s18 + $0xa8] sm:$0xf] }
  0x4c   : > { %v955_v47 = vshll.u32 %v6949_v5, 16  ;;  %v926_v60 = vsel %vm6701_vm4, %v921_v28, %v925_v50  ;;  %v944_v62 = vor.u32 %v943_v15, %v939_v14  ;;  %6177 = vmatprep.mubr.msk.bf16.mxu1 %vm1073_vm3, %v5627_v54  ;;  %v961_v3 = vshll.u32 %v6952_v25, 16  ;;  %9178 = vst [vmem:[#allocation10_spill] sm:$0xff] %v6977_v53  ;;  %v6981_v54 = vld [vmem:[%s6654_s18 + $0xac] sm:$0xf] }
  0x4d   : > { %v965_v26 = vshrl.u32 %v6952_v25, 16  ;;  %v5594_v41 = vcombine.low %v916_v39, %v926_v60  ;;  %v935_v63 = vrot.slane %v934_v7, 4  ;;  %v954_v48 = vrot.slane %v952_v19, 4  ;;  %9179 = vst [vmem:[#allocation11_spill] sm:$0xff] %v6981_v54  ;;  %v6989_v7 = vld [vmem:[%s6654_s18 + $0xb0] sm:$0x1] }
  0x4e   : > { %v957_v20 = vrot.slane %v955_v47, 5  ;;  %v945_v42 = vrot.slane %v944_v62, 4  ;;  %v963_v50 = vrot.slane %v961_v3, 5  ;;  %v971_v15 = vshll.u32 %v6965_v43, 16  ;;  %9180 = vst [vmem:[#allocation12_spill] sm:$0xff] %v6989_v7 }
  0x4f   : > { %v967_v28 = vrot.slane %v965_v26, 4  ;;  %6140 = vmatmul.mubr.msk.bf16.gmra.mxu0 %vm1073_vm3, %v5594_v41  ;;  %v940_v32 = vsel %vm6701_vm4, %v935_v63, %v939_v14  ;;  %v5628_v39 = vcombine.low %v6949_v5, %v6952_v25  ;;  %v976_v19 = vshrl.u32 %v6977_v53, 16  ;;  %v6996_v26 = vld [vmem:[%s6654_s18 + $0xb4] sm:$0xf] }
  0x50   : > { %v958_v24 = vor.u32 %v957_v20, %v954_v48  ;;  %v950_v47 = vsel %vm6701_vm4, %v945_v42, %v949_v40  ;;  %v973_v62 = vrot.slane %v971_v15, 5  ;;  %v979_v3 = vshll.u32 %v6977_v53, 16  ;;  %v7003_v42 = vld [vmem:[%s6654_s18 + $0xb8] sm:$0xf]  ;;  %v7011_v15 = vld [vmem:[%s6654_s18 + $0xbc] sm:$0x1] }
  0x51   : > { %v968_v60 = vor.u32 %v967_v28, %v963_v50  ;;  %v5595_v14 = vcombine.low %v940_v32, %v950_v47  ;;  %6178 = vmatmul.mubr.msk.bf16.gmra.mxu1 %vm1073_vm3, %v5628_v39  ;;  %v978_v63 = vrot.slane %v976_v19, 4  ;;  %v985_v48 = vshll.u32 %v6981_v54, 16  ;;  %s5946_s18 = sshll.u32 %s9420_s24, 8 }
  0x52   : > { %v959_v41 = vrot.slane %v958_v24, 4  ;;  %v981_v43 = vrot.slane %v979_v3, 5  ;;  %v989_v25 = vshrl.u32 %v6981_v54, 16  ;;  %v995_v40 = vshll.u32 %v6989_v7, 16 }
  0x53   : > { %v969_v20 = vrot.slane %v968_v60, 4  ;;  %6143 = vmatprep.mubr.msk.bf16.mxu0 %vm1073_vm3, %v5595_v14  ;;  %v987_v28 = vrot.slane %v985_v48, 5  ;;  %v5629_v24 = vcombine.low %v6977_v53, %v6981_v54  ;;  %v1000_v39 = vshrl.u32 %v6996_v26, 16 }
  0x54   : > { %v964_v32 = vsel %vm6701_vm4, %v959_v41, %v963_v50  ;;  %v982_v47 = vor.u32 %v981_v43, %v978_v63  ;;  %v991_v60 = vrot.slane %v989_v25, 4  ;;  %v997_v50 = vrot.slane %v995_v40, 5 }
  0x55   : > { %v974_v19 = vsel %vm6701_vm4, %v969_v20, %v973_v62  ;;  %6181 = vmatprep.mubr.msk.bf16.mxu1 %vm1073_vm3, %v5629_v24  ;;  %v1002_v14 = vrot.slane %v1000_v39, 4  ;;  %v1003_v41 = vshll.u32 %v6996_v26, 16  ;;  %v1009_v48 = vshll.u32 %v7003_v42, 16  ;;  %v7035_v20 = vld [vmem:[%s7018_s23 + $0x4] sm:$0xf] }
  0x56   : > { %v5596_v3 = vcombine.low %v964_v32, %v974_v19  ;;  %v983_v7 = vrot.slane %v982_v47, 4  ;;  %v992_v54 = vor.u32 %v991_v60, %v987_v28  ;;  %v1013_v53 = vshrl.u32 %v7003_v42, 16 }
  0x57   : > { %v1019_v5 = vshll.u32 %v7011_v15, 16  ;;  %v1005_v25 = vrot.slane %v1003_v41, 5  ;;  %v1011_v43 = vrot.slane %v1009_v48, 5  ;;  %v5630_v62 = vcombine.low %v6996_v26, %v7003_v42 }
  0x58   : > { %6144 = vmatmul.mubr.msk.bf16.gmra.mxu0 %vm1073_vm3, %v5596_v3  ;;  %v5647_v63 = vrot.slane %v6665_v10, 9  ;;  %v988_v40 = vsel %vm6701_vm4, %v983_v7, %v987_v28  ;;  %v993_v32 = vrot.slane %v992_v54, 4  ;;  %v1015_v24 = vrot.slane %v1013_v53, 4 }
  0x59   : > { %v1021_v39 = vrot.slane %v1019_v5, 5  ;;  %v1006_v47 = vor.u32 %v1005_v25, %v1002_v14  ;;  %6182 = vmatmul.mubr.msk.bf16.gmra.mxu1 %vm1073_vm3, %v5630_v62  ;;  %v1600_v10 = vrot.slane %v6668_v11, 5  ;;  %v5648_v60 = vrot.slane %v6678_v17, 9  ;;  %v7058_v25 = vld [vmem:[%s7018_s23 + $0xc] sm:$0xf] }
  0x5a   : > { %v9183_v7 = vrot.slane %v6685_v21, 5  ;;  %v998_v5 = vsel %vm6701_vm4, %v993_v32, %v997_v50  ;;  %v1016_v53 = vor.u32 %v1015_v24, %v1011_v43  ;;  %v5697_v28 = vcombine.low %v7028_v56, %v7035_v20  ;;  %v7061_v17 = vld [vmem:[%s7018_s23 + $0x10] sm:$0xf] }
  0x5b   : > { %v5597_v41 = vcombine.low %v988_v40, %v998_v5  ;;  %v1007_v14 = vrot.slane %v1006_v47, 4  ;;  %v1601_v48 = vsel %vm7041_vm7, %v5647_v63, %v1600_v10  ;;  %v1602_v11 = vrot.slane %v1600_v10, 4  ;;  %v7386_v63 = vld [vmem:[%s7018_s23 + $0xa8] sm:$0xf] }
  0x5c   : > { %v1609_v54 = vrot.slane %v9183_v7, 4  ;;  %v1017_v62 = vrot.slane %v1016_v53, 4  ;;  %v9184_v50 = vmov %v9183_v7  ;;  %v9185_v40 = vrot.slane %v6688_v22, 5  ;;  %6221 = vmatprep.mubr.msk.bf16.mxu1 %vm1073_vm3, %v5697_v28  ;;  %v7093_v53 = vld [vmem:[%s7018_s23 + $0x18] sm:$0xf] }
  0x5d   : > { %v7067_v32 = vsel %vm7041_vm7, %v5648_v60, %v9184_v50  ;;  %6147 = vmatprep.mubr.msk.bf16.mxu0 %vm1073_vm3, %v5597_v41  ;;  %v1012_v21 = vsel %vm6701_vm4, %v1007_v14, %v1011_v43  ;;  %v9186_v47 = vrot.slane %v6671_v12, 5  ;;  %v5698_v5 = vcombine.low %v7058_v25, %v7061_v17  ;;  %v7096_v12 = vld [vmem:[%s7018_s23 + $0x1c] sm:$0xf]  ;;  %v7102_v50 = vld [vmem:[%s7018_s23 + $0x24] sm:$0xf]  ;;  %v9198_v43 = vld [vmem:[#allocation9_spill] sm:$0xff] }
  0x5e   : > { %v7073_v24 = vsel %vm7041_vm7, %v1609_v54, %v9185_v40  ;;  %v1022_v7 = vsel %vm6701_vm4, %v1017_v62, %v1021_v39  ;;  %v1614_v39 = vrot.slane %v6707_v45, 5  ;;  %v5650_v62 = vrot.slane %v6722_v55, 9  ;;  %v7109_v40 = vld [vmem:[%s7018_s23 + $0x28] sm:$0xf]  ;;  %v9199_v60 = vld [vmem:[#allocation10_spill] sm:$0xff] }
  0x5f   : > { %v1604_v10 = vsel %vm7041_vm7, %v1602_v11, %v9186_v47  ;;  %v5665_v22 = vcombine.low %v7067_v32, %v7073_v24  ;;  %v5598_v28 = vcombine.low %v1012_v21, %v1022_v7  ;;  %v5649_v11 = vrot.slane %v6697_v35, 9  ;;  %v7172_v45 = vld [vmem:[%s7018_s23 + $0x48] sm:$0xf] }
  0x60   : > { %v5664_v54 = vcombine.low %v1601_v48, %v1604_v10  ;;  %v1617_v48 = vrot.slane %v6713_v49, 5  ;;  %v1621_v32 = vrot.slane %v6729_v0, 5  ;;  %v1624_v35 = vrot.slane %v6737_v4, 5  ;;  %v7126_v4 = vld [vmem:[%s7018_s23 + $0x30] sm:$0xf] }
  0x61   : > { %6148 = vmatmul.mubr.msk.bf16.gmra.mxu0 %vm1073_vm3, %v5598_v28  ;;  %6222 = vmatmul.mubr.msk.bf16.vlgmr.msra.gmra.mxu1 %vm1073_vm3, %v5698_v5  ;;  %v5699_v24 = vcombine.low %v7093_v53, %v7096_v12  ;;  %v1615_v55 = vsel %vm7041_vm7, %v5649_v11, %v1614_v39  ;;  %v1616_v0 = vrot.slane %v1614_v39, 4  ;;  %v5700_v7 = vcombine.low %v7102_v50, %v7109_v40  ;;  %v7135_v28 = vld [vmem:[%s7018_s23 + $0x34] sm:$0xf]  ;;  %v7150_v49 = vld [vmem:[%s7018_s23 + $0x3c] sm:$0xf] }
  0x62   : > { %6187 = vmatprep.mubr.msk.bf16.mxu0 %vm1073_vm3, %v5664_v54  ;;  %v7123_v21 = vsel %vm7041_vm7, %v5650_v62, %v1621_v32  ;;  %v1623_v47 = vrot.slane %v1621_v32, 4  ;;  %v5651_v32 = vrot.slane %v6743_v16, 9  ;;  %v1628_v54 = vrot.slane %v6751_v29, 5 }
  0x63   : > { %6225 = vmatprep.mubr.msk.bf16.mxu1 %vm1073_vm3, %v5699_v24  ;;  %v1618_v11 = vsel %vm7041_vm7, %v1616_v0, %v1617_v48  ;;  %v1631_v5 = vrot.slane %v6757_v33, 5  ;;  %v7153_v48 = vld [vmem:[%s7018_s23 + $0x40] sm:$0xf]  ;;  %v1635_v0 = vrot.slane %v6776_v58, 5  ;;  %v5701_v16 = vcombine.low %v7126_v4, %v7135_v28 }
  0x64   : > { %v7141_v39 = vsel %vm7041_vm7, %v1623_v47, %v1624_v35  ;;  %v5666_v24 = vcombine.low %v1615_v55, %v1618_v11  ;;  %v5652_v35 = vrot.slane %v6773_v52, 9  ;;  %v1638_v47 = vrot.slane %v6784_v1, 5  ;;  %v7187_v11 = vld [vmem:[%s7018_s23 + $0x4c] sm:$0xf] }
  0x65   : > { %v5667_v10 = vcombine.low %v7123_v21, %v7141_v39  ;;  %v1629_v55 = vsel %vm7041_vm7, %v5651_v32, %v1628_v54  ;;  %v1630_v29 = vrot.slane %v1628_v54, 4  ;;  %v1637_v52 = vrot.slane %v1635_v0, 4  ;;  %v7177_v54 = vld [vmem:[%s9115_s3 + $0xc] sm:$0x3] }
  0x66   : > { %v7166_v62 = vsel %vm7041_vm7, %v5652_v35, %v1635_v0  ;;  %v5702_v1 = vcombine.low %v7150_v49, %v7153_v48  ;;  %v7233_v35 = vld [vmem:[%s7018_s23 + $0x60] sm:$0xf]  ;;  %v1656_v14 = vrot.slane %v6842_v27, 5  ;;  %v1659_v41 = vrot.slane %v6848_v34, 5 }
  0x67   : > { %v1632_v32 = vsel %vm7041_vm7, %v1630_v29, %v1631_v5  ;;  %v1642_v5 = vrot.slane %v6798_v30, 5  ;;  %v7198_v29 = vld [vmem:[%s7018_s23 + $0x54] sm:$0xf]  ;;  %v5661_v3 = vrot.slane %v9199_v60, 9  ;;  %v5662_v60 = vrot.slane %v6996_v26, 9 }
  0x68   : > { %v5668_v33 = vcombine.low %v1629_v55, %v1632_v32  ;;  %v1649_v55 = vrot.slane %v6820_v57, 5  ;;  %v1658_v21 = vrot.slane %v1656_v14, 4 }
  0x69   : > { %6188 = vmatmul.mubr.msk.bf16.vlgmr.msra.gmra.mxu0 %vm1073_vm3, %v5665_v22  ;;  %6226 = vmatmul.mubr.msk.bf16.gmra.mxu1 %vm1073_vm3, %v5700_v7  ;;  %v7193_v22 = vsel %vm7041_vm7, %v1637_v52, %v1638_v47  ;;  %v5653_v7 = vrot.slane %v6794_v8, 9  ;;  %v7207_v47 = vld [vmem:[%s7018_s23 + $0x58] sm:$0xf]  ;;  %v1644_v30 = vrot.slane %v1642_v5, 4  ;;  %v5655_v52 = vrot.slane %v6834_v13, 9 }
  0x6a   : > { %6254 = vmatpush3.bf16.msra.mxu0 %v6662_v9  ;;  %6191 = vmatprep.mubr.msk.bf16.mxu0 %vm1073_vm3, %v5666_v24  ;;  %v5669_v58 = vcombine.low %v7166_v62, %v7193_v22  ;;  %v1645_v9 = vrot.slane %v6806_v37, 5  ;;  %v5654_v24 = vrot.slane %v6813_v44, 9  ;;  %v5703_v37 = vcombine.low %v7172_v45, %v7187_v11 }
  0x6b   : > { %6229 = vmatprep.mubr.msk.bf16.mxu1 %vm1073_vm3, %v5701_v16  ;;  %6463 = vmatprep.subr.msk.bf16.mxu0 %vm1122_vm0, %v7177_v54  ;;  %v7213_v8 = vsel %vm7041_vm7, %v5653_v7, %v1642_v5  ;;  %v1652_v16 = vrot.slane %v6828_v61, 5  ;;  %v1651_v57 = vrot.slane %v1649_v55, 4  ;;  %v5704_v5 = vcombine.low %v7198_v29, %v7207_v47  ;;  %v7247_v61 = vld [vmem:[%s7018_s23 + $0x6c] sm:$0xf] }
  0x6c   : > { %v7220_v44 = vsel %vm7041_vm7, %v5654_v24, %v1649_v55  ;;  %v7226_v7 = vsel %vm7041_vm7, %v1644_v30, %v1645_v9  ;;  %v7236_v24 = vld [vmem:[%s7018_s23 + $0x64] sm:$0xf]  ;;  %v1666_v13 = vrot.slane %v6872_v23, 5  ;;  %v7271_v34 = vsel %vm7041_vm7, %v5655_v52, %v1656_v14  ;;  %v7312_v30 = vld [vmem:[%s7018_s23 + $0x88] sm:$0xf] }
  0x6d   : > { %v5670_v55 = vcombine.low %v7213_v8, %v7226_v7  ;;  %v7242_v32 = vsel %vm7041_vm7, %v1651_v57, %v1652_v16  ;;  %v7255_v8 = vld [vmem:[%s7018_s23 + $0x70] sm:$0xf]  ;;  %v5656_v16 = vrot.slane %v6861_v59, 9  ;;  %v1663_v57 = vrot.slane %v6864_v2, 5  ;;  %9190 = vst [vmem:[#allocation16_spill] sm:$0xff] %v7312_v30  ;;  %v9197_v52 = vld [vmem:[#allocation7_spill] sm:$0xff] }
  0x6e   : > { %v5671_v0 = vcombine.low %v7220_v44, %v7242_v32  ;;  %9187 = vst [vmem:[#allocation13_spill] sm:$0xff] %v7255_v8  ;;  %v5705_v27 = vcombine.low %v7233_v35, %v7236_v24  ;;  %v7287_v14 = vsel %vm7041_vm7, %v1658_v21, %v1659_v41  ;;  %v5657_v59 = vrot.slane %v6882_v31, 9  ;;  %v7304_v21 = vld [vmem:[%s7018_s23 + $0x84] sm:$0xf]  ;;  %v7344_v9 = vld [vmem:[%s7018_s23 + $0x94] sm:$0xf] }
  0x6f   : > { %v7277_v2 = vsel %vm7041_vm7, %v5656_v16, %v1663_v57  ;;  %v1665_v23 = vrot.slane %v1663_v57, 4  ;;  %v7293_v16 = vld [vmem:[%s7018_s23 + $0x7c] sm:$0xf]  ;;  %v1670_v41 = vrot.slane %v6886_v51, 5  ;;  %v1673_v7 = vrot.slane %v6894_v6, 5  ;;  %9192 = vst [vmem:[#allocation18_spill] sm:$0xff] %v7344_v9 }
  0x70   : > { %9189 = vst [vmem:[#allocation15_spill] sm:$0xff] %v7293_v16  ;;  %v1691_v22 = vrot.slane %v9197_v52, 5  ;;  %v7407_v57 = vld [vmem:[%s7018_s23 + $0xb4] sm:$0xf] }
  0x71   : > { %6192 = vmatmul.mubr.msk.bf16.gmra.mxu0 %vm1073_vm3, %v5667_v10  ;;  %6230 = vmatmul.mubr.msk.bf16.gmra.mxu1 %vm1073_vm3, %v5702_v1  ;;  %v7283_v1 = vld [vmem:[%s7018_s23 + $0x78] sm:$0xf]  ;;  %v7299_v39 = vsel %vm7041_vm7, %v1665_v23, %v1666_v13  ;;  %v1677_v10 = vrot.slane %v6908_v38, 5  ;;  %v7316_v31 = vsel %vm7041_vm7, %v5657_v59, %v1670_v41  ;;  %v1672_v51 = vrot.slane %v1670_v41, 4  ;;  %v7341_v41 = vld [vmem:[%s7018_s23 + $0x90] sm:$0xf] }
  0x72   : > { %6195 = vmatprep.mubr.msk.bf16.mxu0 %vm1073_vm3, %v5668_v33  ;;  %6233 = vmatprep.mubr.msk.bf16.mxu1 %vm1073_vm3, %v5703_v37  ;;  %v5706_v33 = vcombine.low %v7247_v61, %v7255_v8  ;;  %9188 = vst [vmem:[#allocation14_spill] sm:$0xff] %v7283_v1  ;;  %v5658_v37 = vrot.slane %v6901_v18, 9  ;;  %v1680_v13 = vrot.slane %v6916_v46, 5  ;;  %v5707_v23 = vcombine.low %v7283_v1, %v7293_v16  ;;  %v9194_v59 = vld [vmem:[#allocation4_spill] sm:$0xff]  ;;  %v9195_v38 = vld [vmem:[#allocation5_spill] sm:$0xff] }
  0x73   : > { %v1679_v18 = vrot.slane %v1677_v10, 4  ;;  %v7334_v46 = vsel %vm7041_vm7, %v1672_v51, %v1673_v7  ;;  %9191 = vst [vmem:[#allocation17_spill] sm:$0xff] %v7341_v41  ;;  %v7357_v7 = vld [vmem:[%s7018_s23 + $0x9c] sm:$0xf]  ;;  %v1687_v62 = vrot.slane %v9195_v38, 5  ;;  %v1693_v52 = vrot.slane %v1691_v22, 4 }
  0x74   : > { %v7323_v6 = vsel %vm7041_vm7, %v5658_v37, %v1677_v10  ;;  %v9193_v37 = vld [vmem:[#allocation3_spill] sm:$0xff]  ;;  %v7423_v38 = vld [vmem:[%s7018_s23 + $0xb8] sm:$0xf]  ;;  %v9210_v8 = vshrl.u32 %v7061_v17, 16 }
  0x75   : > { %v7365_v10 = vld [vmem:[%s7018_s23 + $0xa0] sm:$0xf] }
  0x79   : > { %6196 = vmatmul.mubr.msk.bf16.gmra.mxu0 %vm1073_vm3, %v5669_v58  ;;  %6234 = vmatmul.mubr.msk.bf16.gmra.mxu1 %vm1073_vm3, %v5704_v5  ;;  %v7352_v58 = vsel %vm7041_vm7, %v1679_v18, %v1680_v13  ;;  %v9196_v13 = vld [vmem:[#allocation6_spill] sm:$0xff]  ;;  %v1694_v5 = vrot.slane %v9198_v43, 5 }
  0x7a   : > { %6199 = vmatprep.mubr.msk.bf16.mxu0 %vm1073_vm3, %v5670_v55  ;;  %6237 = vmatprep.mubr.msk.bf16.mxu1 %vm1073_vm3, %v5705_v27  ;;  %v5659_v55 = vrot.slane %v9193_v37, 9  ;;  %v1684_v27 = vrot.slane %v9194_v59, 5  ;;  %v5660_v18 = vrot.slane %v9196_v13, 9  ;;  %v7396_v59 = vld [vmem:[%s7018_s23 + $0xac] sm:$0xf] }
  0x7b   : > { %v7402_v43 = vsel %vm7041_vm7, %v1693_v52, %v1694_v5  ;;  %v9201_v52 = vld [vmem:[#allocation12_spill] sm:$0xff] }
  0x7c   : > { %v7374_v37 = vsel %vm7041_vm7, %v5659_v55, %v1684_v27  ;;  %v1686_v51 = vrot.slane %v1684_v27, 4  ;;  %v7380_v13 = vsel %vm7041_vm7, %v5660_v18, %v1691_v22  ;;  %v1701_v18 = vrot.slane %v9201_v52, 5 }
  0x7d   : > { %v9205_v27 = vshrl.u32 %v7028_v56, 16  ;;  %v9208_v22 = vshrl.u32 %v7058_v25, 16 }
  0x7e   : > { %v7390_v55 = vsel %vm7041_vm7, %v1686_v51, %v1687_v62  ;;  %v9200_v62 = vld [vmem:[#allocation11_spill] sm:$0xff] }
  0x7f   : > { %v1698_v51 = vrot.slane %v9200_v62, 5  ;;  %v1705_v62 = vrot.slane %v7003_v42, 5 }
  0x81   : > { %6200 = vmatmul.mubr.msk.bf16.gmra.mxu0 %vm1073_vm3, %v5671_v0  ;;  %6238 = vmatmul.mubr.msk.bf16.gmra.mxu1 %vm1073_vm3, %v5706_v33  ;;  %v9202_v0 = vcombine.low %v7271_v34, %v7287_v14  ;;  %v7432_v44 = vsel %vm7041_vm7, %v5661_v3, %v1698_v51  ;;  %v1700_v32 = vrot.slane %v1698_v51, 4  ;;  %v1708_v33 = vrot.slane %v7011_v15, 5  ;;  %v544_v14 = vld [vmem:[%s7018_s23 + $0x14] sm:$0x1] }
  0x82   : > { %6241 = vmatprep.mubr.msk.bf16.mxu1 %vm1073_vm3, %v5707_v23  ;;  %v7439_v42 = vsel %vm7041_vm7, %v5662_v60, %v1705_v62  ;;  %v1707_v52 = vrot.slane %v1705_v62, 4  ;;  %v9204_v23 = vld [vmem:[#allocation8_spill] sm:$0xff]  ;;  %v2333_v60 = vrot.slane %v9205_v27, 4  ;;  %v9207_v15 = vshrl.u32 %v7035_v20, 16 }
  0x83   : > { %6203 = vmatprep.mubr.msk.bf16.mxu0 %vm1073_vm3, %v9202_v0  ;;  %v7445_v3 = vsel %vm7041_vm7, %v1700_v32, %v1701_v18  ;;  %v541_v0 = vld [vmem:[%s7018_s23 + $0x8] sm:$0x1]  ;;  %v7463_v32 = vld [vmem:[%s9115_s3 + $0xe] sm:$0x3]  ;;  %v3235_v34 = vsel %vm1122_vm0, %v9204_v23, 0  ;;  %v2340_v18 = vshll.u32 %v7035_v20, 16 }
  0x84   : > { %v7456_v62 = vsel %vm7041_vm7, %v1707_v52, %v1708_v33  ;;  %9203 = vst [vmem:[#allocation3_spill] sm:$0xff] %v7463_v32  ;;  %v9206_v33 = vshll.u32 %v7028_v56, 16  ;;  %6288 = vmatpush3.bf16.msra.mxu1 %v3235_v34  ;;  %v2346_v5 = vrot.slane %v9207_v15, 4  ;;  %v2350_v26 = vshll.u32 %v541_v0, 16 }
  0x85   : > { %v2357_v51 = vrot.slane %v9208_v22, 4  ;;  %v9209_v23 = vshll.u32 %v7058_v25, 16  ;;  %v2364_v27 = vshll.u32 %v7061_v17, 16  ;;  %6464 = vmatprep.subr.msk.bf16.mxu1 %vm1122_vm0, %v7463_v32  ;;  %v9211_v34 = vcombine.low %v7277_v2, %v7299_v39 }
  0x86   : > { %v2336_v52 = vrot.slane %v9206_v33, 5  ;;  %v2370_v33 = vrot.slane %v9210_v8, 4  ;;  %v9212_v22 = vcombine.low %v7304_v21, %v7312_v30  ;;  %v2342_v15 = vrot.slane %v2340_v18, 5 }
  0x87   : > { %v2360_v1 = vrot.slane %v9209_v23, 5  ;;  %v7496_v23 = vsel %vm1122_vm0, %v7177_v54, 0  ;;  %v9213_v8 = vcombine.low %v7316_v31, %v7334_v46  ;;  %v9214_v2 = vcombine.low %v7341_v41, %v7344_v9 }
  0x88   : > { %v2337_v16 = vor.u32 %v2336_v52, %v2333_v60  ;;  %v2352_v60 = vrot.slane %v2350_v26, 5  ;;  %v2374_v52 = vshll.u32 %v544_v14, 16  ;;  %v5762_v26 = vrot.slane %v7028_v56, 9 }
  0x89   : > { %6204 = vmatmul.mubr.msk.bf16.gmra.mxu0 %vm1073_vm3, %v9211_v34  ;;  %6242 = vmatmul.mubr.msk.bf16.gmra.mxu1 %vm1073_vm3, %v9212_v22  ;;  %v2361_v34 = vor.u32 %v2360_v1, %v2357_v51  ;;  %v2366_v22 = vrot.slane %v2364_v27, 5  ;;  %v2347_v18 = vor.u32 %v2346_v5, %v2342_v15  ;;  %v3026_v54 = vrot.slane %v7035_v20, 5 }
  0x8a   : > { %6207 = vmatprep.mubr.msk.bf16.mxu0 %vm1073_vm3, %v9213_v8  ;;  %6245 = vmatprep.mubr.msk.bf16.mxu1 %vm1073_vm3, %v9214_v2  ;;  %v2338_v39 = vrot.slane %v2337_v16, 4  ;;  %v2376_v32 = vrot.slane %v2374_v52, 5  ;;  %v3029_v30 = vrot.slane %v541_v0, 5  ;;  %v5763_v9 = vrot.slane %v7058_v25, 9  ;;  %v547_v52 = vld [vmem:[%s7018_s23 + $0x20] sm:$0x1] }
  0x8b   : > { %v2362_v46 = vrot.slane %v2361_v34, 4  ;;  %v2371_v8 = vor.u32 %v2370_v33, %v2366_v22  ;;  %v2348_v41 = vrot.slane %v2347_v18, 4  ;;  %v3027_v1 = vsel %vm7041_vm7, %v5762_v26, %v3026_v54 }
  0x8c   : > { %v2343_v31 = vsel %vm6701_vm4, %v2338_v39, %v2342_v15  ;;  %v3028_v16 = vrot.slane %v3026_v54, 4  ;;  %v3033_v56 = vrot.slane %v7061_v17, 5  ;;  %v3036_v51 = vrot.slane %v544_v14, 5  ;;  %v550_v54 = vld [vmem:[%s7018_s23 + $0x2c] sm:$0x1] }
  0x8d   : > { %v2367_v5 = vsel %vm6701_vm4, %v2362_v46, %v2366_v22  ;;  %v2372_v20 = vrot.slane %v2371_v8, 4  ;;  %v9215_v0 = vshrl.u32 %v7093_v53, 16  ;;  %v2353_v33 = vsel %vm6701_vm4, %v2348_v41, %v2352_v60 }
  0x8e   : > { %v3030_v25 = vsel %vm7041_vm7, %v3028_v16, %v3029_v30  ;;  %v7524_v15 = vsel %vm7041_vm7, %v5763_v9, %v3033_v56  ;;  %v3035_v17 = vrot.slane %v3033_v56, 4  ;;  %v7527_v2 = vcombine.low %v2343_v31, %v2353_v33 }
  0x8f   : > { %v2381_v27 = vrot.slane %v9215_v0, 4  ;;  %v2377_v14 = vsel %vm6701_vm4, %v2372_v20, %v2376_v32  ;;  %v5779_v39 = vcombine.low %v3027_v1, %v3030_v25  ;;  %v9216_v34 = vshll.u32 %v7093_v53, 16 }
  0x90   : > { %v9217_v41 = vcombine.low %v7323_v6, %v7352_v58  ;;  %v9218_v9 = vcombine.low %v7357_v7, %v7365_v10  ;;  %v7541_v30 = vcombine.low %v2367_v5, %v2377_v14  ;;  %v7545_v60 = vsel %vm7041_vm7, %v3035_v17, %v3036_v51 }
  0x91   : > { %v2384_v22 = vrot.slane %v9216_v34, 5  ;;  %v2388_v32 = vshll.u32 %v7096_v12, 16  ;;  %v9219_v26 = vshrl.u32 %v7096_v12, 16  ;;  %v9220_v6 = vcombine.low %v7374_v37, %v7390_v55 }
  0x92   : > { %6208 = vmatmul.mubr.msk.bf16.gmra.mxu0 %vm1073_vm3, %v9217_v41  ;;  %6246 = vmatmul.mubr.msk.bf16.gmra.mxu1 %vm1073_vm3, %v9218_v9  ;;  %v9221_v58 = vcombine.low %v7386_v63, %v7396_v59  ;;  %v5780_v31 = vcombine.low %v7524_v15, %v7545_v60  ;;  %v2398_v8 = vshll.u32 %v547_v52, 16  ;;  %v9222_v1 = vshrl.u32 %v7102_v50, 16 }
  0x93   : > { %v2394_v18 = vrot.slane %v9219_v26, 4  ;;  %6211 = vmatprep.mubr.msk.bf16.mxu0 %vm1073_vm3, %v9220_v6  ;;  %v2385_v46 = vor.u32 %v2384_v22, %v2381_v27  ;;  %v2390_v56 = vrot.slane %v2388_v32, 5  ;;  %v9223_v5 = vshll.u32 %v7102_v50, 16 }
  0x94   : > { %6249 = vmatprep.mubr.msk.bf16.mxu1 %vm1073_vm3, %v9221_v58  ;;  %v2405_v16 = vrot.slane %v9222_v1, 4  ;;  %v2412_v37 = vshll.u32 %v7109_v40, 16  ;;  %v9224_v55 = vshrl.u32 %v7109_v40, 16  ;;  %v2400_v33 = vrot.slane %v2398_v8, 5 }
  0x95   : > { %v2408_v20 = vrot.slane %v9223_v5, 5  ;;  %v2386_v0 = vrot.slane %v2385_v46, 4  ;;  %v2422_v25 = vshll.u32 %v550_v54, 16  ;;  %v5764_v17 = vrot.slane %v7093_v53, 9  ;;  %v553_v5 = vld [vmem:[%s7018_s23 + $0x38] sm:$0x1] }
  0x96   : > { %v2418_v51 = vrot.slane %v9224_v55, 4  ;;  %v2395_v14 = vor.u32 %v2394_v18, %v2390_v56  ;;  %v2414_v34 = vrot.slane %v2412_v37, 5  ;;  %v3040_v22 = vrot.slane %v7096_v12, 5 }
  0x97   : > { %v2409_v27 = vor.u32 %v2408_v20, %v2405_v16  ;;  %v2391_v41 = vsel %vm6701_vm4, %v2386_v0, %v2390_v56  ;;  %v2424_v9 = vrot.slane %v2422_v25, 5  ;;  %v3043_v32 = vrot.slane %v547_v52, 5 }
  0x98   : > { %v5765_v26 = vrot.slane %v7102_v50, 9  ;;  %v2396_v6 = vrot.slane %v2395_v14, 4  ;;  %v2419_v46 = vor.u32 %v2418_v51, %v2414_v34  ;;  %v3041_v8 = vsel %vm7041_vm7, %v5764_v17, %v3040_v22 }
  0x99   : > { %v2410_v58 = vrot.slane %v2409_v27, 4  ;;  %v3042_v53 = vrot.slane %v3040_v22, 4  ;;  %v3047_v18 = vrot.slane %v7109_v40, 5  ;;  %v3050_v1 = vrot.slane %v550_v54, 5  ;;  %v556_v22 = vld [vmem:[%s7018_s23 + $0x44] sm:$0x1] }
  0x9a   : > { %v9225_v12 = vshrl.u32 %v7126_v4, 16  ;;  %v9226_v56 = vcombine.low %v7380_v13, %v7402_v43  ;;  %v9227_v50 = vcombine.low %v7407_v57, %v7423_v38  ;;  %v2401_v52 = vsel %vm6701_vm4, %v2396_v6, %v2400_v33 }
  0x9b   : > { %v2415_v40 = vsel %vm6701_vm4, %v2410_v58, %v2414_v34  ;;  %v2420_v54 = vrot.slane %v2419_v46, 4  ;;  %v9228_v20 = vshll.u32 %v7126_v4, 16  ;;  %v9229_v13 = vcombine.low %v7432_v44, %v7445_v3 }
  0x9c   : > { %v2429_v16 = vrot.slane %v9225_v12, 4  ;;  %6212 = vmatmul.mubr.msk.bf16.gmra.mxu0 %vm1073_vm3, %v9226_v56  ;;  %6250 = vmatmul.mubr.msk.bf16.gmra.mxu1 %vm1073_vm3, %v9227_v50  ;;  %v7598_v43 = vcombine.low %v2391_v41, %v2401_v52  ;;  %v3044_v55 = vsel %vm7041_vm7, %v3042_v53, %v3043_v32  ;;  %v7604_v51 = vsel %vm7041_vm7, %v5765_v26, %v3047_v18 }
  0x9d   : > { %v2432_v37 = vrot.slane %v9228_v20, 5  ;;  %6215 = vmatprep.mubr.msk.bf16.mxu0 %vm1073_vm3, %v9229_v13  ;;  %6289 = vmatprep.mubr.msk.bf16.mxu1 %vm1073_vm3, %v5779_v39  ;;  %v3049_v0 = vrot.slane %v3047_v18, 4  ;;  %v2425_v33 = vsel %vm6701_vm4, %v2420_v54, %v2424_v9  ;;  %v5781_v25 = vcombine.low %v3041_v8, %v3044_v55 }
  0x9e   : > { %v2436_v44 = vshll.u32 %v7135_v28, 16  ;;  %v7609_v3 = vcombine.low %v2415_v40, %v2425_v33  ;;  %v9230_v14 = vshrl.u32 %v7135_v28, 16  ;;  %v2446_v34 = vshll.u32 %v553_v5, 16 }
  0x9f   : > { %v2433_v17 = vor.u32 %v2432_v37, %v2429_v16  ;;  %v3051_v39 = vsel %vm7041_vm7, %v3049_v0, %v3050_v1  ;;  %v9231_v9 = vshrl.u32 %v7150_v49, 16  ;;  %v9232_v46 = vshll.u32 %v7150_v49, 16 }
  0xa0   : > { %v2442_v27 = vrot.slane %v9230_v14, 4  ;;  %v5782_v41 = vcombine.low %v7604_v51, %v3051_v39  ;;  %v2438_v26 = vrot.slane %v2436_v44, 5  ;;  %v2448_v58 = vrot.slane %v2446_v34, 5 }
  0xa1   : > { %v2434_v32 = vrot.slane %v2433_v17, 4  ;;  %v2453_v6 = vrot.slane %v9231_v9, 4  ;;  %v2456_v8 = vrot.slane %v9232_v46, 5  ;;  %v2460_v53 = vshll.u32 %v7153_v48, 16 }
  0xa2   : > { %v9233_v18 = vshrl.u32 %v7153_v48, 16  ;;  %v2443_v16 = vor.u32 %v2442_v27, %v2438_v26  ;;  %v2470_v56 = vshll.u32 %v556_v22, 16  ;;  %v5766_v50 = vrot.slane %v7126_v4, 9 }
  0xa3   : > { %v2439_v12 = vsel %vm6701_vm4, %v2434_v32, %v2438_v26  ;;  %v2457_v52 = vor.u32 %v2456_v8, %v2453_v6  ;;  %v2462_v40 = vrot.slane %v2460_v53, 5  ;;  %v3054_v54 = vrot.slane %v7135_v28, 5 }
  0xa4   : > { %v2466_v1 = vrot.slane %v9233_v18, 4  ;;  %v3057_v20 = vrot.slane %v553_v5, 5  ;;  %v9234_v37 = vcombine.low %v7439_v42, %v7456_v62  ;;  %6290 = vmatmul.mubr.msk.bf16.vlgmr.msra.gmra.mxu1 %vm1073_vm3, %v5780_v31  ;;  %v2444_v13 = vrot.slane %v2443_v16, 4 }
  0xa5   : > { %v2472_v55 = vrot.slane %v2470_v56, 5  ;;  %v5767_v51 = vrot.slane %v7150_v49, 9  ;;  %v3061_v4 = vrot.slane %v7153_v48, 5  ;;  %6293 = vmatprep.mubr.msk.bf16.mxu1 %vm1073_vm3, %v5781_v25  ;;  %v2458_v28 = vrot.slane %v2457_v52, 4  ;;  %v559_v25 = vld [vmem:[%s7018_s23 + $0x50] sm:$0x1] }
  0xa6   : > { %6216 = vmatmul.mubr.msk.bf16.gmra.mxu0 %vm1073_vm3, %v9234_v37  ;;  %v2467_v42 = vor.u32 %v2466_v1, %v2462_v40  ;;  %v3055_v62 = vsel %vm7041_vm7, %v5766_v50, %v3054_v54  ;;  %v3056_v15 = vrot.slane %v3054_v54, 4  ;;  %v2449_v60 = vsel %vm6701_vm4, %v2444_v13, %v2448_v58  ;;  %v562_v58 = vld [vmem:[%s7018_s23 + $0x5c] sm:$0x1]  ;;  %v7681_v54 = vld [vmem:[%s9115_s3 + $0x10] sm:$0x3] }
  0xa7   : > { %6255 = vmatprep.mubr.msk.bf16.mxu0 %vm1073_vm3, %v7527_v2  ;;  %v7647_v49 = vsel %vm7041_vm7, %v5767_v51, %v3061_v4  ;;  %v3063_v48 = vrot.slane %v3061_v4, 4  ;;  %v3064_v31 = vrot.slane %v556_v22, 5  ;;  %v7649_v5 = vcombine.low %v2439_v12, %v2449_v60 }
  0xa8   : > { %v2463_v2 = vsel %vm6701_vm4, %v2458_v28, %v2462_v40  ;;  %v2468_v0 = vrot.slane %v2467_v42, 4  ;;  %v3058_v33 = vsel %vm7041_vm7, %v3056_v15, %v3057_v20  ;;  %v9235_v39 = vshrl.u32 %v7172_v45, 16 }
  0xa9   : > { %v5783_v17 = vcombine.low %v3055_v62, %v3058_v33  ;;  %v3065_v44 = vsel %vm7041_vm7, %v3063_v48, %v3064_v31  ;;  %v9236_v27 = vshll.u32 %v7172_v45, 16  ;;  %v2484_v26 = vshll.u32 %v7187_v11, 16 }
  0xaa   : > { %v2477_v14 = vrot.slane %v9235_v39, 4  ;;  %v2473_v22 = vsel %vm6701_vm4, %v2468_v0, %v2472_v55  ;;  %v5784_v32 = vcombine.low %v7647_v49, %v3065_v44  ;;  %v9237_v9 = vshrl.u32 %v7187_v11, 16 }
  0xab   : > { %v2480_v34 = vrot.slane %v9236_v27, 5  ;;  %v7669_v46 = vcombine.low %v2463_v2, %v2473_v22  ;;  %v2494_v53 = vshll.u32 %v559_v25, 16  ;;  %v9238_v18 = vshrl.u32 %v7198_v29, 16 }
  0xac   : > { %v2490_v6 = vrot.slane %v9237_v9, 4  ;;  %v2486_v12 = vrot.slane %v2484_v26, 5  ;;  %v9239_v16 = vshll.u32 %v7198_v29, 16  ;;  %v2508_v50 = vshll.u32 %v7207_v47, 16  ;;  %6294 = vmatmul.mubr.msk.bf16.gmra.mxu1 %vm1073_vm3, %v5782_v41 }
  0xad   : > { %v2481_v8 = vor.u32 %v2480_v34, %v2477_v14  ;;  %v2501_v1 = vrot.slane %v9238_v18, 4  ;;  %v9240_v52 = vshrl.u32 %v7207_v47, 16  ;;  %v2496_v37 = vrot.slane %v2494_v53, 5  ;;  %6297 = vmatprep.mubr.msk.bf16.mxu1 %vm1073_vm3, %v5783_v17 }
  0xae   : > { %v2504_v56 = vrot.slane %v9239_v16, 5  ;;  %6256 = vmatmul.mubr.msk.bf16.vlgmr.msra.gmra.mxu0 %vm1073_vm3, %v7541_v30  ;;  %v2518_v13 = vshll.u32 %v562_v58, 16  ;;  %v5768_v55 = vrot.slane %v7172_v45, 9  ;;  %v2491_v51 = vor.u32 %v2490_v6, %v2486_v12 }
  0xaf   : > { %v2514_v40 = vrot.slane %v9240_v52, 4  ;;  %v2482_v20 = vrot.slane %v2481_v8, 4  ;;  %6322 = vmatpush3.bf16.msra.mxu0 %v7496_v23  ;;  %6259 = vmatprep.mubr.msk.bf16.mxu0 %vm1073_vm3, %v7598_v43  ;;  %v2510_v28 = vrot.slane %v2508_v50, 5  ;;  %v3068_v42 = vrot.slane %v7187_v11, 5 }
  0xb0   : > { %v2505_v4 = vor.u32 %v2504_v56, %v2501_v1  ;;  %v2520_v41 = vrot.slane %v2518_v13, 5  ;;  %v3071_v62 = vrot.slane %v559_v25, 5  ;;  %v5769_v45 = vrot.slane %v7198_v29, 9  ;;  %6465 = vmatprep.subr.msk.bf16.mxu0 %vm1122_vm0, %v7681_v54  ;;  %v565_v25 = vld [vmem:[%s7018_s23 + $0x68] sm:$0x1] }
  0xb1   : > { %v2487_v30 = vsel %vm6701_vm4, %v2482_v20, %v2486_v12  ;;  %v2492_v23 = vrot.slane %v2491_v51, 4  ;;  %v2515_v15 = vor.u32 %v2514_v40, %v2510_v28  ;;  %v3069_v60 = vsel %vm7041_vm7, %v5768_v55, %v3068_v42  ;;  %v568_v1 = vld [vmem:[%s7018_s23 + $0x74] sm:$0x1] }
  0xb2   : > { %v2506_v43 = vrot.slane %v2505_v4, 4  ;;  %v3070_v11 = vrot.slane %v3068_v42, 4  ;;  %v3075_v49 = vrot.slane %v7207_v47, 5  ;;  %v3078_v48 = vrot.slane %v562_v58, 5  ;;  %v9246_v20 = vld [vmem:[#allocation13_spill] sm:$0xff] }
  0xb3   : > { %v9241_v31 = vshrl.u32 %v7233_v35, 16  ;;  %v2497_v0 = vsel %vm6701_vm4, %v2492_v23, %v2496_v37  ;;  %v2516_v33 = vrot.slane %v2515_v15, 4  ;;  %v9242_v17 = vshll.u32 %v7233_v35, 16 }
  0xb4   : > { %v2511_v29 = vsel %vm6701_vm4, %v2506_v43, %v2510_v28  ;;  %v5736_v39 = vcombine.low %v2487_v30, %v2497_v0  ;;  %v3072_v47 = vsel %vm7041_vm7, %v3070_v11, %v3071_v62  ;;  %v3076_v14 = vsel %vm7041_vm7, %v5769_v45, %v3075_v49  ;;  %6298 = vmatmul.mubr.msk.bf16.gmra.mxu1 %vm1073_vm3, %v5784_v32 }
  0xb5   : > { %v2525_v2 = vrot.slane %v9241_v31, 4  ;;  %v2528_v44 = vrot.slane %v9242_v17, 5  ;;  %v3077_v27 = vrot.slane %v3075_v49, 4  ;;  %v2521_v34 = vsel %vm6701_vm4, %v2516_v33, %v2520_v41 }
  0xb6   : > { %v5785_v22 = vcombine.low %v3069_v60, %v3072_v47  ;;  %v2532_v9 = vshll.u32 %v7236_v24, 16  ;;  %6260 = vmatmul.mubr.msk.bf16.gmra.mxu0 %vm1073_vm3, %v7609_v3  ;;  %v7719_v6 = vcombine.low %v2511_v29, %v2521_v34  ;;  %v9243_v8 = vshrl.u32 %v7236_v24, 16  ;;  %v9248_v47 = vld [vmem:[#allocation14_spill] sm:$0xff] }
  0xb7   : > { %v2529_v26 = vor.u32 %v2528_v44, %v2525_v2  ;;  %v3079_v58 = vsel %vm7041_vm7, %v3077_v27, %v3078_v48  ;;  %v2542_v18 = vshll.u32 %v565_v25, 16  ;;  %6263 = vmatprep.mubr.msk.bf16.mxu0 %vm1073_vm3, %v7649_v5  ;;  %v9244_v32 = vshrl.u32 %v7247_v61, 16 }
  0xb8   : > { %v2538_v53 = vrot.slane %v9243_v8, 4  ;;  %6301 = vmatprep.mubr.msk.bf16.mxu1 %vm1073_vm3, %v5785_v22  ;;  %v5786_v12 = vcombine.low %v3076_v14, %v3079_v58  ;;  %v2534_v3 = vrot.slane %v2532_v9, 5  ;;  %v9245_v52 = vshll.u32 %v7247_v61, 16  ;;  %v9251_v9 = vld [vmem:[#allocation15_spill] sm:$0xff] }
  0xb9   : > { %v2530_v16 = vrot.slane %v2529_v26, 4  ;;  %v2549_v56 = vrot.slane %v9244_v32, 4  ;;  %v2544_v50 = vrot.slane %v2542_v18, 5  ;;  %v2556_v37 = vshll.u32 %v9246_v20, 16 }
  0xba   : > { %v2552_v40 = vrot.slane %v9245_v52, 5  ;;  %v9247_v13 = vshrl.u32 %v9246_v20, 16  ;;  %v2539_v51 = vor.u32 %v2538_v53, %v2534_v3  ;;  %v2566_v4 = vshll.u32 %v568_v1, 16  ;;  %v9255_v52 = vld [vmem:[#allocation16_spill] sm:$0xff] }
  0xbb   : > { %v2535_v5 = vsel %vm6701_vm4, %v2530_v16, %v2534_v3  ;;  %v5770_v28 = vrot.slane %v7233_v35, 9  ;;  %v2558_v30 = vrot.slane %v2556_v37, 5  ;;  %v3082_v41 = vrot.slane %v7236_v24, 5 }
  0xbc   : > { %v2562_v55 = vrot.slane %v9247_v13, 4  ;;  %v2553_v42 = vor.u32 %v2552_v40, %v2549_v56  ;;  %v3085_v62 = vrot.slane %v565_v25, 5  ;;  %v2540_v45 = vrot.slane %v2539_v51, 4  ;;  %6302 = vmatmul.mubr.msk.bf16.gmra.mxu1 %vm1073_vm3, %v5786_v12  ;;  %v571_v25 = vld [vmem:[%s7018_s23 + $0x80] sm:$0x1] }
  0xbd   : > { %v2568_v23 = vrot.slane %v2566_v4, 5  ;;  %v5771_v43 = vrot.slane %v7247_v61, 9  ;;  %v3089_v15 = vrot.slane %v9246_v20, 5  ;;  %v3083_v49 = vsel %vm7041_vm7, %v5770_v28, %v3082_v41 }
  0xbe   : > { %v2554_v60 = vrot.slane %v2553_v42, 4  ;;  %v2563_v11 = vor.u32 %v2562_v55, %v2558_v30  ;;  %v3084_v48 = vrot.slane %v3082_v41, 4  ;;  %v2545_v35 = vsel %vm6701_vm4, %v2540_v45, %v2544_v50  ;;  %6264 = vmatmul.mubr.msk.bf16.gmra.mxu0 %vm1073_vm3, %v7669_v46 }
  0xbf   : > { %v3090_v24 = vsel %vm7041_vm7, %v5771_v43, %v3089_v15  ;;  %v3091_v31 = vrot.slane %v3089_v15, 4  ;;  %v3092_v2 = vrot.slane %v568_v1, 5  ;;  %v5738_v61 = vcombine.low %v2535_v5, %v2545_v35  ;;  %6267 = vmatprep.mubr.msk.bf16.mxu0 %vm1073_vm3, %v5736_v39  ;;  %v574_v39 = vld [vmem:[%s7018_s23 + $0x8c] sm:$0x1] }
  0xc0   : > { %v2559_v0 = vsel %vm6701_vm4, %v2554_v60, %v2558_v30  ;;  %v2564_v29 = vrot.slane %v2563_v11, 4  ;;  %v3086_v33 = vsel %vm7041_vm7, %v3084_v48, %v3085_v62  ;;  %v9249_v46 = vshrl.u32 %v9248_v47, 16 }
  0xc1   : > { %v5787_v17 = vcombine.low %v3083_v49, %v3086_v33  ;;  %v3093_v44 = vsel %vm7041_vm7, %v3091_v31, %v3092_v2  ;;  %v9250_v27 = vshll.u32 %v9248_v47, 16  ;;  %v2580_v58 = vshll.u32 %v9251_v9, 16 }
  0xc2   : > { %v2573_v14 = vrot.slane %v9249_v46, 4  ;;  %v2569_v22 = vsel %vm6701_vm4, %v2564_v29, %v2568_v23  ;;  %v5788_v26 = vcombine.low %v3090_v24, %v3093_v44  ;;  %v9252_v8 = vshrl.u32 %v9251_v9, 16  ;;  %v9257_v24 = vld [vmem:[#allocation17_spill] sm:$0xff]  ;;  %v577_v29 = vld [vmem:[%s7018_s23 + $0x98] sm:$0x1] }
  0xc3   : > { %v2576_v34 = vrot.slane %v9250_v27, 5  ;;  %v5739_v18 = vcombine.low %v2559_v0, %v2569_v22  ;;  %6305 = vmatprep.mubr.msk.bf16.mxu1 %vm1073_vm3, %v5787_v17  ;;  %v2590_v12 = vshll.u32 %v571_v25, 16  ;;  %v9253_v16 = vshrl.u32 %v7304_v21, 16 }
  0xc4   : > { %v2586_v53 = vrot.slane %v9252_v8, 4  ;;  %v2582_v32 = vrot.slane %v2580_v58, 5  ;;  %v9254_v56 = vshll.u32 %v7304_v21, 16  ;;  %v2604_v40 = vshll.u32 %v9255_v52, 16  ;;  %6306 = vmatmul.mubr.msk.bf16.gmra.mxu1 %vm1073_vm3, %v5788_v26 }
  0xc5   : > { %v2577_v1 = vor.u32 %v2576_v34, %v2573_v14  ;;  %v2597_v3 = vrot.slane %v9253_v16, 4  ;;  %v9256_v20 = vshrl.u32 %v9255_v52, 16  ;;  %v2592_v55 = vrot.slane %v2590_v12, 5  ;;  %v9260_v34 = vld [vmem:[#allocation18_spill] sm:$0xff] }
  0xc6   : > { %v2600_v50 = vrot.slane %v9254_v56, 5  ;;  %v2614_v5 = vshll.u32 %v574_v39, 16  ;;  %v5772_v51 = vrot.slane %v9248_v47, 9  ;;  %v2587_v4 = vor.u32 %v2586_v53, %v2582_v32  ;;  %6268 = vmatmul.mubr.msk.bf16.gmra.mxu0 %vm1073_vm3, %v7719_v6 }
  0xc7   : > { %v2610_v37 = vrot.slane %v9256_v20, 4  ;;  %v2578_v13 = vrot.slane %v2577_v1, 4  ;;  %v2606_v42 = vrot.slane %v2604_v40, 5  ;;  %v3096_v30 = vrot.slane %v9251_v9, 5  ;;  %6271 = vmatprep.mubr.msk.bf16.mxu0 %vm1073_vm3, %v5738_v61 }
  0xc8   : > { %v2601_v28 = vor.u32 %v2600_v50, %v2597_v3  ;;  %v2616_v62 = vrot.slane %v2614_v5, 5  ;;  %v3099_v45 = vrot.slane %v571_v25, 5  ;;  %v5773_v23 = vrot.slane %v7304_v21, 9 }
  0xc9   : > { %v2583_v41 = vsel %vm6701_vm4, %v2578_v13, %v2582_v32  ;;  %v2588_v43 = vrot.slane %v2587_v4, 4  ;;  %v2611_v60 = vor.u32 %v2610_v37, %v2606_v42  ;;  %v3097_v11 = vsel %vm7041_vm7, %v5772_v51, %v3096_v30 }
  0xca   : > { %v2602_v15 = vrot.slane %v2601_v28, 4  ;;  %v3098_v49 = vrot.slane %v3096_v30, 4  ;;  %v3103_v48 = vrot.slane %v9255_v52, 5  ;;  %v3106_v35 = vrot.slane %v574_v39, 5  ;;  %v580_v39 = vld [vmem:[%s7018_s23 + $0xa4] sm:$0x1] }
  0xcb   : > { %v9258_v31 = vshrl.u32 %v9257_v24, 16  ;;  %v2593_v6 = vsel %vm6701_vm4, %v2588_v43, %v2592_v55  ;;  %v2612_v0 = vrot.slane %v2611_v60, 4  ;;  %v9259_v33 = vshll.u32 %v9257_v24, 16 }
  0xcc   : > { %v2607_v2 = vsel %vm6701_vm4, %v2602_v15, %v2606_v42  ;;  %v5740_v61 = vcombine.low %v2583_v41, %v2593_v6  ;;  %v3100_v17 = vsel %vm7041_vm7, %v3098_v49, %v3099_v45  ;;  %v3104_v44 = vsel %vm7041_vm7, %v5773_v23, %v3103_v48 }
  0xcd   : > { %v2621_v21 = vrot.slane %v9258_v31, 4  ;;  %v2624_v25 = vrot.slane %v9259_v33, 5  ;;  %v3105_v47 = vrot.slane %v3103_v48, 4  ;;  %v2617_v46 = vsel %vm6701_vm4, %v2612_v0, %v2616_v62 }
  0xce   : > { %v5789_v14 = vcombine.low %v3097_v11, %v3100_v17  ;;  %v2628_v22 = vshll.u32 %v9260_v34, 16  ;;  %v5741_v26 = vcombine.low %v2607_v2, %v2617_v46  ;;  %v9261_v58 = vshrl.u32 %v9260_v34, 16  ;;  %6272 = vmatmul.mubr.msk.bf16.gmra.mxu0 %vm1073_vm3, %v5739_v18 }
  0xcf   : > { %v2625_v27 = vor.u32 %v2624_v25, %v2621_v21  ;;  %v3107_v9 = vsel %vm7041_vm7, %v3105_v47, %v3106_v35  ;;  %v2638_v53 = vshll.u32 %v577_v29, 16  ;;  %v9262_v3 = vshrl.u32 %v7357_v7, 16  ;;  %6275 = vmatprep.mubr.msk.bf16.mxu0 %vm1073_vm3, %v5740_v61  ;;  %v583_v21 = vld [vmem:[%s7018_s23 + $0xb0] sm:$0x1] }
  0xd0   : > { %v2634_v8 = vrot.slane %v9261_v58, 4  ;;  %6309 = vmatprep.mubr.msk.bf16.mxu1 %vm1073_vm3, %v5789_v14  ;;  %v5790_v1 = vcombine.low %v3104_v44, %v3107_v9  ;;  %v2630_v16 = vrot.slane %v2628_v22, 5  ;;  %v9263_v50 = vshll.u32 %v7357_v7, 16  ;;  %v586_v14 = vld [vmem:[%s7018_s23 + $0xbc] sm:$0x1]  ;;  %s9037_s23 = scalar_lea.vmem %s9119_s7, %s5946_s18 }
  0xd1   : > { %v2626_v12 = vrot.slane %v2625_v27, 4  ;;  %v2645_v32 = vrot.slane %v9262_v3, 4  ;;  %v2640_v56 = vrot.slane %v2638_v53, 5  ;;  %v2652_v40 = vshll.u32 %v7365_v10, 16 }
  0xd2   : > { %v2648_v52 = vrot.slane %v9263_v50, 5  ;;  %v9264_v20 = vshrl.u32 %v7365_v10, 16  ;;  %6310 = vmatmul.mubr.msk.bf16.gmra.mxu1 %vm1073_vm3, %v5790_v1  ;;  %v2635_v55 = vor.u32 %v2634_v8, %v2630_v16  ;;  %v2662_v5 = vshll.u32 %v580_v39, 16 }
  0xd3   : > { %v2631_v13 = vsel %vm6701_vm4, %v2626_v12, %v2630_v16  ;;  %v5774_v51 = vrot.slane %v9257_v24, 9  ;;  %v2654_v28 = vrot.slane %v2652_v40, 5  ;;  %v3110_v42 = vrot.slane %v9260_v34, 5 }
  0xd4   : > { %v2658_v37 = vrot.slane %v9264_v20, 4  ;;  %v2649_v4 = vor.u32 %v2648_v52, %v2645_v32  ;;  %v3113_v30 = vrot.slane %v577_v29, 5  ;;  %v2636_v41 = vrot.slane %v2635_v55, 4 }
  0xd5   : > { %v2664_v62 = vrot.slane %v2662_v5, 5  ;;  %v5775_v18 = vrot.slane %v7357_v7, 9  ;;  %v3117_v45 = vrot.slane %v7365_v10, 5  ;;  %v3111_v15 = vsel %vm7041_vm7, %v5774_v51, %v3110_v42 }
  0xd6   : > { %v2650_v23 = vrot.slane %v2649_v4, 4  ;;  %v2659_v43 = vor.u32 %v2658_v37, %v2654_v28  ;;  %v3112_v60 = vrot.slane %v3110_v42, 4  ;;  %v2641_v11 = vsel %vm6701_vm4, %v2636_v41, %v2640_v56  ;;  %6276 = vmatmul.mubr.msk.bf16.gmra.mxu0 %vm1073_vm3, %v5741_v26  ;;  %v9271_v41 = vld [vmem:[#allocation3_spill] sm:$0xff] }
  0xd7   : > { %v3118_v49 = vsel %vm7041_vm7, %v5775_v18, %v3117_v45  ;;  %v3119_v48 = vrot.slane %v3117_v45, 4  ;;  %v3120_v35 = vrot.slane %v580_v39, 5  ;;  %v5742_v24 = vcombine.low %v2631_v13, %v2641_v11  ;;  %v7878_v18 = vld [vmem:[%s7867_s13] sm:$0xf] }
  0xd8   : > { %v2655_v7 = vsel %vm6701_vm4, %v2650_v23, %v2654_v28  ;;  %v2660_v10 = vrot.slane %v2659_v43, 4  ;;  %v3114_v31 = vsel %vm7041_vm7, %v3112_v60, %v3113_v30  ;;  %v9265_v0 = vshrl.u32 %v7386_v63, 16  ;;  %v7885_v43 = vld [vmem:[%s7867_s13 + $0x4] sm:$0xf] }
  0xd9   : > { %v5791_v6 = vcombine.low %v3111_v15, %v3114_v31  ;;  %v3121_v2 = vsel %vm7041_vm7, %v3119_v48, %v3120_v35  ;;  %v9266_v33 = vshll.u32 %v7386_v63, 16  ;;  %v2676_v44 = vshll.u32 %v7396_v59, 16  ;;  %6279 = vmatprep.mubr.msk.bf16.mxu0 %vm1073_vm3, %v5742_v24  ;;  %v7896_v48 = vld [vmem:[%s7867_s13 + $0x10] sm:$0xf] }
  0xda   : > { %v2669_v29 = vrot.slane %v9265_v0, 4  ;;  %v2665_v61 = vsel %vm6701_vm4, %v2660_v10, %v2664_v62  ;;  %v5792_v17 = vcombine.low %v3118_v49, %v3121_v2  ;;  %v9267_v47 = vshrl.u32 %v7396_v59, 16  ;;  %v7893_v49 = vld [vmem:[%s7867_s13 + $0xc] sm:$0xf]  ;;  %v7907_v2 = vld [vmem:[%s7867_s13 + $0x8] sm:$0x1] }
  0xdb   : > { %v2672_v25 = vrot.slane %v9266_v33, 5  ;;  %v5743_v27 = vcombine.low %v2655_v7, %v2665_v61  ;;  %6313 = vmatprep.mubr.msk.bf16.mxu1 %vm1073_vm3, %v5791_v6  ;;  %v2686_v22 = vshll.u32 %v583_v21, 16  ;;  %v9268_v9 = vshrl.u32 %v7407_v57, 16  ;;  %v6155_v6 = vpop.f32.mrf.mxu1 }
  0xdc   : > { %v2682_v46 = vrot.slane %v9267_v47, 4  ;;  %6314 = vmatmul.mubr.msk.bf16.gmra.mxu1 %vm1073_vm3, %v5792_v17  ;;  %v2678_v8 = vrot.slane %v2676_v44, 5  ;;  %v9269_v53 = vshll.u32 %v7407_v57, 16  ;;  %v2700_v1 = vshll.u32 %v7423_v38, 16 }
  0xdd   : > { %v2673_v34 = vor.u32 %v2672_v25, %v2669_v29  ;;  %v2693_v58 = vrot.slane %v9268_v9, 4  ;;  %v9270_v26 = vshrl.u32 %v7423_v38, 16  ;;  %v2688_v3 = vrot.slane %v2686_v22, 5  ;;  %v1452_v47 = vpop.f32.mrf.mxu1  ;;  %v7919_v22 = vld [vmem:[%s7867_s13 + $0x14] sm:$0x1] }
  0xde   : > { %v2696_v39 = vrot.slane %v9269_v53, 5  ;;  %v2710_v32 = vshll.u32 %v586_v14, 16  ;;  %v5776_v56 = vrot.slane %v7386_v63, 9  ;;  %v2683_v50 = vor.u32 %v2682_v46, %v2678_v8  ;;  %6280 = vmatmul.mubr.msk.bf16.gmra.mxu0 %vm1073_vm3, %v5743_v27 }
  0xdf   : > { %v2706_v12 = vrot.slane %v9270_v26, 4  ;;  %v2674_v16 = vrot.slane %v2673_v34, 4  ;;  %v2702_v40 = vrot.slane %v2700_v1, 5  ;;  %v3124_v20 = vrot.slane %v7396_v59, 5  ;;  %v6156_v53 = vpop.f32.mrf.mxu1 }
  0xe0   : > { %v2697_v52 = vor.u32 %v2696_v39, %v2693_v58  ;;  %v2712_v13 = vrot.slane %v2710_v32, 5  ;;  %v3127_v55 = vrot.slane %v583_v21, 5  ;;  %v5777_v5 = vrot.slane %v7407_v57, 9 }
  0xe1   : > { %v2679_v37 = vsel %vm6701_vm4, %v2674_v16, %v2678_v8  ;;  %v2684_v63 = vrot.slane %v2683_v50, 4  ;;  %v2707_v4 = vor.u32 %v2706_v12, %v2702_v40  ;;  %v3125_v59 = vsel %vm7041_vm7, %v5776_v56, %v3124_v20  ;;  %v6121_v12 = vpop.f32.mrf.mxu0  ;;  %v1455_v50 = vpop.f32.mrf.mxu1 }
  0xe2   : > { %v2698_v51 = vrot.slane %v2697_v52, 4  ;;  %v3126_v28 = vrot.slane %v3124_v20, 4  ;;  %v3131_v42 = vrot.slane %v7423_v38, 5  ;;  %v3134_v30 = vrot.slane %v586_v14, 5  ;;  %v7927_v52 = vld [vmem:[%s7867_s13 + $0x18] sm:$0xf] }
  0xe3   : > { %v4239_v62 = vsel %vm1122_vm0, %v9271_v41, 0  ;;  %v2689_v57 = vsel %vm6701_vm4, %v2684_v63, %v2688_v3  ;;  %v2708_v23 = vrot.slane %v2707_v4, 4  ;;  %v3757_v7 = vshrl.u32 %v7878_v18, 16  ;;  %v1160_v63 = vpop.f32.mrf.mxu0 }
  0xe4   : > { %v2703_v45 = vsel %vm6701_vm4, %v2698_v51, %v2702_v40  ;;  %6356 = vmatpush3.bf16.msra.mxu1 %v4239_v62  ;;  %v5744_v38 = vcombine.low %v2679_v37, %v2689_v57  ;;  %v3128_v15 = vsel %vm7041_vm7, %v3126_v28, %v3127_v55  ;;  %v3132_v60 = vsel %vm7041_vm7, %v5777_v5, %v3131_v42  ;;  %v7933_v55 = vld [vmem:[%s7867_s13 + $0x1c] sm:$0xf]  ;;  %v6159_v28 = vpop.f32.mrf.mxu1 }
  0xe5   : > { %v3133_v11 = vrot.slane %v3131_v42, 4  ;;  %v2713_v35 = vsel %vm6701_vm4, %v2708_v23, %v2712_v13  ;;  %v5793_v24 = vcombine.low %v3125_v59, %v3128_v15  ;;  %v3760_v10 = vshll.u32 %v7878_v18, 16  ;;  %v7938_v42 = vld [vmem:[%s7867_s13 + $0x24] sm:$0xf] }
  0xe6   : > { %6283 = vmatprep.mubr.msk.bf16.mxu0 %vm1073_vm3, %v5744_v38  ;;  %v3770_v21 = vshrl.u32 %v7885_v43, 16  ;;  %v3781_v29 = vshrl.u32 %v7893_v49, 16  ;;  %v3784_v33 = vshll.u32 %v7893_v49, 16  ;;  %v3794_v25 = vshrl.u32 %v7896_v48, 16  ;;  %v6122_v38 = vpop.f32.mrf.mxu0 }
  0xe7   : > { %v3135_v31 = vsel %vm7041_vm7, %v3133_v11, %v3134_v30  ;;  %6317 = vmatprep.mubr.msk.bf16.mxu1 %vm1073_vm3, %v5793_v24  ;;  %v5745_v61 = vcombine.low %v2703_v45, %v2713_v35  ;;  %v5812_v17 = vcombine.low %v7878_v18, %v7885_v43  ;;  %v3759_v44 = vrot.slane %v3757_v7, 4  ;;  %v7946_v45 = vld [vmem:[%s7867_s13 + $0x28] sm:$0xf]  ;;  %v1468_v11 = vpop.f32.mrf.mxu1 }
  0xe8   : > { %v5794_v0 = vcombine.low %v3132_v60, %v3135_v31  ;;  %v3762_v46 = vrot.slane %v3760_v10, 5  ;;  %v3766_v14 = vshll.u32 %v7885_v43, 16  ;;  %v3772_v27 = vrot.slane %v3770_v21, 4  ;;  %v7959_v31 = vld [vmem:[%s7867_s13 + $0x20] sm:$0x1] }
  0xe9   : > { %v3776_v34 = vshll.u32 %v7907_v2, 16  ;;  %v3783_v9 = vrot.slane %v3781_v29, 4  ;;  %v3786_v58 = vrot.slane %v3784_v33, 5  ;;  %v3790_v8 = vshll.u32 %v7896_v48, 16  ;;  %6284 = vmatmul.mubr.msk.bf16.gmra.mxu0 %vm1073_vm3, %v5745_v61 }
  0xea   : > { %6318 = vmatmul.mubr.msk.bf16.gmra.mxu1 %vm1073_vm3, %v5794_v0  ;;  %v3763_v39 = vor.u32 %v3762_v46, %v3759_v44  ;;  %v3768_v1 = vrot.slane %v3766_v14, 5  ;;  %v3796_v26 = vrot.slane %v3794_v25, 4  ;;  %v5813_v16 = vcombine.low %v7893_v49, %v7896_v48  ;;  %6323 = vmatprep.mubr.msk.bf16.mxu0 %vm1073_vm3, %v5812_v17  ;;  %v1163_v0 = vpop.f32.mrf.mxu0  ;;  %v6160_v25 = vpop.f32.mrf.mxu1  ;;  %v7970_v46 = vld [vmem:[%s7867_s13 + $0x2c] sm:$0x1] }
  0xeb   : > { %v3787_v3 = vor.u32 %v3786_v58, %v3783_v9  ;;  %v3792_v32 = vrot.slane %v3790_v8, 5  ;;  %v3800_v56 = vshll.u32 %v7919_v22, 16  ;;  %v7930_v40 = vadd.f32 %v6155_v6, %v6121_v12 }
  0xec   : > { %v3764_v20 = vrot.slane %v3763_v39, 4  ;;  %v3773_v37 = vor.u32 %v3772_v27, %v3768_v1  ;;  %v3778_v13 = vrot.slane %v3776_v34, 5  ;;  %v4661_v5 = vsel %vm1122_vm0, %v7681_v54, 0  ;;  %v1471_v58 = vpop.f32.mrf.mxu1  ;;  %v6125_v12 = vpop.f32.mrf.mxu0 }
  0xed   : > { %v3788_v51 = vrot.slane %v3787_v3, 4  ;;  %v3797_v4 = vor.u32 %v3796_v26, %v3792_v32  ;;  %v3802_v59 = vrot.slane %v3800_v56, 5  ;;  %v7942_v62 = vadd.f32 %v1452_v47, %v1160_v63 }
  0xee   : > { %v3769_v30 = vsel %vm6701_vm4, %v3764_v20, %v3768_v1  ;;  %v3774_v41 = vrot.slane %v3773_v37, 4  ;;  %v3805_v57 = vshrl.u32 %v7927_v52, 16  ;;  %v3808_v15 = vshll.u32 %v7927_v52, 16 }
  0xef   : > { %v3793_v54 = vsel %vm6701_vm4, %v3788_v51, %v3792_v32  ;;  %v3798_v23 = vrot.slane %v3797_v4, 4  ;;  %v3818_v60 = vshrl.u32 %v7933_v55, 16  ;;  %v7954_v24 = vadd.f32 %v6156_v53, %v6122_v38  ;;  %v1176_v4 = vpop.f32.mrf.mxu0  ;;  %v7996_v38 = vld [vmem:[%s7867_s13 + $0x3c] sm:$0xf] }
  0xf0   : > { %v3779_v35 = vsel %vm6701_vm4, %v3774_v41, %v3778_v13  ;;  %v3829_v7 = vshrl.u32 %v7938_v42, 16  ;;  %v3832_v10 = vshll.u32 %v7938_v42, 16  ;;  %v5814_v29 = vcombine.low %v7927_v52, %v7933_v55  ;;  %v7986_v13 = vld [vmem:[%s7867_s13 + $0x30] sm:$0xf]  ;;  %v6163_v41 = vpop.f32.mrf.mxu1 }
  0xf1   : > { %v5845_v21 = vcombine.low %v3769_v30, %v3779_v35  ;;  %v3803_v6 = vsel %vm6701_vm4, %v3798_v23, %v3802_v59  ;;  %v3842_v33 = vshrl.u32 %v7946_v45, 16  ;;  %v7967_v44 = vadd.f32 %v1455_v50, %v1163_v0  ;;  %6324 = vmatmul.mubr.msk.bf16.vlgmr.msra.gmra.mxu0 %vm1073_vm3, %v5813_v16  ;;  %v7989_v30 = vld [vmem:[%s7867_s13 + $0x34] sm:$0xf]  ;;  %v6126_v35 = vpop.f32.mrf.mxu0 }
  0xf2   : > { %v5846_v17 = vcombine.low %v3793_v54, %v3803_v6  ;;  %v3807_v47 = vrot.slane %v3805_v57, 4  ;;  %v3810_v14 = vrot.slane %v3808_v15, 5  ;;  %v3814_v27 = vshll.u32 %v7933_v55, 16  ;;  %6390 = vmatpush3.bf16.msra.mxu0 %v4661_v5  ;;  %6327 = vmatprep.mubr.msk.bf16.mxu0 %vm1073_vm3, %v5814_v29 }
  0xf3   : > { %6357 = vmatprep.mubr.msk.bf16.mxu1 %vm1073_vm3, %v5845_v21  ;;  %v3820_v34 = vrot.slane %v3818_v60, 4  ;;  %v3824_v9 = vshll.u32 %v7959_v31, 16  ;;  %v3831_v8 = vrot.slane %v3829_v7, 4  ;;  %v3834_v53 = vrot.slane %v3832_v10, 5  ;;  %v8003_v21 = vld [vmem:[%s7867_s13 + $0x40] sm:$0xf] }
  0xf4   : > { %6358 = vmatmul.mubr.msk.bf16.vlgmr.msra.gmra.mxu1 %vm1073_vm3, %v5846_v17  ;;  %v3838_v39 = vshll.u32 %v7946_v45, 16  ;;  %v3844_v1 = vrot.slane %v3842_v33, 4  ;;  %v9143_v26 = vrot.slane %v7896_v48, 5  ;;  %v3811_v16 = vor.u32 %v3810_v14, %v3807_v47  ;;  %v1179_v14 = vpop.f32.mrf.mxu0 }
  0xf5   : > { %v3816_v3 = vrot.slane %v3814_v27, 5  ;;  %v3848_v32 = vshll.u32 %v7970_v46, 16  ;;  %v7981_v56 = vadd.f32 %v6159_v28, %v6125_v12  ;;  %v5815_v50 = vcombine.low %v7938_v42, %v7946_v45 }
  0xf6   : > { %v3835_v20 = vor.u32 %v3834_v53, %v3831_v8  ;;  %v3840_v37 = vrot.slane %v3838_v39, 5  ;;  %v3812_v5 = vrot.slane %v3811_v16, 4  ;;  %v3826_v51 = vrot.slane %v3824_v9, 5  ;;  %v8020_v9 = vld [vmem:[%s7867_s13 + $0x38] sm:$0x1]  ;;  %v6129_v16 = vpop.f32.mrf.mxu0 }
  0xf7   : > { %v3821_v63 = vor.u32 %v3820_v34, %v3816_v3  ;;  %v3850_v59 = vrot.slane %v3848_v32, 5  ;;  %v7991_v57 = vadd.f32 %v1468_v11, %v1176_v4  ;;  %v5816_v23 = vcombine.low %v7986_v13, %v7989_v30  ;;  %v1484_v11 = vpop.f32.mrf.mxu1 }
  0xf8   : > { %v3836_v28 = vrot.slane %v3835_v20, 4  ;;  %v3845_v54 = vor.u32 %v3844_v1, %v3840_v37  ;;  %v3817_v15 = vsel %vm6701_vm4, %v3812_v5, %v3816_v3  ;;  %v3853_v7 = vshrl.u32 %v7986_v13, 16 }
  0xf9   : > { %v3822_v60 = vrot.slane %v3821_v63, 4  ;;  %v3856_v10 = vshll.u32 %v7986_v13, 16  ;;  %v8007_v29 = vadd.f32 %v6160_v25, %v6126_v35  ;;  %v3866_v33 = vshrl.u32 %v7989_v30, 16  ;;  %6328 = vmatmul.mubr.msk.bf16.gmra.mxu0 %vm1073_vm3, %v5815_v50  ;;  %v6164_v25 = vpop.f32.mrf.mxu1 }
  0xfa   : > { %v3841_v6 = vsel %vm6701_vm4, %v3836_v28, %v3840_v37  ;;  %v3846_v0 = vrot.slane %v3845_v54, 4  ;;  %v8012_v17 = vrot.slane %v9143_v26, 4  ;;  %v3877_v27 = vshrl.u32 %v7996_v38, 16  ;;  %6331 = vmatprep.mubr.msk.bf16.mxu0 %vm1073_vm3, %v5816_v23 }
  0xfb   : > { %v3827_v47 = vsel %vm6701_vm4, %v3822_v60, %v3826_v51  ;;  %v3880_v34 = vshll.u32 %v7996_v38, 16  ;;  %v8024_v39 = vadd.f32 %v1471_v58, %v1179_v14  ;;  %v3890_v1 = vshrl.u32 %v8003_v21, 16  ;;  %v1487_v20 = vpop.f32.mrf.mxu1  ;;  %v8036_v51 = vld [vmem:[%s7867_s13 + $0x44] sm:$0x1] }
  0xfc   : > { %v5847_v8 = vcombine.low %v3817_v15, %v3827_v47  ;;  %v3851_v53 = vsel %vm6701_vm4, %v3846_v0, %v3850_v59  ;;  %v5817_v3 = vcombine.low %v7996_v38, %v8003_v21  ;;  %v3855_v32 = vrot.slane %v3853_v7, 4  ;;  %9273 = vst [vmem:[#allocation5_spill] sm:$0xff] %v8036_v51  ;;  %v1192_v59 = vpop.f32.mrf.mxu0 }
  0xfd   : > { %v5848_v12 = vcombine.low %v3841_v6, %v3851_v53  ;;  %v3858_v50 = vrot.slane %v3856_v10, 5  ;;  %v8031_v37 = vadd.f32 %v6163_v41, %v6129_v16  ;;  %v3862_v58 = vshll.u32 %v7989_v30, 16  ;;  %v6167_v15 = vpop.f32.mrf.mxu1  ;;  %v8044_v10 = vld [vmem:[%s7867_s13 + $0x48] sm:$0xf]  ;;  %v8088_v41 = vld [vmem:[%s7867_s13 + $0x5c] sm:$0x1] }
  0xfe   : > { %6361 = vmatprep.mubr.msk.bf16.mxu1 %vm1073_vm3, %v5847_v8  ;;  %v3868_v5 = vrot.slane %v3866_v33, 4  ;;  %v3872_v63 = vshll.u32 %v8020_v9, 16  ;;  %v3879_v28 = vrot.slane %v3877_v27, 4  ;;  %v3882_v54 = vrot.slane %v3880_v34, 5  ;;  %v6130_v14 = vpop.f32.mrf.mxu0  ;;  %v8048_v27 = vld [vmem:[%s7867_s13 + $0x4c] sm:$0xf] }
  0xff   : > { %9272 = vst [vmem:[#allocation4_spill] sm:$0xff] %v8031_v37  ;;  %6362 = vmatmul.mubr.msk.bf16.gmra.mxu1 %vm1073_vm3, %v5848_v12  ;;  %v3859_v4 = vor.u32 %v3858_v50, %v3855_v32  ;;  %v3886_v23 = vshll.u32 %v8003_v21, 16  ;;  %v3864_v60 = vrot.slane %v3862_v58, 5  ;;  %v8041_v35 = vadd.f32 %v1484_v11, %v1192_v59  ;;  %v1500_v34 = vpop.f32.mrf.mxu1  ;;  %9279 = vst [vmem:[#allocation12_spill] sm:$0xff] %v8088_v41 }
 0x100   : > { %v3892_v7 = vrot.slane %v3890_v1, 4  ;;  %v3883_v0 = vor.u32 %v3882_v54, %v3879_v28  ;;  %v3896_v47 = vshll.u32 %v8036_v51, 16  ;;  %v3874_v53 = vrot.slane %v3872_v63, 5  ;;  %v1195_v58 = vpop.f32.mrf.mxu0  ;;  %v8066_v28 = vld [vmem:[%s7867_s13 + $0x58] sm:$0xf] }
 0x101   : > { %9274 = vst [vmem:[#allocation6_spill] sm:$0xff] %v8041_v35  ;;  %v3860_v6 = vrot.slane %v3859_v4, 4  ;;  %v3888_v33 = vrot.slane %v3886_v23, 5  ;;  %v3869_v8 = vor.u32 %v3868_v5, %v3864_v60  ;;  %v8050_v12 = vadd.f32 %v6164_v25, %v6130_v14  ;;  %6332 = vmatmul.mubr.msk.bf16.gmra.mxu0 %vm1073_vm3, %v5817_v3  ;;  %v8058_v4 = vld [vmem:[%s7867_s13 + $0x54] sm:$0xf]  ;;  %v6168_v59 = vpop.f32.mrf.mxu1 }
 0x102   : > { %v5818_v11 = vcombine.low %v8044_v10, %v8048_v27  ;;  %v3884_v16 = vrot.slane %v3883_v0, 4  ;;  %v3898_v50 = vrot.slane %v3896_v47, 5  ;;  %v8060_v63 = vadd.f32 %v1487_v20, %v1195_v58 }
 0x103   : > { %9275 = vst [vmem:[#allocation7_spill] sm:$0xff] %v8050_v12  ;;  %v3865_v1 = vsel %vm6701_vm4, %v3860_v6, %v3864_v60  ;;  %v3893_v32 = vor.u32 %v3892_v7, %v3888_v33  ;;  %v3870_v5 = vrot.slane %v3869_v8, 4  ;;  %v3901_v25 = vshrl.u32 %v8044_v10, 16  ;;  %v1503_v6 = vpop.f32.mrf.mxu1  ;;  %v8078_v8 = vld [vmem:[%s7867_s13 + $0x50] sm:$0x1] }
 0x104   : > { %9276 = vst [vmem:[#allocation9_spill] sm:$0xff] %v8060_v63  ;;  %6335 = vmatprep.mubr.msk.bf16.mxu0 %vm1073_vm3, %v5818_v11  ;;  %v3904_v3 = vshll.u32 %v8044_v10, 16  ;;  %v3889_v23 = vsel %vm6701_vm4, %v3884_v16, %v3888_v33  ;;  %v3914_v7 = vshrl.u32 %v8048_v27, 16  ;;  %v3925_v47 = vshrl.u32 %v8058_v4, 16  ;;  %9277 = vst [vmem:[#allocation10_spill] sm:$0xff] %v8078_v8  ;;  %v6133_v16 = vpop.f32.mrf.mxu0 }
 0x105   : > { %v3894_v60 = vrot.slane %v3893_v32, 4  ;;  %v3875_v0 = vsel %vm6701_vm4, %v3870_v5, %v3874_v53  ;;  %v3928_v14 = vshll.u32 %v8058_v4, 16  ;;  %v5819_v32 = vcombine.low %v8058_v4, %v8066_v28  ;;  %v6171_v26 = vpop.f32.mrf.mxu1 }
 0x106   : > { %v5849_v11 = vcombine.low %v3865_v1, %v3875_v0  ;;  %v3938_v58 = vshrl.u32 %v8066_v28, 16  ;;  %v8085_v20 = vadd.f32 %v6167_v15, %v6133_v16  ;;  %v3903_v53 = vrot.slane %v3901_v25, 4 }
 0x107   : > { %v3899_v33 = vsel %vm6701_vm4, %v3894_v60, %v3898_v50  ;;  %v3906_v5 = vrot.slane %v3904_v3, 5  ;;  %v3910_v1 = vshll.u32 %v8048_v27, 16  ;;  %v3916_v0 = vrot.slane %v3914_v7, 4  ;;  %v1208_v60 = vpop.f32.mrf.mxu0  ;;  %v1516_v63 = vpop.f32.mrf.mxu1 }
 0x108   : > { %v5850_v54 = vcombine.low %v3889_v23, %v3899_v33  ;;  %9278 = vst [vmem:[#allocation11_spill] sm:$0xff] %v8085_v20  ;;  %6365 = vmatprep.mubr.msk.bf16.mxu1 %vm1073_vm3, %v5849_v11  ;;  %v3920_v50 = vshll.u32 %v8078_v8, 16  ;;  %v3927_v61 = vrot.slane %v3925_v47, 4  ;;  %v8094_v15 = vadd.f32 %v1500_v34, %v1208_v60  ;;  %v8101_v47 = vld [vmem:[%s7867_s13 + $0x60] sm:$0xf] }
 0x109   : > { %v3907_v23 = vor.u32 %v3906_v5, %v3903_v53  ;;  %v3930_v25 = vrot.slane %v3928_v14, 5  ;;  %v3934_v3 = vshll.u32 %v8066_v28, 16  ;;  %6336 = vmatmul.mubr.msk.bf16.gmra.mxu0 %vm1073_vm3, %v5819_v32  ;;  %v3912_v7 = vrot.slane %v3910_v1, 5  ;;  %v6134_v20 = vpop.f32.mrf.mxu0  ;;  %9281 = vst [vmem:[#allocation13_spill] sm:$0xff] %v8101_v47  ;;  %v8104_v5 = vld [vmem:[%s7867_s13 + $0x64] sm:$0xf]  ;;  %v6172_v1 = vpop.f32.mrf.mxu1 }
 0x10a   : > { %6366 = vmatmul.mubr.msk.bf16.gmra.mxu1 %vm1073_vm3, %v5850_v54  ;;  %9280 = vst [vmem:[#allocation8_spill] sm:$0xff] %v8094_v15  ;;  %v3940_v33 = vrot.slane %v3938_v58, 4  ;;  %v3944_v16 = vshll.u32 %v8088_v41, 16  ;;  %v3922_v34 = vrot.slane %v3920_v50, 5  ;;  %9282 = vst [vmem:[#allocation14_spill] sm:$0xff] %v8104_v5  ;;  %v8106_v15 = vadd.f32 %v6168_v59, %v6134_v20 }
 0x10b   : > { %v3908_v54 = vrot.slane %v3907_v23, 4  ;;  %v3931_v53 = vor.u32 %v3930_v25, %v3927_v61  ;;  %v3936_v14 = vrot.slane %v3934_v3, 5  ;;  %v3917_v60 = vor.u32 %v3916_v0, %v3912_v7  ;;  %v1211_v32 = vpop.f32.mrf.mxu0  ;;  %v8115_v61 = vld [vmem:[%s7867_s13 + $0x6c] sm:$0xf]  ;;  %v8118_v25 = vld [vmem:[%s7867_s13 + $0x70] sm:$0xf] }
 0x10c   : > { %v3946_v11 = vrot.slane %v3944_v16, 5  ;;  %9283 = vst [vmem:[#allocation15_spill] sm:$0xff] %v8106_v15  ;;  %v5820_v58 = vcombine.low %v8101_v47, %v8104_v5  ;;  %v8112_v50 = vadd.f32 %v1503_v6, %v1211_v32  ;;  %9285 = vst [vmem:[#allocation17_spill] sm:$0xff] %v8115_v61  ;;  %v3949_v59 = vshrl.u32 %v8101_v47, 16 }
 0x10d   : > { %v3913_v12 = vsel %vm6701_vm4, %v3908_v54, %v3912_v7  ;;  %v3932_v35 = vrot.slane %v3931_v53, 4  ;;  %v3941_v23 = vor.u32 %v3940_v33, %v3936_v14  ;;  %9286 = vst [vmem:[#allocation18_spill] sm:$0xff] %v8118_v25  ;;  %v3918_v0 = vrot.slane %v3917_v60, 4  ;;  %v6137_v16 = vpop.f32.mrf.mxu0  ;;  %v8124_v7 = vpop.f32.mrf.mxu1  ;;  %v8133_v60 = vld [vmem:[%s7867_s13 + $0x68] sm:$0x1] }
 0x10e   : > { %9284 = vst [vmem:[#allocation16_spill] sm:$0xff] %v8112_v50  ;;  %6339 = vmatprep.mubr.msk.bf16.mxu0 %vm1073_vm3, %v5820_v58  ;;  %v3952_v20 = vshll.u32 %v8101_v47, 16  ;;  %v3962_v3 = vshrl.u32 %v8104_v5, 16  ;;  %9287 = vst [vmem:[#allocation3_spill] sm:$0xff] %v8124_v7  ;;  %v8128_v54 = vadd.f32 %v6171_v26, %v6137_v16  ;;  %v5821_v53 = vcombine.low %v8115_v61, %v8118_v25 }
 0x10f   : > { %v3937_v6 = vsel %vm6701_vm4, %v3932_v35, %v3936_v14  ;;  %v3942_v33 = vrot.slane %v3941_v23, 4  ;;  %9289 = vst [vmem:[#allocation20_spill] sm:$0xff] %v8133_v60  ;;  %v3923_v32 = vsel %vm6701_vm4, %v3918_v0, %v3922_v34  ;;  %v3973_v58 = vshrl.u32 %v8115_v61, 16  ;;  %v1224_v15 = vpop.f32.mrf.mxu0  ;;  %v6175_v35 = vpop.f32.mrf.mxu1 }
 0x110   : > { %9288 = vst [vmem:[#allocation19_spill] sm:$0xff] %v8128_v54  ;;  %v3976_v50 = vshll.u32 %v8115_v61, 16  ;;  %v3986_v7 = vshrl.u32 %v8118_v25, 16  ;;  %v5851_v14 = vcombine.low %v3913_v12, %v3923_v32  ;;  %v3951_v23 = vrot.slane %v3949_v59, 4  ;;  %v8146_v61 = vld [vmem:[%s7867_s13 + $0x74] sm:$0x1] }
 0x111   : > { %v3947_v26 = vsel %vm6701_vm4, %v3942_v33, %v3946_v11  ;;  %v3954_v16 = vrot.slane %v3952_v20, 5  ;;  %6340 = vmatmul.mubr.msk.bf16.gmra.mxu0 %vm1073_vm3, %v5821_v53  ;;  %v3958_v47 = vshll.u32 %v8104_v5, 16  ;;  %v3964_v34 = vrot.slane %v3962_v3, 4  ;;  %9290 = vst [vmem:[#allocation21_spill] sm:$0xff] %v8146_v61  ;;  %v6138_v37 = vpop.f32.mrf.mxu0  ;;  %v1532_v41 = vpop.f32.mrf.mxu1 }
 0x112   : > { %v5852_v54 = vcombine.low %v3937_v6, %v3947_v26  ;;  %v3968_v0 = vshll.u32 %v8133_v60, 16  ;;  %6369 = vmatprep.mubr.msk.bf16.mxu1 %vm1073_vm3, %v5851_v14  ;;  %v8149_v11 = vadd.f32 %v1516_v63, %v1224_v15  ;;  %v3975_v59 = vrot.slane %v3973_v58, 4  ;;  %v8157_v26 = vld [vmem:[%s7867_s13 + $0x78] sm:$0xf]  ;;  %v8163_v58 = vld [vmem:[%s7867_s13 + $0x7c] sm:$0xf] }
 0x113   : > { %v3955_v12 = vor.u32 %v3954_v16, %v3951_v23  ;;  %v3978_v20 = vrot.slane %v3976_v50, 5  ;;  %v3960_v3 = vrot.slane %v3958_v47, 5  ;;  %v3982_v33 = vshll.u32 %v8118_v25, 16  ;;  %v8154_v32 = vpop.f32.mrf.mxu0  ;;  %9293 = vst [vmem:[#allocation24_spill] sm:$0xff] %v8157_v26  ;;  %v6176_v14 = vpop.f32.mrf.mxu1  ;;  %9295 = vst [vmem:[#allocation26_spill] sm:$0xff] %v8163_v58 }
 0x114   : > { %9291 = vst [vmem:[#allocation22_spill] sm:$0xff] %v8149_v11  ;;  %6370 = vmatmul.mubr.msk.bf16.gmra.mxu1 %vm1073_vm3, %v5852_v54  ;;  %v3988_v53 = vrot.slane %v3986_v7, 4  ;;  %9292 = vst [vmem:[#allocation23_spill] sm:$0xff] %v8154_v32  ;;  %v3992_v15 = vshll.u32 %v8146_v61, 16  ;;  %v8160_v50 = vadd.f32 %v6172_v1, %v6138_v37  ;;  %v3970_v16 = vrot.slane %v3968_v0, 5 }
 0x115   : > { %v3956_v23 = vrot.slane %v3955_v12, 4  ;;  %v3979_v63 = vor.u32 %v3978_v20, %v3975_v59  ;;  %v3965_v54 = vor.u32 %v3964_v34, %v3960_v3  ;;  %v3984_v47 = vrot.slane %v3982_v33, 5  ;;  %v8168_v6 = vld [vmem:[%s7867_s13 + $0x84] sm:$0xf]  ;;  %v8170_v32 = vpop.f32.mrf.mxu1  ;;  %v8176_v1 = vld [vmem:[%s7867_s13 + $0x88] sm:$0xf]  ;;  %v6141_v11 = vpop.f32.mrf.mxu0 }
 0x116   : > { %9294 = vst [vmem:[#allocation25_spill] sm:$0xff] %v8160_v50  ;;  %v5822_v7 = vcombine.low %v8157_v26, %v8163_v58  ;;  %9296 = vst [vmem:[#allocation27_spill] sm:$0xff] %v8168_v6  ;;  %v3994_v20 = vrot.slane %v3992_v15, 5  ;;  %v3997_v37 = vshrl.u32 %v8157_v26, 16  ;;  %v4000_v33 = vshll.u32 %v8157_v26, 16 }
 0x117   : > { %9297 = vst [vmem:[#allocation28_spill] sm:$0xff] %v8170_v32  ;;  %v3961_v12 = vsel %vm6701_vm4, %v3956_v23, %v3960_v3  ;;  %v3980_v59 = vrot.slane %v3979_v63, 4  ;;  %9298 = vst [vmem:[#allocation29_spill] sm:$0xff] %v8176_v1  ;;  %v3966_v34 = vrot.slane %v3965_v54, 4  ;;  %v3989_v0 = vor.u32 %v3988_v53, %v3984_v47  ;;  %v8189_v63 = vld [vmem:[%s7867_s13 + $0x80] sm:$0x1]  ;;  %v1240_v26 = vpop.f32.mrf.mxu0 }
 0x118   : > { %6343 = vmatprep.mubr.msk.bf16.mxu0 %vm1073_vm3, %v5822_v7  ;;  %v4010_v50 = vshrl.u32 %v8163_v58, 16  ;;  %v8183_v61 = vadd.f32 %v6175_v35, %v6141_v11  ;;  %v5823_v3 = vcombine.low %v8168_v6, %v8176_v1  ;;  %v4021_v23 = vshrl.u32 %v8168_v6, 16  ;;  %9300 = vst [vmem:[#allocation31_spill] sm:$0xff] %v8189_v63 }
 0x119   : > { %v3985_v32 = vsel %vm6701_vm4, %v3980_v59, %v3984_v47  ;;  %v3971_v53 = vsel %vm6701_vm4, %v3966_v34, %v3970_v16  ;;  %v3990_v15 = vrot.slane %v3989_v0, 4  ;;  %v4024_v54 = vshll.u32 %v8168_v6, 16  ;;  %v6179_v47 = vpop.f32.mrf.mxu1  ;;  %v8203_v0 = vld [vmem:[%s7867_s13 + $0x8c] sm:$0x1]  ;;  %v6142_v6 = vpop.f32.mrf.mxu0 }
 0x11a   : > { %9299 = vst [vmem:[#allocation30_spill] sm:$0xff] %v8183_v61  ;;  %v4034_v7 = vshrl.u32 %v8176_v1, 16  ;;  %v5853_v35 = vcombine.low %v3961_v12, %v3971_v53  ;;  %6344 = vmatmul.mubr.msk.bf16.gmra.mxu0 %vm1073_vm3, %v5823_v3  ;;  %v3999_v11 = vrot.slane %v3997_v37, 4  ;;  %v4002_v59 = vrot.slane %v4000_v33, 5  ;;  %9302 = vst [vmem:[#allocation33_spill] sm:$0xff] %v8203_v0 }
 0x11b   : > { %v4006_v61 = vshll.u32 %v8163_v58, 16  ;;  %v3995_v25 = vsel %vm6701_vm4, %v3990_v15, %v3994_v20  ;;  %v4012_v60 = vrot.slane %v4010_v50, 4  ;;  %v4016_v16 = vshll.u32 %v8189_v63, 16  ;;  %v1548_v5 = vpop.f32.mrf.mxu1  ;;  %v8207_v15 = vpop.f32.mrf.mxu0 }
 0x11c   : > { %v8200_v34 = vadd.f32 %v1532_v41, %v1240_v26  ;;  %6373 = vmatprep.mubr.msk.bf16.mxu1 %vm1073_vm3, %v5853_v35  ;;  %v5854_v12 = vcombine.low %v3985_v32, %v3995_v25  ;;  %v4003_v37 = vor.u32 %v4002_v59, %v3999_v11  ;;  %v4023_v3 = vrot.slane %v4021_v23, 4  ;;  %9303 = vst [vmem:[#allocation34_spill] sm:$0xff] %v8207_v15  ;;  %v8210_v41 = vld [vmem:[%s7867_s13 + $0x90] sm:$0xf]  ;;  %v8219_v23 = vld [vmem:[%s7867_s13 + $0x94] sm:$0xf] }
 0x11d   : > { %v4008_v33 = vrot.slane %v4006_v61, 5  ;;  %v4018_v53 = vrot.slane %v4016_v16, 5  ;;  %v4026_v58 = vrot.slane %v4024_v54, 5  ;;  %v4030_v50 = vshll.u32 %v8176_v1, 16  ;;  %9304 = vst [vmem:[#allocation35_spill] sm:$0xff] %v8210_v41  ;;  %v8212_v26 = vpop.f32.mrf.mxu1  ;;  %9306 = vst [vmem:[#allocation37_spill] sm:$0xff] %v8219_v23  ;;  %v6145_v16 = vpop.f32.mrf.mxu0 }
 0x11e   : > { %9301 = vst [vmem:[#allocation32_spill] sm:$0xff] %v8200_v34  ;;  %v4036_v20 = vrot.slane %v4034_v7, 4  ;;  %6374 = vmatmul.mubr.msk.bf16.gmra.mxu1 %vm1073_vm3, %v5854_v12  ;;  %v4004_v35 = vrot.slane %v4003_v37, 4  ;;  %v4040_v32 = vshll.u32 %v8203_v0, 16  ;;  %v8216_v61 = vadd.f32 %v6176_v14, %v6142_v6  ;;  %v8225_v15 = vld [vmem:[%s7867_s13 + $0x9c] sm:$0xf] }
 0x11f   : > { %v4013_v25 = vor.u32 %v4012_v60, %v4008_v33  ;;  %v4027_v7 = vor.u32 %v4026_v58, %v4023_v3  ;;  %v4032_v11 = vrot.slane %v4030_v50, 5  ;;  %v5824_v59 = vcombine.low %v8210_v41, %v8219_v23  ;;  %9307 = vst [vmem:[#allocation38_spill] sm:$0xff] %v8225_v15  ;;  %v8227_v12 = vpop.f32.mrf.mxu1  ;;  %v8236_v50 = vld [vmem:[%s7867_s13 + $0xa0] sm:$0xf]  ;;  %v1256_v34 = vpop.f32.mrf.mxu0 }
 0x120   : > { %9305 = vst [vmem:[#allocation36_spill] sm:$0xff] %v8216_v61  ;;  %9308 = vst [vmem:[#allocation39_spill] sm:$0xff] %v8227_v12  ;;  %v4009_v60 = vsel %vm6701_vm4, %v4004_v35, %v4008_v33  ;;  %v4042_v14 = vrot.slane %v4040_v32, 5  ;;  %v4045_v37 = vshrl.u32 %v8210_v41, 16  ;;  %v4048_v58 = vshll.u32 %v8210_v41, 16 }
 0x121   : > { %v4014_v6 = vrot.slane %v4013_v25, 4  ;;  %v4028_v54 = vrot.slane %v4027_v7, 4  ;;  %v4037_v61 = vor.u32 %v4036_v20, %v4032_v11  ;;  %6347 = vmatprep.mubr.msk.bf16.mxu0 %vm1073_vm3, %v5824_v59  ;;  %v4058_v3 = vshrl.u32 %v8219_v23, 16  ;;  %9309 = vst [vmem:[#allocation40_spill] sm:$0xff] %v8236_v50  ;;  %v6183_v12 = vpop.f32.mrf.mxu1  ;;  %v8246_v32 = vld [vmem:[%s7867_s13 + $0x98] sm:$0x1]  ;;  %v6146_v1 = vpop.f32.mrf.mxu0 }
 0x122   : > { %v8240_v35 = vadd.f32 %v6179_v47, %v6145_v16  ;;  %v5825_v25 = vcombine.low %v8225_v15, %v8236_v50  ;;  %v4069_v20 = vshrl.u32 %v8225_v15, 16  ;;  %9311 = vst [vmem:[#allocation42_spill] sm:$0xff] %v8246_v32  ;;  %v4072_v0 = vshll.u32 %v8225_v15, 16 }
 0x123   : > { %v4019_v33 = vsel %vm6701_vm4, %v4014_v6, %v4018_v53  ;;  %v4033_v59 = vsel %vm6701_vm4, %v4028_v54, %v4032_v11  ;;  %v4038_v41 = vrot.slane %v4037_v61, 4  ;;  %v8251_v63 = vpop.f32.mrf.mxu1  ;;  %v4082_v47 = vshrl.u32 %v8236_v50, 16 }
 0x124   : > { %9310 = vst [vmem:[#allocation41_spill] sm:$0xff] %v8240_v35  ;;  %v5855_v7 = vcombine.low %v4009_v60, %v4019_v33  ;;  %6348 = vmatmul.mubr.msk.bf16.gmra.mxu0 %vm1073_vm3, %v5825_v25  ;;  %v4047_v53 = vrot.slane %v4045_v37, 4  ;;  %v4050_v16 = vrot.slane %v4048_v58, 5  ;;  %v4054_v6 = vshll.u32 %v8219_v23, 16  ;;  %v8263_v33 = vld [vmem:[%s7867_s13 + $0xa4] sm:$0x1]  ;;  %v8265_v25 = vpop.f32.mrf.mxu0 }
 0x125   : > { %v4043_v54 = vsel %vm6701_vm4, %v4038_v41, %v4042_v14  ;;  %v4060_v61 = vrot.slane %v4058_v3, 4  ;;  %v4064_v11 = vshll.u32 %v8246_v32, 16  ;;  %v8260_v60 = vadd.f32 %v1548_v5, %v1256_v34  ;;  %9313 = vst [vmem:[#allocation44_spill] sm:$0xff] %v8263_v33  ;;  %9314 = vst [vmem:[#allocation45_spill] sm:$0xff] %v8265_v25  ;;  %v8267_v35 = vpop.f32.mrf.mxu1  ;;  %v8271_v3 = vld [vmem:[%s7867_s13 + $0xa8] sm:$0xf] }
 0x126   : > { %6377 = vmatprep.mubr.msk.bf16.mxu1 %vm1073_vm3, %v5855_v7  ;;  %v5856_v37 = vcombine.low %v4033_v59, %v4043_v54  ;;  %v4051_v58 = vor.u32 %v4050_v16, %v4047_v53  ;;  %v4056_v23 = vrot.slane %v4054_v6, 5  ;;  %v4071_v7 = vrot.slane %v4069_v20, 4  ;;  %9315 = vst [vmem:[#allocation46_spill] sm:$0xff] %v8271_v3  ;;  %v8281_v20 = vld [vmem:[%s7867_s13 + $0xac] sm:$0xf]  ;;  %v6149_v6 = vpop.f32.mrf.mxu0 }
 0x127   : > { %9312 = vst [vmem:[#allocation43_spill] sm:$0xff] %v8260_v60  ;;  %v4066_v15 = vrot.slane %v4064_v11, 5  ;;  %v4074_v8 = vrot.slane %v4072_v0, 5  ;;  %v4078_v41 = vshll.u32 %v8236_v50, 16  ;;  %v4084_v14 = vrot.slane %v4082_v47, 4  ;;  %v8273_v5 = vpop.f32.mrf.mxu1  ;;  %9318 = vst [vmem:[#allocation49_spill] sm:$0xff] %v8281_v20 }
 0x128   : > { %9316 = vst [vmem:[#allocation47_spill] sm:$0xff] %v8273_v5  ;;  %6378 = vmatmul.mubr.msk.bf16.gmra.mxu1 %vm1073_vm3, %v5856_v37  ;;  %v4052_v34 = vrot.slane %v4051_v58, 4  ;;  %v4061_v25 = vor.u32 %v4060_v61, %v4056_v23  ;;  %v4088_v60 = vshll.u32 %v8263_v33, 16  ;;  %v8278_v59 = vadd.f32 %v8212_v26, %v6146_v1  ;;  %v8287_v54 = vld [vmem:[%s7867_s13 + $0xb4] sm:$0xf]  ;;  %v1272_v5 = vpop.f32.mrf.mxu0 }
 0x129   : > { %v4075_v53 = vor.u32 %v4074_v8, %v4071_v7  ;;  %v4080_v47 = vrot.slane %v4078_v41, 5  ;;  %v5826_v16 = vcombine.low %v8271_v3, %v8281_v20  ;;  %9319 = vst [vmem:[#allocation50_spill] sm:$0xff] %v8287_v54  ;;  %v8289_v11 = vpop.f32.mrf.mxu1  ;;  %v4093_v37 = vshrl.u32 %v8271_v3, 16  ;;  %v8298_v41 = vld [vmem:[%s7867_s13 + $0xb8] sm:$0xf] }
 0x12a   : > { %9317 = vst [vmem:[#allocation48_spill] sm:$0xff] %v8278_v59  ;;  %v4057_v61 = vsel %vm6701_vm4, %v4052_v34, %v4056_v23  ;;  %v4062_v1 = vrot.slane %v4061_v25, 4  ;;  %v4090_v26 = vrot.slane %v4088_v60, 5  ;;  %v4096_v8 = vshll.u32 %v8271_v3, 16  ;;  %v8310_v34 = vld [vmem:[%s7867_s13 + $0xb0] sm:$0x1]  ;;  %v6150_v33 = vpop.f32.mrf.mxu0 }
 0x12b   : > { %v4076_v58 = vrot.slane %v4075_v53, 4  ;;  %v4085_v0 = vor.u32 %v4084_v14, %v4080_v47  ;;  %6351 = vmatprep.mubr.msk.bf16.mxu0 %vm1073_vm3, %v5826_v16  ;;  %v4106_v7 = vshrl.u32 %v8281_v20, 16  ;;  %v8300_v59 = vpop.f32.mrf.mxu1  ;;  %v8304_v25 = vadd.f32 %v6183_v12, %v6149_v6  ;;  %9321 = vst [vmem:[#allocation52_spill] sm:$0xff] %v8310_v34 }
 0x12c   : > { %v4067_v23 = vsel %vm6701_vm4, %v4062_v1, %v4066_v15  ;;  %v5827_v60 = vcombine.low %v8287_v54, %v8298_v41  ;;  %v4117_v14 = vshrl.u32 %v8287_v54, 16  ;;  %v4120_v32 = vshll.u32 %v8287_v54, 16 }
 0x12d   : > { %9320 = vst [vmem:[#allocation51_spill] sm:$0xff] %v8304_v25  ;;  %v5857_v53 = vcombine.low %v4057_v61, %v4067_v23  ;;  %v4081_v16 = vsel %vm6701_vm4, %v4076_v58, %v4080_v47  ;;  %v4086_v3 = vrot.slane %v4085_v0, 4  ;;  %v8315_v50 = vpop.f32.mrf.mxu1  ;;  %v4130_v15 = vshrl.u32 %v8298_v41, 16  ;;  %v8328_v23 = vld [vmem:[%s7867_s13 + $0xbc] sm:$0x1] }
 0x12e   : > { %6352 = vmatmul.mubr.msk.bf16.gmra.mxu0 %vm1073_vm3, %v5827_v60  ;;  %v4095_v12 = vrot.slane %v4093_v37, 4  ;;  %v4098_v6 = vrot.slane %v4096_v8, 5  ;;  %v4102_v1 = vshll.u32 %v8281_v20, 16  ;;  %v4108_v47 = vrot.slane %v4106_v7, 4  ;;  %v8330_v60 = vpop.f32.mrf.mxu0 }
 0x12f   : > { %6381 = vmatprep.mubr.msk.bf16.mxu1 %vm1073_vm3, %v5857_v53  ;;  %v4091_v61 = vsel %vm6701_vm4, %v4086_v3, %v4090_v26  ;;  %v4112_v0 = vshll.u32 %v8310_v34, 16  ;;  %v8325_v58 = vadd.f32 %v8251_v63, %v1272_v5  ;;  %9323 = vst [vmem:[#allocation54_spill] sm:$0xff] %v8330_v60  ;;  %v8332_v25 = vpop.f32.mrf.mxu1  ;;  %v4119_v54 = vrot.slane %v4117_v14, 4 }
 0x130   : > { %v5858_v37 = vcombine.low %v4081_v16, %v4091_v61  ;;  %v4099_v8 = vor.u32 %v4098_v6, %v4095_v12  ;;  %v4104_v20 = vrot.slane %v4102_v1, 5  ;;  %v4122_v51 = vrot.slane %v4120_v32, 5  ;;  %v6189_v7 = vpop.f32.mrf.mxu0 }
 0x131   : > { %9322 = vst [vmem:[#allocation53_spill] sm:$0xff] %v8325_v58  ;;  %v4114_v53 = vrot.slane %v4112_v0, 5  ;;  %v4126_v3 = vshll.u32 %v8298_v41, 16  ;;  %v4132_v26 = vrot.slane %v4130_v15, 4  ;;  %v6227_v34 = vpop.f32.mrf.mxu1  ;;  %v4136_v58 = vshll.u32 %v8328_v23, 16 }
 0x132   : > { %6382 = vmatmul.mubr.msk.bf16.gmra.mxu1 %vm1073_vm3, %v5858_v37  ;;  %v4100_v63 = vrot.slane %v4099_v8, 4  ;;  %v4109_v5 = vor.u32 %v4108_v47, %v4104_v20  ;;  %v8338_v60 = vadd.f32 %v8267_v35, %v6150_v33  ;;  %v4123_v12 = vor.u32 %v4122_v51, %v4119_v54  ;;  %v1845_v6 = vpop.f32.mrf.mxu0 }
 0x133   : > { %v4128_v14 = vrot.slane %v4126_v3, 5  ;;  %v5877_v32 = vrot.slane %v7878_v18, 9  ;;  %v2187_v1 = vpop.f32.mrf.mxu1  ;;  %v4138_v0 = vrot.slane %v4136_v58, 5  ;;  %v4452_v47 = vrot.slane %v7885_v43, 5 }
 0x134   : > { %v4105_v15 = vsel %vm6701_vm4, %v4100_v63, %v4104_v20  ;;  %v4110_v61 = vrot.slane %v4109_v5, 4  ;;  %v4124_v37 = vrot.slane %v4123_v12, 4  ;;  %v4455_v35 = vrot.slane %v7907_v2, 5  ;;  %v6190_v16 = vpop.f32.mrf.mxu0 }
 0x135   : > { %v4133_v8 = vor.u32 %v4132_v26, %v4128_v14  ;;  %v1974_v33 = vadd.f32 %v6189_v7, %v7930_v40  ;;  %v6228_v51 = vpop.f32.mrf.mxu1  ;;  %v4453_v54 = vsel %vm7041_vm7, %v5877_v32, %v4452_v47  ;;  %v4454_v3 = vrot.slane %v4452_v47, 4 }
 0x136   : > { %v4115_v18 = vsel %vm6701_vm4, %v4110_v61, %v4114_v53  ;;  %v9324_v20 = vrot.slane %v7896_v48, 5  ;;  %v9325_v58 = vrot.slane %v7893_v49, 9  ;;  %v4129_v2 = vsel %vm6701_vm4, %v4124_v37, %v4128_v14  ;;  %v1848_v63 = vpop.f32.mrf.mxu0 }
 0x137   : > { %v5859_v26 = vcombine.low %v4105_v15, %v4115_v18  ;;  %v4134_v40 = vrot.slane %v4133_v8, 4  ;;  %v9326_v7 = vrot.slane %v7919_v22, 5  ;;  %v8364_v5 = vpop.f32.mrf.mxu1  ;;  %v4456_v49 = vsel %vm7041_vm7, %v4454_v3, %v4455_v35 }
 0x138   : > { %v4460_v43 = vsel %vm7041_vm7, %v9325_v58, %v9324_v20  ;;  %v1972_v12 = vadd.f32 %v1845_v6, %v7942_v62  ;;  %v8370_v32 = vadd.f32 %v8289_v11, %v1974_v33  ;;  %v5894_v14 = vcombine.low %v4453_v54, %v4456_v49  ;;  %v6193_v61 = vpop.f32.mrf.mxu0  ;;  %v9385_v19 = vld [vmem:[#allocation53_spill] sm:$0xff] }
 0x139   : > { %v4463_v53 = vsel %vm7041_vm7, %v8012_v17, %v9326_v7  ;;  %6385 = vmatprep.mubr.msk.bf16.mxu1 %vm1073_vm3, %v5859_v26  ;;  %v4139_v22 = vsel %vm6701_vm4, %v4134_v40, %v4138_v0  ;;  %v1975_v17 = vadd.f32 %v6190_v16, %v7954_v24  ;;  %v8377_v15 = vadd.f32 %v1848_v63, %v7967_v44  ;;  %v6231_v47 = vpop.f32.mrf.mxu1 }
 0x13a   : > { %v5895_v48 = vcombine.low %v4460_v43, %v4463_v53  ;;  %v5860_v37 = vcombine.low %v4129_v2, %v4139_v22  ;;  %v8380_v8 = vadd.f32 %v8300_v59, %v1972_v12  ;;  %v5879_v62 = vrot.slane %v7927_v52, 9  ;;  %6391 = vmatprep.mubr.msk.bf16.mxu0 %vm1073_vm3, %v5894_v14  ;;  %v1861_v16 = vpop.f32.mrf.mxu0 }
 0x13b   : > { %v4466_v11 = vrot.slane %v7933_v55, 5  ;;  %v4501_v6 = vrot.slane %v8066_v28, 5  ;;  %v8387_v36 = vadd.f32 %v8315_v50, %v1975_v17  ;;  %v4469_v24 = vrot.slane %v7959_v31, 5  ;;  %v2203_v0 = vpop.f32.mrf.mxu1  ;;  %v9335_v17 = vld [vmem:[#allocation12_spill] sm:$0xff] }
 0x13c   : > { %v1978_v44 = vadd.f32 %v6193_v61, %v7981_v56  ;;  %6386 = vmatmul.mubr.msk.bf16.gmra.mxu1 %vm1073_vm3, %v5860_v37  ;;  %6392 = vmatmul.mubr.msk.bf16.vlgmr.msra.gmra.mxu0 %vm1073_vm3, %v5895_v48  ;;  %v9327_v28 = vrot.slane %v7946_v45, 5  ;;  %v9328_v59 = vrot.slane %v7938_v42, 9  ;;  %v1976_v35 = vadd.f32 %v1861_v16, %v7991_v57  ;;  %v6194_v18 = vpop.f32.mrf.mxu0  ;;  %v9336_v37 = vld [vmem:[#allocation4_spill] sm:$0xff] }
 0x13d   : > { %v4467_v52 = vsel %vm7041_vm7, %v5879_v62, %v4466_v11  ;;  %v4468_v55 = vrot.slane %v4466_v11, 4  ;;  %v5881_v54 = vrot.slane %v7986_v13, 9  ;;  %v4480_v3 = vrot.slane %v7989_v30, 5  ;;  %v6232_v20 = vpop.f32.mrf.mxu1 }
 0x13e   : > { %v4474_v50 = vsel %vm7041_vm7, %v9328_v59, %v9327_v28  ;;  %v9329_v31 = vmov %v9327_v28  ;;  %v8404_v33 = vadd.f32 %v6227_v34, %v1978_v44  ;;  %v9330_v42 = vrot.slane %v7970_v46, 5  ;;  %v1864_v13 = vpop.f32.mrf.mxu0 }
 0x13f   : > { %v4475_v56 = vrot.slane %v9329_v31, 4  ;;  %v4470_v58 = vsel %vm7041_vm7, %v4468_v55, %v4469_v24  ;;  %v1979_v45 = vadd.f32 %v6194_v18, %v8007_v29  ;;  %v4483_v57 = vrot.slane %v8020_v9, 5  ;;  %v8420_v40 = vpop.f32.mrf.mxu1 }
 0x140   : > { %v5896_v34 = vcombine.low %v4467_v52, %v4470_v58  ;;  %v8416_v2 = vadd.f32 %v2187_v1, %v1976_v35  ;;  %v4481_v30 = vsel %vm7041_vm7, %v5881_v54, %v4480_v3  ;;  %v8423_v7 = vadd.f32 %v1864_v13, %v8024_v39  ;;  %v6197_v63 = vpop.f32.mrf.mxu0 }
 0x141   : > { %v4477_v43 = vsel %vm7041_vm7, %v4475_v56, %v9330_v42  ;;  %v8425_v46 = vadd.f32 %v6228_v51, %v1979_v45  ;;  %v4482_v53 = vrot.slane %v4480_v3, 4  ;;  %v9331_v29 = vrot.slane %v8003_v21, 5  ;;  %v9334_v51 = vld [vmem:[#allocation10_spill] sm:$0xff]  ;;  %v6235_v14 = vpop.f32.mrf.mxu1  ;;  %v9341_v3 = vld [vmem:[#allocation13_spill] sm:$0xff]  ;;  %v9343_v45 = vld [vmem:[#allocation20_spill] sm:$0xff] }
 0x142   : > { %v5897_v26 = vcombine.low %v4474_v50, %v4477_v43  ;;  %v9332_v9 = vrot.slane %v7996_v38, 9  ;;  %6395 = vmatprep.mubr.msk.bf16.mxu0 %vm1073_vm3, %v5896_v34  ;;  %v5883_v12 = vrot.slane %v8044_v10, 9  ;;  %v4494_v39 = vrot.slane %v8048_v27, 5  ;;  %v9338_v10 = vld [vmem:[#allocation5_spill] sm:$0xff]  ;;  %v1877_v16 = vpop.f32.mrf.mxu0  ;;  %v9342_v42 = vld [vmem:[#allocation14_spill] sm:$0xff]  ;;  %v9344_v34 = vld [vmem:[#allocation7_spill] sm:$0xff] }
 0x143   : > { %v9333_v49 = vmov %v9331_v29  ;;  %v4497_v22 = vrot.slane %v9334_v51, 5  ;;  %v4504_v61 = vrot.slane %v9335_v17, 5  ;;  %v4484_v38 = vsel %vm7041_vm7, %v4482_v53, %v4483_v57  ;;  %v2219_v28 = vpop.f32.mrf.mxu1 }
 0x144   : > { %v4488_v1 = vsel %vm7041_vm7, %v9332_v9, %v9331_v29  ;;  %v4489_v48 = vrot.slane %v9333_v49, 4  ;;  %v1982_v62 = vadd.f32 %v6197_v63, %v9336_v37  ;;  %v9337_v11 = vrot.slane %v8058_v4, 9  ;;  %6396 = vmatmul.mubr.msk.bf16.gmra.mxu0 %vm1073_vm3, %v5897_v26  ;;  %v9340_v4 = vld [vmem:[#allocation6_spill] sm:$0xff]  ;;  %v6198_v35 = vpop.f32.mrf.mxu0  ;;  %v9345_v63 = vld [vmem:[#allocation17_spill] sm:$0xff] }
 0x145   : > { %v5898_v24 = vcombine.low %v4481_v30, %v4484_v38  ;;  %v9339_v44 = vrot.slane %v9338_v10, 5  ;;  %v4495_v52 = vsel %vm7041_vm7, %v5883_v12, %v4494_v39  ;;  %v4496_v55 = vrot.slane %v4494_v39, 4  ;;  %v6236_v54 = vpop.f32.mrf.mxu1  ;;  %v9347_v39 = vld [vmem:[#allocation18_spill] sm:$0xff]  ;;  %v9351_v10 = vld [vmem:[#allocation31_spill] sm:$0xff] }
 0x146   : > { %v8447_v21 = vsel %vm7041_vm7, %v9337_v11, %v4501_v6  ;;  %v1980_v50 = vadd.f32 %v1877_v16, %v9340_v4  ;;  %v8457_v31 = vadd.f32 %v6231_v47, %v1982_v62  ;;  %v4503_v56 = vrot.slane %v4501_v6, 4  ;;  %v1880_v30 = vpop.f32.mrf.mxu0  ;;  %v9349_v62 = vld [vmem:[#allocation24_spill] sm:$0xff] }
 0x147   : > { %v4491_v27 = vsel %vm7041_vm7, %v4489_v48, %v9339_v44  ;;  %6399 = vmatprep.mubr.msk.bf16.mxu0 %vm1073_vm3, %v5898_v24  ;;  %v4498_v18 = vsel %vm7041_vm7, %v4496_v55, %v4497_v22  ;;  %v5885_v58 = vrot.slane %v9341_v3, 9  ;;  %v4508_v43 = vrot.slane %v9342_v42, 5  ;;  %v9346_v48 = vld [vmem:[#allocation9_spill] sm:$0xff] }
 0x148   : > { %v5899_v59 = vcombine.low %v4488_v1, %v4491_v27  ;;  %v4511_v57 = vrot.slane %v9343_v45, 5  ;;  %v1983_v26 = vadd.f32 %v6198_v35, %v9344_v34  ;;  %v8466_v13 = vadd.f32 %v2203_v0, %v1980_v50  ;;  %v8473_v1 = vpop.f32.mrf.mxu1  ;;  %v9348_v22 = vld [vmem:[#allocation21_spill] sm:$0xff]  ;;  %v9352_v27 = vld [vmem:[#allocation11_spill] sm:$0xff] }
 0x149   : > { %v5900_v47 = vcombine.low %v4495_v52, %v4498_v18  ;;  %v4505_v6 = vsel %vm7041_vm7, %v4503_v56, %v4504_v61  ;;  %v4509_v29 = vsel %vm7041_vm7, %v5885_v58, %v4508_v43  ;;  %v4510_v9 = vrot.slane %v4508_v43, 4  ;;  %v6201_v61 = vpop.f32.mrf.mxu0  ;;  %v9353_v18 = vld [vmem:[#allocation27_spill] sm:$0xff]  ;;  %v9354_v58 = vld [vmem:[#allocation8_spill] sm:$0xff]  ;;  %v9355_v45 = vld [vmem:[#allocation29_spill] sm:$0xff] }
 0x14a   : > { %v5901_v53 = vcombine.low %v8447_v21, %v4505_v6  ;;  %v5886_v49 = vrot.slane %v9345_v63, 9  ;;  %v8477_v12 = vadd.f32 %v1880_v30, %v9346_v48  ;;  %v8479_v0 = vadd.f32 %v6232_v20, %v1983_v26  ;;  %v6239_v37 = vpop.f32.mrf.mxu1  ;;  %v9350_v21 = vld [vmem:[#allocation26_spill] sm:$0xff] }
 0x14b   : > { %v4515_v51 = vrot.slane %v9347_v39, 5  ;;  %v4518_v17 = vrot.slane %v9348_v22, 5  ;;  %v4512_v38 = vsel %vm7041_vm7, %v4510_v9, %v4511_v57  ;;  %v5887_v11 = vrot.slane %v9349_v62, 9  ;;  %v1893_v55 = vpop.f32.mrf.mxu0  ;;  %v9357_v9 = vld [vmem:[#allocation15_spill] sm:$0xff] }
 0x14c   : > { %v4522_v24 = vrot.slane %v9350_v21, 5  ;;  %v4525_v44 = vrot.slane %v9351_v10, 5  ;;  %v1986_v16 = vadd.f32 %v6201_v61, %v9352_v27  ;;  %v5902_v52 = vcombine.low %v4509_v29, %v4512_v38  ;;  %v2235_v50 = vpop.f32.mrf.mxu1  ;;  %6400 = vmatmul.mubr.msk.bf16.gmra.mxu0 %vm1073_vm3, %v5899_v59  ;;  %v9356_v29 = vld [vmem:[#allocation33_spill] sm:$0xff]  ;;  %v9360_v10 = vld [vmem:[#allocation40_spill] sm:$0xff] }
 0x14d   : > { %v8491_v20 = vsel %vm7041_vm7, %v5886_v49, %v4515_v51  ;;  %v4517_v4 = vrot.slane %v4515_v51, 4  ;;  %v5888_v3 = vrot.slane %v9353_v18, 9  ;;  %v1984_v42 = vadd.f32 %v1893_v55, %v9354_v58  ;;  %6403 = vmatprep.mubr.msk.bf16.mxu0 %vm1073_vm3, %v5900_v47  ;;  %v6202_v34 = vpop.f32.mrf.mxu0  ;;  %v9361_v27 = vld [vmem:[#allocation44_spill] sm:$0xff] }
 0x14e   : > { %v8495_v56 = vsel %vm7041_vm7, %v5887_v11, %v4522_v24  ;;  %v4524_v35 = vrot.slane %v4522_v24, 4  ;;  %v8500_v43 = vadd.f32 %v6235_v14, %v1986_v16  ;;  %v4529_v57 = vrot.slane %v9355_v45, 5  ;;  %v6240_v6 = vpop.f32.mrf.mxu1  ;;  %v9364_v45 = vld [vmem:[#allocation50_spill] sm:$0xff] }
 0x14f   : > { %v8506_v26 = vsel %vm7041_vm7, %v4517_v4, %v4518_v17  ;;  %v4532_v59 = vrot.slane %v9356_v29, 5  ;;  %v1987_v63 = vadd.f32 %v6202_v34, %v9357_v9  ;;  %v8514_v14 = vadd.f32 %v2219_v28, %v1984_v42  ;;  %v1896_v48 = vpop.f32.mrf.mxu0  ;;  %v9358_v17 = vld [vmem:[#allocation16_spill] sm:$0xff]  ;;  %v9359_v28 = vld [vmem:[#allocation38_spill] sm:$0xff]  ;;  %v9365_v34 = vld [vmem:[#allocation23_spill] sm:$0xff] }
 0x150   : > { %v8510_v30 = vsel %vm7041_vm7, %v4524_v35, %v4525_v44  ;;  %v5903_v49 = vcombine.low %v8491_v20, %v8506_v26  ;;  %v2238_v39 = vpop.f32.mrf.mxu1  ;;  %v8522_v51 = vsel %vm7041_vm7, %v5888_v3, %v4529_v57  ;;  %v4531_v22 = vrot.slane %v4529_v57, 4  ;;  %v9362_v20 = vld [vmem:[#allocation19_spill] sm:$0xff]  ;;  %v9363_v3 = vld [vmem:[#allocation22_spill] sm:$0xff]  ;;  %v9367_v9 = vld [vmem:[#allocation37_spill] sm:$0xff] }
 0x151   : > { %v5904_v47 = vcombine.low %v8495_v56, %v8510_v30  ;;  %v8525_v61 = vadd.f32 %v1896_v48, %v9358_v17  ;;  %v8527_v38 = vadd.f32 %v6236_v54, %v1987_v63  ;;  %v5890_v62 = vrot.slane %v9359_v28, 9  ;;  %v6205_v11 = vpop.f32.mrf.mxu0  ;;  %v9366_v26 = vld [vmem:[#allocation3_spill] sm:$0xff] }
 0x152   : > { %v8532_v21 = vsel %vm7041_vm7, %v4531_v22, %v4532_v59  ;;  %v6243_v24 = vpop.f32.mrf.mxu1  ;;  %v4543_v44 = vrot.slane %v9360_v10, 5  ;;  %v4546_v16 = vrot.slane %v9361_v27, 5  ;;  %v1990_v55 = vadd.f32 %v6205_v11, %v9362_v20  ;;  %v9368_v22 = vld [vmem:[#allocation25_spill] sm:$0xff] }
 0x153   : > { %v5905_v4 = vcombine.low %v8522_v51, %v8532_v21  ;;  %v1909_v56 = vpop.f32.mrf.mxu0  ;;  %v5892_v57 = vrot.slane %v9364_v45, 9  ;;  %v1520_v30 = vadd.f32 %v9366_v26, %v9365_v34  ;;  %v4536_v63 = vrot.slane %v9367_v9, 5  ;;  %v9371_v34 = vld [vmem:[#allocation42_spill] sm:$0xff]  ;;  %v9372_v9 = vld [vmem:[#allocation32_spill] sm:$0xff] }
 0x154   : > { %v2251_v54 = vpop.f32.mrf.mxu1  ;;  %v8541_v35 = vsel %vm7041_vm7, %v5890_v62, %v4543_v44  ;;  %v4545_v18 = vrot.slane %v4543_v44, 4  ;;  %6404 = vmatmul.mubr.msk.bf16.gmra.mxu0 %vm1073_vm3, %v5901_v53  ;;  %v1988_v58 = vadd.f32 %v1909_v56, %v9363_v3  ;;  %v8545_v42 = vadd.f32 %v6239_v37, %v1990_v55  ;;  %v5007_v37 = vld [vmem:[%s9117_s5] sm:$0xf] }
 0x155   : > { %6407 = vmatprep.mubr.msk.bf16.mxu0 %vm1073_vm3, %v5902_v52  ;;  %v6206_v29 = vpop.f32.mrf.mxu0  ;;  %v4557_v53 = vrot.slane %v8298_v41, 5  ;;  %v4560_v62 = vrot.slane %v8328_v23, 5  ;;  %6466 = vmatprep.subr.msk.bf16.mxu1 %vm5057_vm8, %v5007_v37  ;;  %v5059_v20 = vsel %vm5057_vm8, %v5007_v37, 0  ;;  %v9369_v55 = vld [vmem:[#allocation35_spill] sm:$0xff]  ;;  %v4539_v26 = vrot.slane %v9371_v34, 5 }
 0x156   : > { %v6244_v59 = vpop.f32.mrf.mxu1  ;;  %v8554_v48 = vsel %vm7041_vm7, %v4545_v18, %v4546_v16  ;;  %v1991_v17 = vadd.f32 %v6206_v29, %v9368_v22  ;;  %v8561_v28 = vadd.f32 %v2235_v50, %v1988_v58  ;;  %v5889_v56 = vrot.slane %v9369_v55, 9  ;;  %6424 = vmatpush3.bf16.msra.mxu1 %v5059_v20  ;;  %v9370_v58 = vld [vmem:[#allocation30_spill] sm:$0xff]  ;;  %v9376_v55 = vld [vmem:[#allocation49_spill] sm:$0xff] }
 0x157   : > { %v5907_v52 = vcombine.low %v8541_v35, %v8554_v48  ;;  %v1912_v11 = vpop.f32.mrf.mxu0  ;;  %v8568_v44 = vsel %vm7041_vm7, %v5892_v57, %v4557_v53  ;;  %v4559_v41 = vrot.slane %v4557_v53, 4  ;;  %v4538_v18 = vrot.slane %v4536_v63, 4  ;;  %v9373_v22 = vld [vmem:[#allocation34_spill] sm:$0xff] }
 0x158   : > { %v2254_v10 = vpop.f32.mrf.mxu1  ;;  %v1989_v27 = vadd.f32 %v1912_v11, %v1520_v30  ;;  %v8570_v16 = vadd.f32 %v6240_v6, %v1991_v17  ;;  %v9374_v17 = vld [vmem:[#allocation28_spill] sm:$0xff]  ;;  %v4537_v11 = vsel %vm7041_vm7, %v5889_v56, %v4536_v63  ;;  %v9378_v56 = vld [vmem:[#allocation41_spill] sm:$0xff] }
 0x159   : > { %v6209_v50 = vpop.f32.mrf.mxu0  ;;  %v8575_v23 = vsel %vm7041_vm7, %v4559_v41, %v4560_v62  ;;  %v1536_v62 = vadd.f32 %v9374_v17, %v9373_v22  ;;  %v9377_v22 = vld [vmem:[#allocation46_spill] sm:$0xff] }
 0x15a   : > { %v6247_v3 = vpop.f32.mrf.mxu1  ;;  %v1994_v45 = vadd.f32 %v6209_v50, %v9370_v58  ;;  %v8578_v57 = vadd.f32 %v2238_v39, %v1989_v27  ;;  %v9375_v27 = vld [vmem:[#allocation36_spill] sm:$0xff]  ;;  %v5891_v17 = vrot.slane %v9377_v22, 9 }
 0x15b   : > { %v1925_v30 = vpop.f32.mrf.mxu0 }
 0x15c   : > { %v2267_v29 = vpop.f32.mrf.mxu1  ;;  %6408 = vmatmul.mubr.msk.bf16.gmra.mxu0 %vm1073_vm3, %v5903_v49  ;;  %v1992_v53 = vadd.f32 %v1925_v30, %v9372_v9  ;;  %v8585_v37 = vadd.f32 %v6243_v24, %v1994_v45  ;;  %v4540_v49 = vsel %vm7041_vm7, %v4538_v18, %v4539_v26  ;;  %v4550_v24 = vrot.slane %v9376_v55, 5 }
 0x15d   : > { %6411 = vmatprep.mubr.msk.bf16.mxu0 %vm1073_vm3, %v5904_v47  ;;  %v6210_v39 = vpop.f32.mrf.mxu0  ;;  %v5906_v47 = vcombine.low %v4537_v11, %v4540_v49  ;;  %v9382_v49 = vld [vmem:[#allocation39_spill] sm:$0xff] }
 0x15e   : > { %v6248_v41 = vpop.f32.mrf.mxu1  ;;  %v1995_v20 = vadd.f32 %v6210_v39, %v9375_v27  ;;  %v8593_v50 = vadd.f32 %v2251_v54, %v1992_v53  ;;  %v4552_v54 = vrot.slane %v4550_v24, 4  ;;  %v9379_v53 = vld [vmem:[#allocation52_spill] sm:$0xff]  ;;  %v4551_v51 = vsel %vm7041_vm7, %v5891_v17, %v4550_v24 }
 0x15f   : > { %v1928_v58 = vpop.f32.mrf.mxu0  ;;  %v4553_v27 = vrot.slane %v9379_v53, 5 }
 0x160   : > { %v2270_v45 = vpop.f32.mrf.mxu1  ;;  %v1993_v34 = vadd.f32 %v1928_v58, %v1536_v62  ;;  %v8598_v30 = vadd.f32 %v6244_v59, %v1995_v20  ;;  %v9380_v59 = vld [vmem:[#allocation43_spill] sm:$0xff]  ;;  %v9381_v20 = vld [vmem:[#allocation45_spill] sm:$0xff] }
 0x161   : > { %v6213_v9 = vpop.f32.mrf.mxu0  ;;  %v1552_v55 = vadd.f32 %v9382_v49, %v9381_v20  ;;  %v4554_v21 = vsel %vm7041_vm7, %v4552_v54, %v4553_v27  ;;  %v9386_v27 = vld [vmem:[#allocation54_spill] sm:$0xff] }
 0x162   : > { %v6251_v63 = vpop.f32.mrf.mxu1  ;;  %v1998_v6 = vadd.f32 %v6213_v9, %v9378_v56  ;;  %v8602_v39 = vadd.f32 %v2254_v10, %v1993_v34  ;;  %v9383_v34 = vld [vmem:[#allocation48_spill] sm:$0xff]  ;;  %v5908_v53 = vcombine.low %v4551_v51, %v4554_v21 }
 0x163   : > { %v1941_v18 = vpop.f32.mrf.mxu0 }
 0x164   : > { %v2283_v26 = vpop.f32.mrf.mxu1  ;;  %6412 = vmatmul.mubr.msk.bf16.gmra.mxu0 %vm1073_vm3, %v5905_v4  ;;  %v1996_v62 = vadd.f32 %v1941_v18, %v9380_v59  ;;  %v8610_v11 = vadd.f32 %v6247_v3, %v1998_v6  ;;  %v9384_v59 = vld [vmem:[#allocation51_spill] sm:$0xff] }
 0x165   : > { %6415 = vmatprep.mubr.msk.bf16.mxu0 %vm1073_vm3, %v5906_v47  ;;  %v6214_v10 = vpop.f32.mrf.mxu0 }
 0x166   : > { %v6252_v58 = vpop.f32.mrf.mxu1  ;;  %v1999_v9 = vadd.f32 %v6214_v10, %v9383_v34  ;;  %v8616_v22 = vadd.f32 %v2267_v29, %v1996_v62 }
 0x167   : > { %v1944_v4 = vpop.f32.mrf.mxu0 }
 0x168   : > { %v2286_v3 = vpop.f32.mrf.mxu1  ;;  %v1997_v6 = vadd.f32 %v1944_v4, %v1552_v55  ;;  %v8622_v56 = vadd.f32 %v6248_v41, %v1999_v9  ;;  %v9387_v55 = vld [vmem:[#allocation47_spill] sm:$0xff] }
 0x169   : > { %v6217_v18 = vpop.f32.mrf.mxu0  ;;  %v1568_v10 = vadd.f32 %v9387_v55, %v9386_v27 }
 0x16a   : > { %v6291_v47 = vpop.f32.mrf.mxu1  ;;  %v2002_v20 = vadd.f32 %v6217_v18, %v9384_v59  ;;  %v8625_v49 = vadd.f32 %v2270_v45, %v1997_v6  ;;  %v9388_v18 = vcombine.low %v8568_v44, %v8575_v23 }
 0x16b   : > { %v1957_v29 = vpop.f32.mrf.mxu0 }
 0x16c   : > { %v3271_v62 = vpop.f32.mrf.mxu1  ;;  %6416 = vmatmul.mubr.msk.bf16.gmra.mxu0 %vm1073_vm3, %v5907_v52  ;;  %v2000_v24 = vadd.f32 %v1957_v29, %v9385_v19  ;;  %v8632_v17 = vadd.f32 %v6251_v63, %v2002_v20  ;;  %v2299_v20 = vadd.f32 %v8332_v25, %v8377_v15 }
 0x16d   : > { %6419 = vmatprep.mubr.msk.bf16.mxu0 %vm1073_vm3, %v5908_v53  ;;  %v6218_v41 = vpop.f32.mrf.mxu0 }
 0x16e   : > { %v6292_v54 = vpop.f32.mrf.mxu1  ;;  %v2003_v45 = vadd.f32 %v6218_v41, %v8338_v60  ;;  %v8638_v34 = vadd.f32 %v2283_v26, %v2000_v24 }
 0x16f   : > { %v1960_v9 = vpop.f32.mrf.mxu0 }
 0x170   : > { %v8640_v51 = vpop.f32.mrf.mxu1  ;;  %v2001_v35 = vadd.f32 %v1960_v9, %v1568_v10  ;;  %v8642_v48 = vadd.f32 %v6252_v58, %v2003_v45 }
 0x171   : > { %v6257_v52 = vpop.f32.mrf.mxu0 }
 0x172   : > { %v6295_v63 = vpop.f32.mrf.mxu1  ;;  %v8644_v21 = vadd.f32 %v2286_v3, %v2001_v35  ;;  %v2978_v4 = vadd.f32 %v6257_v52, %v8370_v32 }
 0x173   : > { %v2849_v6 = vpop.f32.mrf.mxu0 }
 0x174   : > { %v3287_v53 = vpop.f32.mrf.mxu1  ;;  %6420 = vmatmul.mubr.msk.bf16.gmra.mxu0 %vm1073_vm3, %v9388_v18  ;;  %v2976_v60 = vadd.f32 %v2849_v6, %v8380_v8  ;;  %v8652_v26 = vadd.f32 %v6291_v47, %v2978_v4 }
 0x175   : > { %v6258_v59 = vpop.f32.mrf.mxu0 }
 0x176   : > { %v6296_v58 = vpop.f32.mrf.mxu1  ;;  %v2979_v3 = vadd.f32 %v6258_v59, %v8387_v36  ;;  %v8657_v29 = vadd.f32 %v3271_v62, %v2976_v60  ;;  %v2303_v62 = vadd.f32 %v8364_v5, %v8423_v7 }
 0x177   : > { %v2852_v32 = vpop.f32.mrf.mxu0 }
 0x178   : > { %v8659_v19 = vpop.f32.mrf.mxu1  ;;  %v8661_v24 = vadd.f32 %v2852_v32, %v2299_v20  ;;  %v8663_v44 = vadd.f32 %v6292_v54, %v2979_v3 }
 0x179   : > { %v6261_v23 = vpop.f32.mrf.mxu0 }
 0x17a   : > { %v6299_v8 = vpop.f32.mrf.mxu1  ;;  %v2982_v47 = vadd.f32 %v6261_v23, %v8404_v33 }
 0x17b   : > { %v2865_v41 = vpop.f32.mrf.mxu0 }
 0x17c   : > { %v3303_v27 = vpop.f32.mrf.mxu1  ;;  %v2980_v55 = vadd.f32 %v2865_v41, %v8416_v2  ;;  %v8667_v25 = vadd.f32 %v6295_v63, %v2982_v47 }
 0x17d   : > { %v6262_v15 = vpop.f32.mrf.mxu0 }
 0x17e   : > { %v6300_v36 = vpop.f32.mrf.mxu1  ;;  %v2983_v10 = vadd.f32 %v6262_v15, %v8425_v46  ;;  %v8672_v45 = vadd.f32 %v3287_v53, %v2980_v55  ;;  %v2307_v53 = vadd.f32 %v8420_v40, %v8477_v12 }
 0x17f   : > { %v2868_v54 = vpop.f32.mrf.mxu0 }
 0x180   : > { %v8674_v9 = vpop.f32.mrf.mxu1  ;;  %v8676_v35 = vadd.f32 %v2868_v54, %v2303_v62  ;;  %v8678_v33 = vadd.f32 %v6296_v58, %v2983_v10 }
 0x181   : > { %v6265_v52 = vpop.f32.mrf.mxu0 }
 0x182   : > { %v6303_v2 = vpop.f32.mrf.mxu1  ;;  %v2986_v63 = vadd.f32 %v6265_v52, %v8457_v31 }
 0x183   : > { %v2881_v4 = vpop.f32.mrf.mxu0 }
 0x184   : > { %v3319_v6 = vpop.f32.mrf.mxu1  ;;  %v2984_v18 = vadd.f32 %v2881_v4, %v8466_v13  ;;  %v8682_v5 = vadd.f32 %v6299_v8, %v2986_v63 }
 0x185   : > { %v6266_v7 = vpop.f32.mrf.mxu0 }
 0x186   : > { %v6304_v46 = vpop.f32.mrf.mxu1  ;;  %v2987_v60 = vadd.f32 %v6266_v7, %v8479_v0  ;;  %v8687_v59 = vadd.f32 %v3303_v27, %v2984_v18  ;;  %v2311_v27 = vadd.f32 %v8473_v1, %v8525_v61 }
 0x187   : > { %v2884_v58 = vpop.f32.mrf.mxu0 }
 0x188   : > { %v8689_v20 = vpop.f32.mrf.mxu1  ;;  %v8691_v3 = vadd.f32 %v2884_v58, %v2307_v53  ;;  %v8693_v31 = vadd.f32 %v6300_v36, %v2987_v60 }
 0x189   : > { %v6269_v32 = vpop.f32.mrf.mxu0 }
 0x18a   : > { %v6307_v13 = vpop.f32.mrf.mxu1  ;;  %v2990_v23 = vadd.f32 %v6269_v32, %v8500_v43 }
 0x18b   : > { %v2897_v8 = vpop.f32.mrf.mxu0 }
 0x18c   : > { %v3335_v47 = vpop.f32.mrf.mxu1  ;;  %v2988_v41 = vadd.f32 %v2897_v8, %v8514_v14  ;;  %v8697_v40 = vadd.f32 %v6303_v2, %v2990_v23 }
 0x18d   : > { %v6270_v12 = vpop.f32.mrf.mxu0 }
 0x18e   : > { %v6308_v0 = vpop.f32.mrf.mxu1  ;;  %v2991_v55 = vadd.f32 %v6270_v12, %v8527_v38  ;;  %v8702_v15 = vadd.f32 %v3319_v6, %v2988_v41 }
 0x18f   : > { %v2900_v36 = vpop.f32.mrf.mxu0 }
 0x190   : > { %v8704_v62 = vpop.f32.mrf.mxu1  ;;  %v8706_v10 = vadd.f32 %v2900_v36, %v2311_v27  ;;  %v8708_v43 = vadd.f32 %v6304_v46, %v2991_v55 }
 0x191   : > { %v6273_v54 = vpop.f32.mrf.mxu0 }
 0x192   : > { %v6311_v14 = vpop.f32.mrf.mxu1  ;;  %v2994_v52 = vadd.f32 %v6273_v54, %v8545_v42 }
 0x193   : > { %v2913_v2 = vpop.f32.mrf.mxu0 }
 0x194   : > { %v3351_v63 = vpop.f32.mrf.mxu1  ;;  %v2992_v4 = vadd.f32 %v2913_v2, %v8561_v28  ;;  %v8712_v1 = vadd.f32 %v6307_v13, %v2994_v52 }
 0x195   : > { %v6274_v61 = vpop.f32.mrf.mxu0 }
 0x196   : > { %v6312_v38 = vpop.f32.mrf.mxu1  ;;  %v2995_v6 = vadd.f32 %v6274_v61, %v8570_v16  ;;  %v8715_v18 = vadd.f32 %v3335_v47, %v2992_v4 }
 0x197   : > { %v2916_v7 = vpop.f32.mrf.mxu0 }
 0x198   : > { %v8717_v53 = vpop.f32.mrf.mxu1  ;;  %v8720_v46 = vadd.f32 %v2916_v7, %v8578_v57  ;;  %v8722_v60 = vadd.f32 %v6308_v0, %v2995_v6 }
 0x199   : > { %v6277_v42 = vpop.f32.mrf.mxu0 }
 0x19a   : > { %v2998_v58 = vadd.f32 %v6277_v42, %v8585_v37 }
 0x19b   : > { %v2929_v32 = vpop.f32.mrf.mxu0 }
 0x19c   : > { %v6315_v28 = vpop.f32.mrf.mxu1  ;;  %v2996_v13 = vadd.f32 %v2929_v32, %v8593_v50  ;;  %v8726_v23 = vadd.f32 %v6311_v14, %v2998_v58 }
 0x19d   : > { %v6278_v8 = vpop.f32.mrf.mxu0 }
 0x19e   : > { %v3367_v16 = vpop.f32.mrf.mxu1  ;;  %v2999_v47 = vadd.f32 %v6278_v8, %v8598_v30  ;;  %v8729_v41 = vadd.f32 %v3351_v63, %v2996_v13 }
 0x19f   : > { %v2932_v57 = vpop.f32.mrf.mxu0 }
 0x1a0   : > { %v6316_v12 = vpop.f32.mrf.mxu1  ;;  %v8732_v0 = vadd.f32 %v2932_v57, %v8602_v39  ;;  %v8734_v27 = vadd.f32 %v6312_v38, %v2999_v47 }
 0x1a1   : > { %v6281_v37 = vpop.f32.mrf.mxu0 }
 0x1a2   : > { %v3002_v55 = vadd.f32 %v6281_v37, %v8610_v11  ;;  %v8737_v36 = vpop.f32.mrf.mxu1 }
 0x1a3   : > { %9389 = vst [vmem:[#allocation10_spill] sm:$0xff] %v8737_v36  ;;  %v2945_v50 = vpop.f32.mrf.mxu0 }
 0x1a4   : > { %v3000_v54 = vadd.f32 %v2945_v50, %v8616_v22  ;;  %v8740_v14 = vadd.f32 %v6315_v28, %v3002_v55 }
 0x1a5   : > { %v6282_v30 = vpop.f32.mrf.mxu0 }
 0x1a6   : > { %v3003_v52 = vadd.f32 %v6282_v30, %v8622_v56  ;;  %v8743_v2 = vadd.f32 %v3367_v16, %v3000_v54 }
 0x1a7   : > { %v2948_v39 = vpop.f32.mrf.mxu0 }
 0x1a8   : > { %v8746_v4 = vadd.f32 %v2948_v39, %v8625_v49  ;;  %v8748_v61 = vadd.f32 %v6316_v12, %v3003_v52 }
 0x1a9   : > { %v6285_v11 = vpop.f32.mrf.mxu0 }
 0x1aa   : > { %v6319_v63 = vpop.f32.mrf.mxu1  ;;  %9390 = vst [vmem:[#allocation12_spill] sm:$0xff] %v8746_v4  ;;  %v3006_v6 = vadd.f32 %v6285_v11, %v8632_v17 }
 0x1ab   : > { %v2961_v7 = vpop.f32.mrf.mxu0 }
 0x1ac   : > { %v3383_v38 = vpop.f32.mrf.mxu1  ;;  %v3004_v22 = vadd.f32 %v2961_v7, %v8638_v34  ;;  %v8752_v42 = vadd.f32 %v6319_v63, %v3006_v6 }
 0x1ad   : > { %v6286_v58 = vpop.f32.mrf.mxu0 }
 0x1ae   : > { %v6320_v56 = vpop.f32.mrf.mxu1  ;;  %v3007_v28 = vadd.f32 %v6286_v58, %v8642_v48  ;;  %v8755_v32 = vadd.f32 %v3383_v38, %v3004_v22 }
 0x1af   : > { %v2964_v13 = vpop.f32.mrf.mxu0 }
 0x1b0   : > { %v8758_v49 = vadd.f32 %v2964_v13, %v8644_v21  ;;  %v8760_v16 = vadd.f32 %v6320_v56, %v3007_v28  ;;  %v8768_v57 = vpop.f32.mrf.mxu1 }
 0x1b1   : > { %v6325_v8 = vpop.f32.mrf.mxu0  ;;  %9392 = vst [vmem:[#allocation5_spill] sm:$0xff] %v8768_v57 }
 0x1b2   : > { %9391 = vst [vmem:[#allocation4_spill] sm:$0xff] %v8758_v49  ;;  %v8763_v17 = vadd.f32 %v6325_v8, %v8652_v26 }
 0x1b3   : > { %v3597_v47 = vpop.f32.mrf.mxu0 }
 0x1b4   : > { %v8766_v34 = vadd.f32 %v3597_v47, %v8657_v29  ;;  %v8775_v55 = vpop.f32.mrf.mxu1 }
 0x1b5   : > { %v6326_v12 = vpop.f32.mrf.mxu0 }
 0x1b6   : > { %v8771_v48 = vadd.f32 %v6326_v12, %v8663_v44  ;;  %v8783_v30 = vpop.f32.mrf.mxu1 }
 0x1b7   : > { %v8773_v37 = vpop.f32.mrf.mxu0 }
 0x1b8   : > { %v8790_v39 = vpop.f32.mrf.mxu1 }
 0x1b9   : > { %v6329_v21 = vpop.f32.mrf.mxu0 }
 0x1ba   : > { %v8778_v50 = vadd.f32 %v6329_v21, %v8667_v25  ;;  %v8798_v6 = vpop.f32.mrf.mxu1 }
 0x1bb   : > { %v3613_v26 = vpop.f32.mrf.mxu0 }
 0x1bc   : > { %v8781_v54 = vadd.f32 %v3613_v26, %v8672_v45 }
 0x1bd   : > { %v6330_v29 = vpop.f32.mrf.mxu0 }
 0x1be   : > { %v8786_v52 = vadd.f32 %v6330_v29, %v8678_v33 }
 0x1bf   : > { %v8788_v44 = vpop.f32.mrf.mxu0  ;;  %v8805_v58 = vpop.f32.mrf.mxu1 }
 0x1c1   : > { %v6333_v63 = vpop.f32.mrf.mxu0  ;;  %v8813_v13 = vpop.f32.mrf.mxu1 }
 0x1c2   : > { %v8793_v11 = vadd.f32 %v6333_v63, %v8682_v5 }
 0x1c3   : > { %v3629_v25 = vpop.f32.mrf.mxu0  ;;  %v8820_v12 = vpop.f32.mrf.mxu1 }
 0x1c4   : > { %v8796_v38 = vadd.f32 %v3629_v25, %v8687_v59 }
 0x1c5   : > { %v6334_v45 = vpop.f32.mrf.mxu0  ;;  %v8828_v29 = vpop.f32.mrf.mxu1 }
 0x1c6   : > { %v8801_v7 = vadd.f32 %v6334_v45, %v8693_v31 }
 0x1c7   : > { %v8803_v33 = vpop.f32.mrf.mxu0 }
 0x1c9   : > { %v6337_v22 = vpop.f32.mrf.mxu0 }
 0x1ca   : > { %v8808_v56 = vadd.f32 %v6337_v22, %v8697_v40  ;;  %v8835_v25 = vpop.f32.mrf.mxu1 }
 0x1cb   : > { %v3645_v5 = vpop.f32.mrf.mxu0 }
 0x1cc   : > { %v8811_v28 = vadd.f32 %v3645_v5, %v8702_v15 }
 0x1cd   : > { %v6338_v59 = vpop.f32.mrf.mxu0 }
 0x1ce   : > { %v8816_v8 = vadd.f32 %v6338_v59, %v8708_v43 }
 0x1cf   : > { %v8818_v31 = vpop.f32.mrf.mxu0 }
 0x1d1   : > { %v6341_v47 = vpop.f32.mrf.mxu0 }
 0x1d2   : > { %v8823_v21 = vadd.f32 %v6341_v47, %v8712_v1 }
 0x1d3   : > { %v3661_v40 = vpop.f32.mrf.mxu0 }
 0x1d4   : > { %v8826_v26 = vadd.f32 %v3661_v40, %v8715_v18  ;;  %v8843_v18 = vpop.f32.mrf.mxu1 }
 0x1d5   : > { %v6342_v15 = vpop.f32.mrf.mxu0 }
 0x1d6   : > { %v8831_v63 = vadd.f32 %v6342_v15, %v8722_v60  ;;  %v8850_v40 = vpop.f32.mrf.mxu1 }
 0x1d7   : > { %v8833_v43 = vpop.f32.mrf.mxu0 }
 0x1da   : > { %v6345_v45 = vpop.f32.mrf.mxu0 }
 0x1db   : > { %v8838_v22 = vadd.f32 %v6345_v45, %v8726_v23  ;;  %v8855_v23 = vpop.f32.mrf.mxu1 }
 0x1dc   : > { %v3677_v1 = vpop.f32.mrf.mxu0 }
 0x1dd   : > { %v8841_v5 = vadd.f32 %v3677_v1, %v8729_v41 }
 0x1de   : > { %v6346_v59 = vpop.f32.mrf.mxu0 }
 0x1df   : > { %v8846_v47 = vadd.f32 %v6346_v59, %v8734_v27  ;;  %v8863_v27 = vpop.f32.mrf.mxu1 }
 0x1e0   : > { %v8848_v60 = vpop.f32.mrf.mxu0 }
 0x1e1   : > { %9393 = vst [vmem:[#allocation6_spill] sm:$0xff] %v8846_v47  ;;  %v8867_v36 = vpop.f32.mrf.mxu1 }
 0x1e4   : > { %v6349_v15 = vpop.f32.mrf.mxu0 }
 0x1e5   : > { %v8853_v57 = vadd.f32 %v6349_v15, %v8740_v14 }
 0x1e6   : > { %v3693_v45 = vpop.f32.mrf.mxu0 }
 0x1e7   : > { %9394 = vst [vmem:[#allocation13_spill] sm:$0xff] %v8853_v57  ;;  %v8858_v41 = vadd.f32 %v3693_v45, %v8743_v2  ;;  %v8875_v2 = vpop.f32.mrf.mxu1 }
 0x1e8   : > { %v6350_v1 = vpop.f32.mrf.mxu0 }
 0x1e9   : > { %9395 = vst [vmem:[#allocation14_spill] sm:$0xff] %v8858_v41  ;;  %v8861_v49 = vadd.f32 %v6350_v1, %v8748_v61  ;;  %v8880_v1 = vpop.f32.mrf.mxu1 }
 0x1ea   : > { %v8865_v59 = vpop.f32.mrf.mxu0 }
 0x1eb   : > { %9396 = vst [vmem:[#allocation20_spill] sm:$0xff] %v8861_v49  ;;  %9397 = vst [vmem:[#allocation7_spill] sm:$0xff] %v8865_v59  ;;  %v8884_v59 = vpop.f32.mrf.mxu1 }
 0x1ee   : > { %v6353_v4 = vpop.f32.mrf.mxu0 }
 0x1ef   : > { %v8870_v14 = vadd.f32 %v6353_v4, %v8752_v42  ;;  %v4404_v4 = vadd.f32 %v8775_v55, %v8763_v17  ;;  %v3399_v42 = vadd.f32 %v8640_v51, %v8661_v24  ;;  %v4405_v17 = vadd.f32 %v8790_v39, %v8771_v48 }
 0x1f0   : > { %v3709_v15 = vpop.f32.mrf.mxu0 }
 0x1f1   : > { %9398 = vst [vmem:[#allocation17_spill] sm:$0xff] %v8870_v14  ;;  %v8873_v57 = vadd.f32 %v3709_v15, %v8755_v32  ;;  %v8893_v15 = vld [vmem:[%s9116_s4] ss:$0 sm:$0xff] }
 0x1f2   : > { %v6354_v45 = vpop.f32.mrf.mxu0 }
 0x1f3   : > { %9399 = vst [vmem:[#allocation9_spill] sm:$0xff] %v8873_v57  ;;  %v8878_v61 = vadd.f32 %v6354_v45, %v8760_v16  ;;  %v4402_v16 = vadd.f32 %v8783_v30, %v8766_v34 }
 0x1f4   : > { %v8882_v49 = vpop.f32.mrf.mxu0 }
 0x1f5   : > { %9400 = vst [vmem:[#allocation18_spill] sm:$0xff] %v8878_v61  ;;  %9401 = vst [vmem:[#allocation21_spill] sm:$0xff] %v8882_v49  ;;  %v3725_v61 = vadd.f32 %v8773_v37, %v3399_v42  ;;  %v8898_v49 = vpop.f32.mrf.mxu1  ;;  %v3403_v37 = vadd.f32 %v8659_v19, %v8676_v35 }
 0x1f7   : > { %v4403_v41 = vadd.f32 %v8798_v6, %v3725_v61  ;;  %v8904_v47 = vpop.f32.mrf.mxu1  ;;  %v3729_v6 = vadd.f32 %v8788_v44, %v3403_v37 }
 0x1f9   : > { %v4407_v44 = vadd.f32 %v8828_v29, %v3729_v6 }
 0x1fc   : > { %v6393_v32 = vpop.f32.mrf.mxu0 }
 0x1fd   : > { %v4826_v45 = vadd.f32 %v6393_v32, %v4404_v4  ;;  %v4408_v4 = vadd.f32 %v8805_v58, %v8778_v50  ;;  %v4406_v32 = vadd.f32 %v8813_v13, %v8781_v54 }
 0x1fe   : > { %v4697_v57 = vpop.f32.mrf.mxu0 }
 0x1ff   : > { %v4865_v51 = vadd.f32 %v8893_v15, %v4826_v45  ;;  %v4824_v24 = vadd.f32 %v4697_v57, %v4402_v16  ;;  %v4409_v45 = vadd.f32 %v8820_v12, %v8786_v52  ;;  %v3407_v52 = vadd.f32 %v8674_v9, %v8691_v3 }
 0x200   : > { %v6394_v55 = vpop.f32.mrf.mxu0 }
 0x201   : > { %v4827_v14 = vadd.f32 %v6394_v55, %v4405_v17  ;;  %v4863_v34 = vadd.f32 %v8893_v15, %v4824_v24  ;;  %v4897_v42 = vmul.f32 0.1, %v4865_v51  ;;  %v8917_v17 = vpop.f32.mrf.mxu1  ;;  %v3733_v6 = vadd.f32 %v8803_v33, %v3407_v52 }
 0x202   : > { %v4700_v30 = vpop.f32.mrf.mxu0 }
 0x203   : > { %v4866_v48 = vadd.f32 %v8893_v15, %v4827_v14  ;;  %v4825_v39 = vadd.f32 %v4700_v30, %v4403_v41  ;;  %v4895_v19 = vmul.f32 0.1, %v4863_v34  ;;  %v4929_v58 = vmax.f32 %v4865_v51, %v4897_v42  ;;  %v8925_v12 = vpop.f32.mrf.mxu1 }
 0x204   : > { %v6397_v57 = vpop.f32.mrf.mxu0  ;;  %v4412_v42 = vadd.f32 %v8835_v25, %v8793_v11  ;;  %v4411_v33 = vadd.f32 %v8855_v23, %v3733_v6 }
 0x205   : > { %v4898_v61 = vmul.f32 0.1, %v4866_v48  ;;  %v4830_v16 = vadd.f32 %v6397_v57, %v4408_v4  ;;  %v4864_v35 = vadd.f32 %v8893_v15, %v4825_v39  ;;  %v4927_v4 = vmax.f32 %v4863_v34, %v4895_v19  ;;  %v8934_v19 = vpop.f32.mrf.mxu1 }
 0x206   : > { %v4713_v50 = vpop.f32.mrf.mxu0 }
 0x207   : > { %v4930_v14 = vmax.f32 %v4866_v48, %v4898_v61  ;;  %v4869_v41 = vadd.f32 %v8893_v15, %v4830_v16  ;;  %v4828_v24 = vadd.f32 %v4713_v50, %v4406_v32  ;;  %v4896_v55 = vmul.f32 0.1, %v4864_v35 }
 0x208   : > { %v6398_v54 = vpop.f32.mrf.mxu0  ;;  %v4410_v32 = vadd.f32 %v8843_v18, %v8796_v38  ;;  %v4413_v38 = vadd.f32 %v8850_v40, %v8801_v7  ;;  %v3411_v7 = vadd.f32 %v8689_v20, %v8706_v10  ;;  %v4417_v20 = vadd.f32 %v8875_v2, %v8816_v8 }
 0x209   : > { %v4992_v13 = vpack.c.bf16 %v4930_v14, %v4929_v58  ;;  %v4867_v30 = vadd.f32 %v8893_v15, %v4828_v24  ;;  %v4831_v37 = vadd.f32 %v6398_v54, %v4409_v45  ;;  %v4928_v39 = vmax.f32 %v4864_v35, %v4896_v55 }
 0x20a   : > { %v4716_v51 = vpop.f32.mrf.mxu0  ;;  %v4901_v48 = vmul.f32 0.1, %v4869_v41 }
 0x20b   : > { %v4870_v57 = vadd.f32 %v8893_v15, %v4831_v37  ;;  %v4829_v29 = vadd.f32 %v4716_v51, %v4407_v44  ;;  %v4991_v61 = vpack.c.bf16 %v4928_v39, %v4927_v4  ;;  %v4899_v3 = vmul.f32 0.1, %v4867_v30  ;;  %v8943_v37 = vpop.f32.mrf.mxu1 }
 0x20c   : > { %v6401_v9 = vpop.f32.mrf.mxu0  ;;  %v4933_v25 = vmax.f32 %v4869_v41, %v4901_v48  ;;  %v4414_v51 = vadd.f32 %v8867_v36, %v8811_v28 }
 0x20d   : > { %v4902_v16 = vmul.f32 0.1, %v4870_v57  ;;  %v4868_v34 = vadd.f32 %v8893_v15, %v4829_v29  ;;  %v4834_v45 = vadd.f32 %v6401_v9, %v4412_v42  ;;  %6425 = vmatprep.mubr.msk.bf16.mxu1 %vm5008_vm9, %v4991_v61  ;;  %v4931_v24 = vmax.f32 %v4867_v30, %v4899_v3 }
 0x20e   : > { %v4729_v11 = vpop.f32.mrf.mxu0  ;;  %6426 = vmatmul.mubr.msk.bf16.vlgmr.msra.gmra.mxu1 %vm5008_vm9, %v4992_v13  ;;  %v4416_v13 = vadd.f32 %v8863_v27, %v8808_v56  ;;  %v3737_v56 = vadd.f32 %v8818_v31, %v3411_v7  ;;  %v8955_v27 = vpop.f32.mrf.mxu1  ;;  %v3415_v31 = vadd.f32 %v8704_v62, %v8720_v46  ;;  %v4418_v62 = vadd.f32 %v8898_v49, %v8826_v26 }
 0x20f   : > { %v4934_v35 = vmax.f32 %v4870_v57, %v4902_v16  ;;  %v4900_v50 = vmul.f32 0.1, %v4868_v34  ;;  %v4832_v58 = vadd.f32 %v4729_v11, %v4410_v32  ;;  %v4873_v18 = vadd.f32 %v8893_v15, %v4834_v45 }
 0x210   : > { %v6402_v14 = vpop.f32.mrf.mxu0  ;;  %v4415_v45 = vadd.f32 %v8880_v1, %v3737_v56  ;;  %v8964_v11 = vpop.f32.mrf.mxu1  ;;  %v3741_v46 = vadd.f32 %v8833_v43, %v3415_v31 }
 0x211   : > { %v4994_v55 = vpack.c.bf16 %v4934_v35, %v4933_v25  ;;  %v4932_v54 = vmax.f32 %v4868_v34, %v4900_v50  ;;  %v4871_v44 = vadd.f32 %v8893_v15, %v4832_v58  ;;  %v4835_v41 = vadd.f32 %v6402_v14, %v4413_v38 }
 0x212   : > { %v4732_v52 = vpop.f32.mrf.mxu0  ;;  %v4905_v40 = vmul.f32 0.1, %v4873_v18  ;;  %v4420_v35 = vadd.f32 %v8884_v59, %v8823_v21  ;;  %v4419_v43 = vadd.f32 %v8917_v17, %v3741_v46  ;;  %v4422_v17 = vadd.f32 %v8934_v19, %v8841_v5  ;;  %v9402_v5 = vld [vmem:[#allocation6_spill] sm:$0xff] }
 0x213   : > { %v4993_v4 = vpack.c.bf16 %v4932_v54, %v4931_v24  ;;  %v4833_v39 = vadd.f32 %v4732_v52, %v4411_v33  ;;  %v4874_v23 = vadd.f32 %v8893_v15, %v4835_v41  ;;  %v4903_v42 = vmul.f32 0.1, %v4871_v44 }
 0x214   : > { %v6405_v30 = vpop.f32.mrf.mxu0  ;;  %v4937_v36 = vmax.f32 %v4873_v18, %v4905_v40  ;;  %v4421_v24 = vadd.f32 %v8904_v47, %v8831_v63  ;;  %v3419_v47 = vadd.f32 %v8717_v53, %v8732_v0 }
 0x215   : > { %v4872_v48 = vadd.f32 %v8893_v15, %v4833_v39  ;;  %v4838_v57 = vadd.f32 %v6405_v30, %v4416_v13  ;;  %6429 = vmatprep.mubr.msk.bf16.mxu1 %vm5008_vm9, %v4993_v4  ;;  %v4906_v29 = vmul.f32 0.1, %v4874_v23  ;;  %v4935_v3 = vmax.f32 %v4871_v44, %v4903_v42 }
 0x216   : > { %v4745_v32 = vpop.f32.mrf.mxu0  ;;  %6430 = vmatmul.mubr.msk.bf16.gmra.mxu1 %vm5008_vm9, %v4994_v55  ;;  %v4371_v55 = vpop.f32.mrf.mxu1  ;;  %v3745_v56 = vadd.f32 %v8848_v60, %v3419_v47  ;;  %v4425_v60 = vadd.f32 %v8943_v37, %v9402_v5  ;;  %v9405_v37 = vld [vmem:[#allocation10_spill] sm:$0xff] }
 0x217   : > { %v4904_v10 = vmul.f32 0.1, %v4872_v48  ;;  %v4877_v6 = vadd.f32 %v8893_v15, %v4838_v57  ;;  %v4836_v61 = vadd.f32 %v4745_v32, %v4414_v51  ;;  %v4938_v28 = vmax.f32 %v4874_v23, %v4906_v29 }
 0x218   : > { %v6406_v9 = vpop.f32.mrf.mxu0  ;;  %v6384_v7 = vpop.f32.mrf.mxu1  ;;  %v4424_v51 = vadd.f32 %v8925_v12, %v8838_v22  ;;  %v4423_v19 = vadd.f32 %v8955_v27, %v3745_v56 }
 0x219   : > { %v4936_v16 = vmax.f32 %v4872_v48, %v4904_v10  ;;  %v4839_v34 = vadd.f32 %v6406_v9, %v4417_v20  ;;  %v4996_v8 = vpack.c.bf16 %v4938_v28, %v4937_v36  ;;  %v4875_v2 = vadd.f32 %v8893_v15, %v4836_v61 }
 0x21a   : > { %v4748_v25 = vpop.f32.mrf.mxu0  ;;  %v4909_v58 = vmul.f32 0.1, %v4877_v6 }
 0x21b   : > { %v4995_v50 = vpack.c.bf16 %v4936_v16, %v4935_v3  ;;  %v4878_v38 = vadd.f32 %v8893_v15, %v4839_v34  ;;  %v4837_v33 = vadd.f32 %v4748_v25, %v4415_v45  ;;  %v4907_v21 = vmul.f32 0.1, %v4875_v2 }
 0x21c   : > { %v6409_v18 = vpop.f32.mrf.mxu0  ;;  %v4941_v44 = vmax.f32 %v4877_v6, %v4909_v58  ;;  %v4374_v6 = vpop.f32.mrf.mxu1 }
 0x21d   : > { %v4910_v1 = vmul.f32 0.1, %v4878_v38  ;;  %v4842_v14 = vadd.f32 %v6409_v18, %v4420_v35  ;;  %6433 = vmatprep.mubr.msk.bf16.mxu1 %vm5008_vm9, %v4995_v50  ;;  %v4876_v59 = vadd.f32 %v8893_v15, %v4837_v33  ;;  %v4939_v40 = vmax.f32 %v4875_v2, %v4907_v21  ;;  %v9403_v35 = vld [vmem:[#allocation13_spill] sm:$0xff]  ;;  %v9404_v33 = vld [vmem:[#allocation12_spill] sm:$0xff] }
 0x21e   : > { %v4761_v54 = vpop.f32.mrf.mxu0  ;;  %6434 = vmatmul.mubr.msk.bf16.gmra.mxu1 %vm5008_vm9, %v4996_v8  ;;  %v6387_v8 = vpop.f32.mrf.mxu1  ;;  %v4428_v50 = vadd.f32 %v8964_v11, %v9403_v35  ;;  %v3423_v18 = vadd.f32 %v9405_v37, %v9404_v33 }
 0x21f   : > { %v4942_v41 = vmax.f32 %v4878_v38, %v4910_v1  ;;  %v4881_v52 = vadd.f32 %v8893_v15, %v4842_v14  ;;  %v4840_v13 = vadd.f32 %v4761_v54, %v4418_v62  ;;  %v4908_v49 = vmul.f32 0.1, %v4876_v59  ;;  %v9406_v1 = vld [vmem:[#allocation14_spill] sm:$0xff]  ;;  %v9407_v54 = vld [vmem:[#allocation7_spill] sm:$0xff] }
 0x220   : > { %v6410_v26 = vpop.f32.mrf.mxu0  ;;  %v4426_v14 = vadd.f32 %v4371_v55, %v9406_v1  ;;  %v4387_v11 = vpop.f32.mrf.mxu1 }
 0x221   : > { %v4998_v4 = vpack.c.bf16 %v4942_v41, %v4941_v44  ;;  %v4879_v39 = vadd.f32 %v8893_v15, %v4840_v13  ;;  %v4843_v63 = vadd.f32 %v6410_v26, %v4421_v24  ;;  %v4940_v23 = vmax.f32 %v4876_v59, %v4908_v49  ;;  %v9408_v13 = vld [vmem:[#allocation20_spill] sm:$0xff] }
 0x222   : > { %v4764_v30 = vpop.f32.mrf.mxu0  ;;  %v4913_v42 = vmul.f32 0.1, %v4881_v52  ;;  %v3749_v44 = vadd.f32 %v9407_v54, %v3423_v18  ;;  %v4429_v49 = vadd.f32 %v6384_v7, %v9408_v13 }
 0x223   : > { %v4882_v48 = vadd.f32 %v8893_v15, %v4843_v63  ;;  %v4841_v57 = vadd.f32 %v4764_v30, %v4419_v43  ;;  %v4997_v29 = vpack.c.bf16 %v4940_v23, %v4939_v40  ;;  %v4911_v20 = vmul.f32 0.1, %v4879_v39  ;;  %v9409_v30 = vld [vmem:[#allocation4_spill] sm:$0xff] }
 0x224   : > { %v6413_v32 = vpop.f32.mrf.mxu0  ;;  %v4945_v12 = vmax.f32 %v4881_v52, %v4913_v42 }
 0x225   : > { %v4914_v53 = vmul.f32 0.1, %v4882_v48  ;;  %v4880_v0 = vadd.f32 %v8893_v15, %v4841_v57  ;;  %v4846_v10 = vadd.f32 %v6413_v32, %v4424_v51  ;;  %6437 = vmatprep.mubr.msk.bf16.mxu1 %vm5008_vm9, %v4997_v29  ;;  %v4943_v16 = vmax.f32 %v4879_v39, %v4911_v20  ;;  %v9410_v51 = vld [vmem:[#allocation5_spill] sm:$0xff]  ;;  %v6388_v57 = vpop.f32.mrf.mxu1 }
 0x226   : > { %v4777_v22 = vpop.f32.mrf.mxu0  ;;  %6438 = vmatmul.mubr.msk.bf16.gmra.mxu1 %vm5008_vm9, %v4998_v4  ;;  %v3427_v42 = vadd.f32 %v9410_v51, %v9409_v30  ;;  %v9411_v29 = vld [vmem:[#allocation17_spill] sm:$0xff] }
 0x227   : > { %v4946_v61 = vmax.f32 %v4882_v48, %v4914_v53  ;;  %v4912_v36 = vmul.f32 0.1, %v4880_v0  ;;  %v4844_v28 = vadd.f32 %v4777_v22, %v4422_v17  ;;  %v4885_v9 = vadd.f32 %v8893_v15, %v4846_v10 }
 0x228   : > { %v6414_v3 = vpop.f32.mrf.mxu0  ;;  %v4427_v48 = vadd.f32 %v4374_v6, %v3749_v44  ;;  %v4432_v32 = vadd.f32 %v6387_v8, %v9411_v29  ;;  %v9414_v6 = vld [vmem:[#allocation18_spill] sm:$0xff] }
 0x229   : > { %v5000_v34 = vpack.c.bf16 %v4946_v61, %v4945_v12  ;;  %v4944_v31 = vmax.f32 %v4880_v0, %v4912_v36  ;;  %v4883_v45 = vadd.f32 %v8893_v15, %v4844_v28  ;;  %v4847_v2 = vadd.f32 %v6414_v3, %v4425_v60  ;;  %v9412_v12 = vld [vmem:[#allocation9_spill] sm:$0xff] }
 0x22a   : > { %v4780_v25 = vpop.f32.mrf.mxu0  ;;  %v4917_v27 = vmul.f32 0.1, %v4885_v9  ;;  %v4430_v61 = vadd.f32 %v4387_v11, %v9412_v12  ;;  %v9413_v36 = vld [vmem:[#allocation21_spill] sm:$0xff] }
 0x22b   : > { %v4999_v58 = vpack.c.bf16 %v4944_v31, %v4943_v16  ;;  %v4845_v38 = vadd.f32 %v4780_v25, %v4423_v19  ;;  %v4886_v62 = vadd.f32 %v8893_v15, %v4847_v2  ;;  %v4915_v24 = vmul.f32 0.1, %v4883_v45 }
 0x22c   : > { %v6417_v46 = vpop.f32.mrf.mxu0  ;;  %v4949_v55 = vmax.f32 %v4885_v9, %v4917_v27  ;;  %v3753_v28 = vadd.f32 %v9413_v36, %v3427_v42  ;;  %v4433_v19 = vadd.f32 %v6388_v57, %v9414_v6  ;;  %v4390_v9 = vpop.f32.mrf.mxu1 }
 0x22d   : > { %v4884_v21 = vadd.f32 %v8893_v15, %v4845_v38  ;;  %v4850_v59 = vadd.f32 %v6417_v46, %v4428_v50  ;;  %6441 = vmatprep.mubr.msk.bf16.mxu1 %vm5008_vm9, %v4999_v58  ;;  %v4918_v41 = vmul.f32 0.1, %v4886_v62  ;;  %v4947_v47 = vmax.f32 %v4883_v45, %v4915_v24 }
 0x22e   : > { %v4793_v52 = vpop.f32.mrf.mxu0  ;;  %6442 = vmatmul.mubr.msk.bf16.gmra.mxu1 %vm5008_vm9, %v5000_v34  ;;  %v4431_v50 = vadd.f32 %v4390_v9, %v3753_v28 }
 0x22f   : > { %v4916_v26 = vmul.f32 0.1, %v4884_v21  ;;  %v4889_v43 = vadd.f32 %v8893_v15, %v4850_v59  ;;  %v4848_v4 = vadd.f32 %v4793_v52, %v4426_v14  ;;  %v4950_v39 = vmax.f32 %v4886_v62, %v4918_v41 }
 0x230   : > { %v6418_v63 = vpop.f32.mrf.mxu0 }
 0x231   : > { %v4948_v40 = vmax.f32 %v4884_v21, %v4916_v26  ;;  %v4851_v23 = vadd.f32 %v6418_v63, %v4429_v49  ;;  %v5002_v17 = vpack.c.bf16 %v4950_v39, %v4949_v55  ;;  %v4887_v7 = vadd.f32 %v8893_v15, %v4848_v4 }
 0x232   : > { %v4796_v56 = vpop.f32.mrf.mxu0  ;;  %v4921_v53 = vmul.f32 0.1, %v4889_v43 }
 0x233   : > { %v5001_v20 = vpack.c.bf16 %v4948_v40, %v4947_v47  ;;  %v4890_v0 = vadd.f32 %v8893_v15, %v4851_v23  ;;  %v4849_v10 = vadd.f32 %v4796_v56, %v4427_v48  ;;  %v4919_v3 = vmul.f32 0.1, %v4887_v7 }
 0x234   : > { %v6421_v22 = vpop.f32.mrf.mxu0  ;;  %v4953_v31 = vmax.f32 %v4889_v43, %v4921_v53 }
 0x235   : > { %v4922_v5 = vmul.f32 0.1, %v4890_v0  ;;  %v4854_v60 = vadd.f32 %v6421_v22, %v4432_v32  ;;  %6445 = vmatprep.mubr.msk.bf16.mxu1 %vm5008_vm9, %v5001_v20  ;;  %v4888_v16 = vadd.f32 %v8893_v15, %v4849_v10  ;;  %v4951_v37 = vmax.f32 %v4887_v7, %v4919_v3 }
 0x236   : > { %v4809_v34 = vpop.f32.mrf.mxu0  ;;  %6446 = vmatmul.mubr.msk.bf16.gmra.mxu1 %vm5008_vm9, %v5002_v17 }
 0x237   : > { %v4954_v45 = vmax.f32 %v4890_v0, %v4922_v5  ;;  %v4893_v8 = vadd.f32 %v8893_v15, %v4854_v60  ;;  %v4852_v2 = vadd.f32 %v4809_v34, %v4430_v61  ;;  %v4920_v25 = vmul.f32 0.1, %v4888_v16 }
 0x238   : > { %v6422_v35 = vpop.f32.mrf.mxu0 }
 0x239   : > { %v5004_v58 = vpack.c.bf16 %v4954_v45, %v4953_v31  ;;  %v4891_v38 = vadd.f32 %v8893_v15, %v4852_v2  ;;  %v4855_v33 = vadd.f32 %v6422_v35, %v4433_v19  ;;  %v4952_v18 = vmax.f32 %v4888_v16, %v4920_v25 }
 0x23a   : > { %v4812_v27 = vpop.f32.mrf.mxu0  ;;  %v4925_v62 = vmul.f32 0.1, %v4893_v8 }
 0x23b   : > { %v4894_v46 = vadd.f32 %v8893_v15, %v4855_v33  ;;  %v4853_v1 = vadd.f32 %v4812_v27, %v4431_v50  ;;  %v5003_v14 = vpack.c.bf16 %v4952_v18, %v4951_v37  ;;  %v4923_v24 = vmul.f32 0.1, %v4891_v38 }
 0x23c   : > { %v4957_v54 = vmax.f32 %v4893_v8, %v4925_v62 }
 0x23d   : > { %v4926_v21 = vmul.f32 0.1, %v4894_v46  ;;  %v4892_v59 = vadd.f32 %v8893_v15, %v4853_v1  ;;  %6449 = vmatprep.mubr.msk.bf16.mxu1 %vm5008_vm9, %v5003_v14  ;;  %v4955_v41 = vmax.f32 %v4891_v38, %v4923_v24  ;;  %v9032_v15 = vld [vmem:[%s9118_s6] ss:$0 sm:$0xff] }
 0x23e   : > { %6450 = vmatmul.mubr.msk.bf16.gmra.mxu1 %vm5008_vm9, %v5004_v58 }
 0x23f   : > { %v4958_v44 = vmax.f32 %v4894_v46, %v4926_v21  ;;  %v4924_v11 = vmul.f32 0.1, %v4892_v59 }
 0x241   : > { %v5006_v52 = vpack.c.bf16 %v4958_v44, %v4957_v54  ;;  %v4956_v13 = vmax.f32 %v4892_v59, %v4924_v11 }
 0x243   : > { %v5005_v49 = vpack.c.bf16 %v4956_v13, %v4955_v41 }
 0x245   : > { %6453 = vmatprep.mubr.msk.bf16.mxu1 %vm5008_vm9, %v5005_v49 }
 0x246   : > { %6454 = vmatmul.mubr.msk.bf16.gmra.mxu1 %vm5008_vm9, %v5006_v52 }
 0x2ce   : > { %v6427_v26 = vpop.f32.mrf.mxu1 }
 0x2cf   : > { %v5330_v43 = vadd.f32 %v6427_v26, %v9032_v15 }
 0x2d0   : > { %v5095_v4 = vpop.f32.mrf.mxu1 }
 0x2d1   : > { %5362 = vst [vmem:[%s9037_s23 + $0x10] sm:$0xff] %v5330_v43  ;;  %v5328_v55 = vadd.f32 %v9032_v15, %v5095_v4 }
 0x2d2   : > { %v6428_v39 = vpop.f32.mrf.mxu1 }
 0x2d3   : > { %5360 = vst [vmem:[%s9037_s23] sm:$0xff] %v5328_v55  ;;  %v5331_v63 = vadd.f32 %v6428_v39, %v9032_v15 }
 0x2d4   : > { %v5098_v47 = vpop.f32.mrf.mxu1 }
 0x2d5   : > { %5363 = vst [vmem:[%s9037_s23 + $0x18] sm:$0xff] %v5331_v63  ;;  %v5329_v40 = vadd.f32 %v9032_v15, %v5098_v47 }
 0x2d6   : > { %v6431_v23 = vpop.f32.mrf.mxu1 }
 0x2d7   : > { %5361 = vst [vmem:[%s9037_s23 + $0x8] sm:$0xff] %v5329_v40  ;;  %v5334_v30 = vadd.f32 %v6431_v23, %v9032_v15 }
 0x2d8   : > { %v5111_v51 = vpop.f32.mrf.mxu1 }
 0x2d9   : > { %5366 = vst [vmem:[%s9037_s23 + $0x30] sm:$0xff] %v5334_v30  ;;  %v5332_v42 = vadd.f32 %v9032_v15, %v5111_v51 }
 0x2da   : > { %v6432_v48 = vpop.f32.mrf.mxu1 }
 0x2db   : > { %5364 = vst [vmem:[%s9037_s23 + $0x20] sm:$0xff] %v5332_v42  ;;  %v5335_v57 = vadd.f32 %v6432_v48, %v9032_v15 }
 0x2dc   : > { %v5114_v17 = vpop.f32.mrf.mxu1 }
 0x2dd   : > { %5367 = vst [vmem:[%s9037_s23 + $0x38] sm:$0xff] %v5335_v57  ;;  %v5333_v7 = vadd.f32 %v9032_v15, %v5114_v17 }
 0x2de   : > { %v6435_v56 = vpop.f32.mrf.mxu1 }
 0x2df   : > { %5365 = vst [vmem:[%s9037_s23 + $0x28] sm:$0xff] %v5333_v7  ;;  %v5338_v29 = vadd.f32 %v6435_v56, %v9032_v15 }
 0x2e0   : > { %v5127_v32 = vpop.f32.mrf.mxu1 }
 0x2e1   : > { %5370 = vst [vmem:[%s9037_s23 + $0x50] sm:$0xff] %v5338_v29  ;;  %v5336_v20 = vadd.f32 %v9032_v15, %v5127_v32 }
 0x2e2   : > { %v6436_v53 = vpop.f32.mrf.mxu1 }
 0x2e3   : > { %5368 = vst [vmem:[%s9037_s23 + $0x40] sm:$0xff] %v5336_v20  ;;  %v5339_v0 = vadd.f32 %v6436_v53, %v9032_v15 }
 0x2e4   : > { %v5130_v10 = vpop.f32.mrf.mxu1 }
 0x2e5   : > { %5371 = vst [vmem:[%s9037_s23 + $0x58] sm:$0xff] %v5339_v0  ;;  %v5337_v22 = vadd.f32 %v9032_v15, %v5130_v10 }
 0x2e6   : > { %v6439_v12 = vpop.f32.mrf.mxu1 }
 0x2e7   : > { %5369 = vst [vmem:[%s9037_s23 + $0x48] sm:$0xff] %v5337_v22  ;;  %v5342_v61 = vadd.f32 %v6439_v12, %v9032_v15 }
 0x2e8   : > { %v5143_v36 = vpop.f32.mrf.mxu1 }
 0x2e9   : > { %5374 = vst [vmem:[%s9037_s23 + $0x70] sm:$0xff] %v5342_v61  ;;  %v5340_v28 = vadd.f32 %v9032_v15, %v5143_v36 }
 0x2ea   : > { %v6440_v5 = vpop.f32.mrf.mxu1 }
 0x2eb   : > { %5372 = vst [vmem:[%s9037_s23 + $0x60] sm:$0xff] %v5340_v28  ;;  %v5343_v60 = vadd.f32 %v6440_v5, %v9032_v15 }
 0x2ec   : > { %v5146_v6 = vpop.f32.mrf.mxu1 }
 0x2ed   : > { %5375 = vst [vmem:[%s9037_s23 + $0x78] sm:$0xff] %v5343_v60  ;;  %v5341_v19 = vadd.f32 %v9032_v15, %v5146_v6 }
 0x2ee   : > { %v6443_v9 = vpop.f32.mrf.mxu1 }
 0x2ef   : > { %5373 = vst [vmem:[%s9037_s23 + $0x68] sm:$0xff] %v5341_v19  ;;  %v5346_v3 = vadd.f32 %v6443_v9, %v9032_v15 }
 0x2f0   : > { %v5159_v16 = vpop.f32.mrf.mxu1 }
 0x2f1   : > { %5378 = vst [vmem:[%s9037_s23 + $0x90] sm:$0xff] %v5346_v3  ;;  %v5344_v34 = vadd.f32 %v9032_v15, %v5159_v16 }
 0x2f2   : > { %v6444_v31 = vpop.f32.mrf.mxu1 }
 0x2f3   : > { %5376 = vst [vmem:[%s9037_s23 + $0x80] sm:$0xff] %v5344_v34  ;;  %v5347_v45 = vadd.f32 %v6444_v31, %v9032_v15 }
 0x2f4   : > { %v5162_v8 = vpop.f32.mrf.mxu1 }
 0x2f5   : > { %5379 = vst [vmem:[%s9037_s23 + $0x98] sm:$0xff] %v5347_v45  ;;  %v5345_v2 = vadd.f32 %v9032_v15, %v5162_v8 }
 0x2f6   : > { %v6447_v25 = vpop.f32.mrf.mxu1 }
 0x2f7   : > { %5377 = vst [vmem:[%s9037_s23 + $0x88] sm:$0xff] %v5345_v2  ;;  %v5350_v35 = vadd.f32 %v6447_v25, %v9032_v15 }
 0x2f8   : > { %v5175_v50 = vpop.f32.mrf.mxu1 }
 0x2f9   : > { %5382 = vst [vmem:[%s9037_s23 + $0xb0] sm:$0xff] %v5350_v35  ;;  %v5348_v58 = vadd.f32 %v9032_v15, %v5175_v50 }
 0x2fa   : > { %v6448_v38 = vpop.f32.mrf.mxu1 }
 0x2fb   : > { %5380 = vst [vmem:[%s9037_s23 + $0xa0] sm:$0xff] %v5348_v58  ;;  %v5351_v33 = vadd.f32 %v6448_v38, %v9032_v15 }
 0x2fc   : > { %v5178_v37 = vpop.f32.mrf.mxu1 }
 0x2fd   : > { %5383 = vst [vmem:[%s9037_s23 + $0xb8] sm:$0xff] %v5351_v33  ;;  %v5349_v18 = vadd.f32 %v9032_v15, %v5178_v37 }
 0x2fe   : > { %v6451_v27 = vpop.f32.mrf.mxu1 }
 0x2ff   : > { %5381 = vst [vmem:[%s9037_s23 + $0xa8] sm:$0xff] %v5349_v18  ;;  %v5354_v62 = vadd.f32 %v6451_v27, %v9032_v15 }
 0x300   : > { %v5191_v46 = vpop.f32.mrf.mxu1 }
 0x301   : > { %5386 = vst [vmem:[%s9037_s23 + $0xd0] sm:$0xff] %v5354_v62  ;;  %v5352_v1 = vadd.f32 %v9032_v15, %v5191_v46 }
 0x302   : > { %v6452_v14 = vpop.f32.mrf.mxu1 }
 0x303   : > { %5384 = vst [vmem:[%s9037_s23 + $0xc0] sm:$0xff] %v5352_v1  ;;  %v5355_v24 = vadd.f32 %v6452_v14, %v9032_v15 }
 0x304   : > { %v5194_v21 = vpop.f32.mrf.mxu1 }
 0x305   : > { %5387 = vst [vmem:[%s9037_s23 + $0xd8] sm:$0xff] %v5355_v24  ;;  %v5353_v59 = vadd.f32 %v9032_v15, %v5194_v21 }
 0x306   : > { %v6455_v54 = vpop.f32.mrf.mxu1 }
 0x307   : > { %5385 = vst [vmem:[%s9037_s23 + $0xc8] sm:$0xff] %v5353_v59  ;;  %v5358_v44 = vadd.f32 %v6455_v54, %v9032_v15 }
 0x308   : > { %v5207_v11 = vpop.f32.mrf.mxu1 }
 0x309   : > { %5390 = vst [vmem:[%s9037_s23 + $0xf0] sm:$0xff] %v5358_v44  ;;  %v5356_v41 = vadd.f32 %v9032_v15, %v5207_v11 }
 0x30a   : > { %v6456_v52 = vpop.f32.mrf.mxu1 }
 0x30b   : > { %5388 = vst [vmem:[%s9037_s23 + $0xe0] sm:$0xff] %v5356_v41  ;;  %v5359_v13 = vadd.f32 %v6456_v52, %v9032_v15 }
 0x30c   : > { %v5210_v49 = vpop.f32.mrf.mxu1 }
 0x30d   : > { %5391 = vst [vmem:[%s9037_s23 + $0xf8] sm:$0xff] %v5359_v13  ;;  %v5357_v26 = vadd.f32 %v9032_v15, %v5210_v49 }
 0x30f   : > { %5389 = vst [vmem:[%s9037_s23 + $0xe8] sm:$0xff] %v5357_v26 }
 0x310 PF: > { %s17_s26 = sadd.s32 1, %s6562_s26   ;;  %s9415_s24 = smov %s6558_s25 }
 0x311   : > { %p14_p5 = scmp.ge.s32.totalorder %s17_s26, 4   ;;  %s9416_s25 = smov %s9418_s27 }
 0x313   :  { %16 = sbr.rel (!%p14_p5) target bundleno = 2 (0x2), region = 109 }

</bundles_post_ra>
